<compile_context>
chip_gen: v7x
topology: tpu7x:2x2x1
jax: 0.10.0
libtpu: 0.0.40
codegen_flags: <defaults>
</compile_context>

<pallas_src>
import functools

import jax
import jax.numpy as jnp
from jax import lax
from jax.experimental import pallas as pl
from jax.experimental.pallas import tpu as pltpu


# ---------------------------------------------------------------------------
# Fused Inception kernel (one batch element per grid step, NHWC layout).
# ---------------------------------------------------------------------------

def _inception_kernel(ch1x1, ch3x3red, ch3x3, ch5x5red, ch5x5, pool_proj,
                      x_ref, wa_ref, sa_ref, w3_ref, s23_ref, wp_ref, sp_ref,
                      o_ref, xpad_ref, col_ref):
    _, H, W, cin = x_ref.shape
    hp, wp = H + 2, W + 2
    cred = ch3x3red + ch5x5red
    c35 = ch3x3 + ch5x5
    cdt = xpad_ref.dtype
    odt = o_ref.dtype

    # ---- copy this image into the 1-pixel-halo VMEM buffer ----------------
    # Only the interior is written.  The halo ring may hold stale VMEM data,
    # but every consumer masks it out explicitly (see `ring` selects below),
    # so no NaN/Inf can leak into kept outputs.
    xpad_ref[1:H + 1, 1:W + 1, :] = x_ref[0]
    xp = xpad_ref[...]                                     # (hp, wp, cin)

    # Padding-ring mask (True on the 1-pixel halo).
    row = lax.broadcasted_iota(jnp.int32, (hp, wp, 1), 0)
    col = lax.broadcasted_iota(jnp.int32, (hp, wp, 1), 1)
    ring = (row == 0) | (row == hp - 1) | (col == 0) | (col == wp - 1)

    # ---- fused 1x1 convs [branch1 | branch2-reduce | branch3-reduce] ------
    # Computed over the padded extent so the reduced activations come out
    # already aligned with the 3x3 halo; ring rows are either discarded
    # (branch1) or forced to exact zero (reduce outputs) below.
    ya = jnp.dot(xp.reshape(hp * wp, cin), wa_ref[...],
                 preferred_element_type=jnp.float32)
    ya = jnp.maximum(ya + sa_ref[...], 0.0)                # (hp*wp, ch1x1+cred)

    b1 = ya[:, :ch1x1].reshape(hp, wp, ch1x1)[1:H + 1, 1:W + 1, :]

    red = ya[:, ch1x1:].reshape(hp, wp, cred)
    red = jnp.where(ring, 0.0, red).astype(cdt)            # true zero padding

    # ---- both 3x3 convs as ONE im2col matmul (K = 9 * cred) ---------------
    for t in range(9):
        ky, kx = t // 3, t % 3
        col_ref[:, :, t * cred:(t + 1) * cred] = red[ky:ky + H, kx:kx + W, :]
    y23 = jnp.dot(col_ref[...].reshape(H * W, 9 * cred), w3_ref[...],
                  preferred_element_type=jnp.float32)
    y23 = jnp.maximum(y23 + s23_ref[...], 0.0)             # (H*W, ch3x3+ch5x5)

    # ---- branch4: 3x3/s1/p1 maxpool (separable) + 1x1 projection ----------
    xpm = jnp.where(ring, jnp.asarray(-jnp.inf, cdt), xp)
    rmax = jnp.maximum(jnp.maximum(xpm[:, 0:W, :], xpm[:, 1:W + 1, :]),
                       xpm[:, 2:W + 2, :])                 # (hp, W, cin)
    pooled = jnp.maximum(jnp.maximum(rmax[0:H], rmax[1:H + 1]), rmax[2:H + 2])
    y4 = jnp.dot(pooled.reshape(H * W, cin), wp_ref[...],
                 preferred_element_type=jnp.float32)
    y4 = jnp.maximum(y4 + sp_ref[...], 0.0)                # (H*W, pool_proj)

    # ---- write the concatenated output directly (no XLA concat) -----------
    o_ref[0, :, :, 0:ch1x1] = b1.astype(odt)
    o_ref[0, :, :, ch1x1:ch1x1 + c35] = y23.reshape(H, W, c35).astype(odt)
    o_ref[0, :, :, ch1x1 + c35:] = y4.reshape(H, W, pool_proj).astype(odt)


# ---------------------------------------------------------------------------
# Wrapper (NCHW in / NCHW out, like the PyTorch module)
# ---------------------------------------------------------------------------

@functools.partial(jax.jit, static_argnames=("channels", "compute_dtype"))
def inception_forward(x_nchw, weights, channels, compute_dtype=jnp.float32):
    ch1x1, ch3x3red, ch3x3, ch5x5red, ch5x5, pool_proj = channels
    cred = ch3x3red + ch5x5red
    c_total = ch1x1 + ch3x3 + ch5x5 + pool_proj

    x = jnp.transpose(x_nchw, (0, 2, 3, 1)).astype(compute_dtype)  # NHWC
    n, h, w, cin = x.shape

    wa = weights["w_a"].astype(compute_dtype)
    w3 = weights["w3"].astype(compute_dtype)
    wpool = weights["w_pool"].astype(compute_dtype)
    sa = weights["shift_a"].astype(jnp.float32)
    s23 = weights["shift_23"].astype(jnp.float32)
    spool = weights["shift_pool"].astype(jnp.float32)

    kernel = functools.partial(_inception_kernel, ch1x1, ch3x3red, ch3x3,
                               ch5x5red, ch5x5, pool_proj)
    out = pl.pallas_call(
        kernel,
        out_shape=jax.ShapeDtypeStruct((n, h, w, c_total), jnp.float32),
        grid=(n,),
        in_specs=[
            pl.BlockSpec((1, h, w, cin), lambda i: (i, 0, 0, 0)),
            pl.BlockSpec(wa.shape, lambda i: (0, 0)),
            pl.BlockSpec(sa.shape, lambda i: (0, 0)),
            pl.BlockSpec(w3.shape, lambda i: (0, 0)),
            pl.BlockSpec(s23.shape, lambda i: (0, 0)),
            pl.BlockSpec(wpool.shape, lambda i: (0, 0)),
            pl.BlockSpec(spool.shape, lambda i: (0, 0)),
        ],
        out_specs=pl.BlockSpec((1, h, w, c_total), lambda i: (i, 0, 0, 0)),
        scratch_shapes=[
            pltpu.VMEM((h + 2, w + 2, cin), compute_dtype),   # padded x halo
            pltpu.VMEM((h, w, 9 * cred), compute_dtype),      # im2col buffer
        ],
        compiler_params=pltpu.CompilerParams(
            dimension_semantics=("parallel",)),
    )(x, wa, sa, w3, s23, wpool, spool)
    return jnp.transpose(out, (0, 3, 1, 2))                  # back to NCHW


# ---------------------------------------------------------------------------
# Parameter construction (PyTorch-style raw params) and packing for the kernel
# ---------------------------------------------------------------------------

def make_inception_raw_params(key, in_channels, channels):
    ch1x1, ch3x3red, ch3x3, ch5x5red, ch5x5, pool_proj = channels
    specs = [("b1", in_channels, ch1x1, 1),
             ("b2red", in_channels, ch3x3red, 1),
             ("b2", ch3x3red, ch3x3, 3),
             ("b3red", in_channels, ch5x5red, 1),
             ("b3", ch5x5red, ch5x5, 3),
             ("b4", in_channels, pool_proj, 1)]
    raw = {}
    for k, (name, cin, cout, ks) in zip(jax.random.split(key, 6), specs):
        kw, kg, kb, km, kv = jax.random.split(k, 5)
        raw[name] = {
            "w": 0.1 * jax.random.normal(kw, (cout, cin, ks, ks), jnp.float32),
            "gamma": 1.0 + 0.1 * jax.random.normal(kg, (cout,), jnp.float32),
            "beta": 0.1 * jax.random.normal(kb, (cout,), jnp.float32),
            "mean": 0.1 * jax.random.normal(km, (cout,), jnp.float32),
            "var": jax.random.uniform(kv, (cout,), jnp.float32,
                                      minval=0.5, maxval=1.5),
        }
    return raw


def _fold_bn(p, eps=0.001):
    scale = p["gamma"] / jnp.sqrt(p["var"] + eps)
    shift = p["beta"] - p["mean"] * scale
    return p["w"] * scale[:, None, None, None], shift


def pack_inception_params(raw, channels, eps=0.001):
    ch1x1, ch3x3red, ch3x3, ch5x5red, ch5x5, pool_proj = channels
    cred = ch3x3red + ch5x5red
    c35 = ch3x3 + ch5x5

    w_b1, s_b1 = _fold_bn(raw["b1"], eps)
    w_b2r, s_b2r = _fold_bn(raw["b2red"], eps)
    w_b3r, s_b3r = _fold_bn(raw["b3red"], eps)
    w_b2, s_b2 = _fold_bn(raw["b2"], eps)
    w_b3, s_b3 = _fold_bn(raw["b3"], eps)
    w_b4, s_b4 = _fold_bn(raw["b4"], eps)

    def t1x1(w):                    # (Cout, Cin, 1, 1) -> (Cin, Cout)
        return jnp.transpose(w[:, :, 0, 0], (1, 0))

    def t3x3(w):                    # (Cout, Cin, 3, 3) -> (9, Cin, Cout)
        return jnp.transpose(w, (2, 3, 1, 0)).reshape(9, w.shape[1], w.shape[0])

    w_a = jnp.concatenate([t1x1(w_b1), t1x1(w_b2r), t1x1(w_b3r)], axis=1)
    shift_a = jnp.concatenate([s_b1, s_b2r, s_b3r])[None, :]

    # Block-diagonal 3x3 weight so BOTH 3x3 branches run as one matmul.
    w3 = jnp.zeros((9, cred, c35), jnp.float32)
    w3 = w3.at[:, :ch3x3red, :ch3x3].set(t3x3(w_b2))
    w3 = w3.at[:, ch3x3red:, ch3x3:].set(t3x3(w_b3))
    w3 = w3.reshape(9 * cred, c35)
    shift_23 = jnp.concatenate([s_b2, s_b3])[None, :]

    return {"w_a": w_a, "shift_a": shift_a,
            "w3": w3, "shift_23": shift_23,
            "w_pool": t1x1(w_b4), "shift_pool": s_b4[None, :]}


# ---------------------------------------------------------------------------
# Pure-JAX reference (exact PyTorch semantics, unfolded params)
# ---------------------------------------------------------------------------

def _ref_basic_conv(x, p, eps=0.001):
    w = jnp.transpose(p["w"], (2, 3, 1, 0))      # HWIO
    k = w.shape[0]
    y = lax.conv_general_dilated(
        x, w, (1, 1), [(k // 2, k // 2), (k // 2, k // 2)],
        dimension_numbers=("NHWC", "HWIO", "NHWC"))
    scale = p["gamma"] / jnp.sqrt(p["var"] + eps)
    shift = p["beta"] - p["mean"] * scale
    return jnp.maximum(y * scale + shift, 0.0)


def _ref_maxpool3x3(x):
    return lax.reduce_window(x, -jnp.inf, lax.max, (1, 3, 3, 1), (1, 1, 1, 1),
                             [(0, 0), (1, 1), (1, 1), (0, 0)])


def inception_reference(x_nchw, raw):
    x = jnp.transpose(x_nchw, (0, 2, 3, 1))
    b1 = _ref_basic_conv(x, raw["b1"])
    b2 = _ref_basic_conv(_ref_basic_conv(x, raw["b2red"]), raw["b2"])
    b3 = _ref_basic_conv(_ref_basic_conv(x, raw["b3red"]), raw["b3"])
    b4 = _ref_basic_conv(_ref_maxpool3x3(x), raw["b4"])
    return jnp.transpose(jnp.concatenate([b1, b2, b3, b4], -1), (0, 3, 1, 2))


# ---------------------------------------------------------------------------

if __name__ == "__main__":
    N, CIN, H, W = 2, 4, 16, 16
    channels = (8, 4, 8, 4, 8, 8)   # ch1x1, ch3x3red, ch3x3, ch5x5red, ch5x5, pool_proj

    key = jax.random.PRNGKey(0)
    k_x, k_p = jax.random.split(key)
    x = jax.random.normal(k_x, (N, CIN, H, W), jnp.float32)

    raw = make_inception_raw_params(k_p, CIN, channels)
    packed = pack_inception_params(raw, channels)

    ref = inception_reference(x, raw)

    # f32 path (strict check against the PyTorch-semantics reference).
    out = inception_forward(x, packed, channels=channels,
                            compute_dtype=jnp.float32)
    out = jax.block_until_ready(out)
    c_total = channels[0] + channels[2] + channels[4] + channels[5]
    assert out.shape == (N, c_total, H, W), out.shape
    err = float(jnp.max(jnp.abs(out - ref)))
    assert err < 2e-4, err

    # bf16 HBM/MXU path (f32 accumulation + epilogue) -- loose check.
    out_bf16 = inception_forward(x, packed, channels=channels,
                                 compute_dtype=jnp.bfloat16)
    out_bf16 = jax.block_until_ready(out_bf16)
    err_bf16 = float(jnp.max(jnp.abs(out_bf16 - ref)))
    assert err_bf16 < 1e-1, err_bf16

    print("KERNEL_OK")
</pallas_src>

<mosaic_0001>
module attributes {stable_mosaic.version = 11 : i64} {
  func.func @_inception_kernel(%arg0: i32, %arg1: memref<1x16x16x4xf32, #tpu.memory_space<vmem>>, %arg2: memref<4x16xf32, #tpu.memory_space<vmem>>, %arg3: memref<1x16xf32, #tpu.memory_space<vmem>>, %arg4: memref<72x16xf32, #tpu.memory_space<vmem>>, %arg5: memref<1x16xf32, #tpu.memory_space<vmem>>, %arg6: memref<4x8xf32, #tpu.memory_space<vmem>>, %arg7: memref<1x8xf32, #tpu.memory_space<vmem>>, %arg8: memref<1x16x16x32xf32, #tpu.memory_space<vmem>>, %arg9: memref<18x18x4xf32, #tpu.memory_space<vmem>>, %arg10: memref<16x16x72xf32, #tpu.memory_space<vmem>>) attributes {dimension_semantics = [#tpu.dimension_semantics<parallel>], iteration_bounds = array<i64: 2>, scalar_prefetch = 0 : i64, scratch_operands = 2 : i64, tpu.core_type = #tpu.core_type<tc>, window_params = [{transform_indices = @transform_0, window_bounds = array<i64: 1, 16, 16, 4>}, {pipeline_mode = #tpu.pipeline_mode<synchronous>, transform_indices = @transform_1, window_bounds = array<i64: 4, 16>}, {pipeline_mode = #tpu.pipeline_mode<synchronous>, transform_indices = @transform_2, window_bounds = array<i64: 1, 16>}, {pipeline_mode = #tpu.pipeline_mode<synchronous>, transform_indices = @transform_3, window_bounds = array<i64: 72, 16>}, {pipeline_mode = #tpu.pipeline_mode<synchronous>, transform_indices = @transform_4, window_bounds = array<i64: 1, 16>}, {pipeline_mode = #tpu.pipeline_mode<synchronous>, transform_indices = @transform_5, window_bounds = array<i64: 4, 8>}, {pipeline_mode = #tpu.pipeline_mode<synchronous>, transform_indices = @transform_6, window_bounds = array<i64: 1, 8>}, {transform_indices = @transform_7, window_bounds = array<i64: 1, 16, 16, 32>}]} {
    %c0 = arith.constant 0 : index
    %c0_0 = arith.constant 0 : index
    %c0_1 = arith.constant 0 : index
    %c0_2 = arith.constant 0 : index
    %0 = vector.load %arg1[%c0, %c0_0, %c0_1, %c0_2] : memref<1x16x16x4xf32, #tpu.memory_space<vmem>>, vector<1x16x16x4xf32>
    %1 = vector.shape_cast %0 : vector<1x16x16x4xf32> to vector<16x16x4xf32>
    %c1 = arith.constant 1 : index
    %c1_3 = arith.constant 1 : index
    %c0_4 = arith.constant 0 : index
    %2 = vector.load %arg9[%c1, %c1_3, %c0_4] : memref<18x18x4xf32, #tpu.memory_space<vmem>>, vector<16x16x4xf32>
    tpu.vector_store %arg9[%c1, %c1_3, %c0_4], %1 {strides = array<i32>} : memref<18x18x4xf32, #tpu.memory_space<vmem>>, vector<16x16x4xf32>,
    %c0_5 = arith.constant 0 : index
    %c0_6 = arith.constant 0 : index
    %c0_7 = arith.constant 0 : index
    %3 = vector.load %arg9[%c0_5, %c0_6, %c0_7] : memref<18x18x4xf32, #tpu.memory_space<vmem>>, vector<18x18x4xf32>
    %4 = tpu.iota {dimensions = array<i32: 0>} : vector<18x18x1xi32>
    %5 = tpu.iota {dimensions = array<i32: 1>} : vector<18x18x1xi32>
    %c0_i32 = arith.constant 0 : i32
    %6 = vector.broadcast %c0_i32 : i32 to vector<18x18x1xi32>
    %7 = arith.cmpi eq, %4, %6 : vector<18x18x1xi32>
    %c17_i32 = arith.constant 17 : i32
    %8 = vector.broadcast %c17_i32 : i32 to vector<18x18x1xi32>
    %9 = arith.cmpi eq, %4, %8 : vector<18x18x1xi32>
    %10 = arith.ori %7, %9 : vector<18x18x1xi1>
    %c0_i32_8 = arith.constant 0 : i32
    %11 = vector.broadcast %c0_i32_8 : i32 to vector<18x18x1xi32>
    %12 = arith.cmpi eq, %5, %11 : vector<18x18x1xi32>
    %13 = arith.ori %10, %12 : vector<18x18x1xi1>
    %c17_i32_9 = arith.constant 17 : i32
    %14 = vector.broadcast %c17_i32_9 : i32 to vector<18x18x1xi32>
    %15 = arith.cmpi eq, %5, %14 : vector<18x18x1xi32>
    %16 = arith.ori %13, %15 : vector<18x18x1xi1>
    %17 = vector.shape_cast %3 : vector<18x18x4xf32> to vector<324x4xf32>
    %c0_10 = arith.constant 0 : index
    %c0_11 = arith.constant 0 : index
    %18 = vector.load %arg2[%c0_10, %c0_11] : memref<4x16xf32, #tpu.memory_space<vmem>>, vector<4x16xf32>
    %cst = arith.constant dense<0.000000e+00> : vector<324x16xf32>
    %19 = tpu.matmul %17, %18, %cst {dimension_numbers = #tpu.dot_dimension_numbers<[1], [0], [0], [1], [0, 0, 1, 1], [], []>} : vector<324x4xf32>, vector<4x16xf32>, vector<324x16xf32> -> vector<324x16xf32>
    %c0_12 = arith.constant 0 : index
    %c0_13 = arith.constant 0 : index
    %20 = vector.load %arg3[%c0_12, %c0_13] : memref<1x16xf32, #tpu.memory_space<vmem>>, vector<1x16xf32>
    %21 = vector.broadcast %20 : vector<1x16xf32> to vector<324x16xf32>
    %22 = arith.addf %19, %21 : vector<324x16xf32>
    %cst_14 = arith.constant 0.000000e+00 : f32
    %23 = vector.broadcast %cst_14 : f32 to vector<324x16xf32>
    %24 = arith.maximumf %22, %23 : vector<324x16xf32>
    %25 = vector.extract_strided_slice %24 {offsets = [0, 0], sizes = [324, 8], strides = [1, 1]} : vector<324x16xf32> to vector<324x8xf32>
    %26 = vector.shape_cast %25 : vector<324x8xf32> to vector<18x18x8xf32>
    %27 = vector.extract_strided_slice %26 {offsets = [1, 1, 0], sizes = [16, 16, 8], strides = [1, 1, 1]} : vector<18x18x8xf32> to vector<16x16x8xf32>
    %28 = vector.extract_strided_slice %24 {offsets = [0, 8], sizes = [324, 8], strides = [1, 1]} : vector<324x16xf32> to vector<324x8xf32>
    %29 = vector.shape_cast %28 : vector<324x8xf32> to vector<18x18x8xf32>
    %cst_15 = arith.constant 0.000000e+00 : f32
    %30 = vector.shape_cast %16 : vector<18x18x1xi1> to vector<18x18x1xi1>
    %31 = vector.broadcast %30 : vector<18x18x1xi1> to vector<18x18x8xi1>
    %32 = vector.broadcast %cst_15 : f32 to vector<18x18x8xf32>
    %33 = arith.select %31, %32, %29 : vector<18x18x8xi1>, vector<18x18x8xf32>
    %34 = vector.extract_strided_slice %33 {offsets = [0, 0, 0], sizes = [16, 16, 8], strides = [1, 1, 1]} : vector<18x18x8xf32> to vector<16x16x8xf32>
    %c0_16 = arith.constant 0 : index
    %c0_17 = arith.constant 0 : index
    %c0_18 = arith.constant 0 : index
    %35 = vector.load %arg10[%c0_16, %c0_17, %c0_18] : memref<16x16x72xf32, #tpu.memory_space<vmem>>, vector<16x16x8xf32>
    tpu.vector_store %arg10[%c0_16, %c0_17, %c0_18], %34 {strides = array<i32>} : memref<16x16x72xf32, #tpu.memory_space<vmem>>, vector<16x16x8xf32>,
    %36 = vector.extract_strided_slice %33 {offsets = [0, 1, 0], sizes = [16, 16, 8], strides = [1, 1, 1]} : vector<18x18x8xf32> to vector<16x16x8xf32>
    %c0_19 = arith.constant 0 : index
    %c0_20 = arith.constant 0 : index
    %c8 = arith.constant 8 : index
    %37 = vector.load %arg10[%c0_19, %c0_20, %c8] : memref<16x16x72xf32, #tpu.memory_space<vmem>>, vector<16x16x8xf32>
    tpu.vector_store %arg10[%c0_19, %c0_20, %c8], %36 {strides = array<i32>} : memref<16x16x72xf32, #tpu.memory_space<vmem>>, vector<16x16x8xf32>,
    %38 = vector.extract_strided_slice %33 {offsets = [0, 2, 0], sizes = [16, 16, 8], strides = [1, 1, 1]} : vector<18x18x8xf32> to vector<16x16x8xf32>
    %c0_21 = arith.constant 0 : index
    %c0_22 = arith.constant 0 : index
    %c16 = arith.constant 16 : index
    %39 = vector.load %arg10[%c0_21, %c0_22, %c16] : memref<16x16x72xf32, #tpu.memory_space<vmem>>, vector<16x16x8xf32>
    tpu.vector_store %arg10[%c0_21, %c0_22, %c16], %38 {strides = array<i32>} : memref<16x16x72xf32, #tpu.memory_space<vmem>>, vector<16x16x8xf32>,
    %40 = vector.extract_strided_slice %33 {offsets = [1, 0, 0], sizes = [16, 16, 8], strides = [1, 1, 1]} : vector<18x18x8xf32> to vector<16x16x8xf32>
    %c0_23 = arith.constant 0 : index
    %c0_24 = arith.constant 0 : index
    %c24 = arith.constant 24 : index
    %41 = vector.load %arg10[%c0_23, %c0_24, %c24] : memref<16x16x72xf32, #tpu.memory_space<vmem>>, vector<16x16x8xf32>
    tpu.vector_store %arg10[%c0_23, %c0_24, %c24], %40 {strides = array<i32>} : memref<16x16x72xf32, #tpu.memory_space<vmem>>, vector<16x16x8xf32>,
    %42 = vector.extract_strided_slice %33 {offsets = [1, 1, 0], sizes = [16, 16, 8], strides = [1, 1, 1]} : vector<18x18x8xf32> to vector<16x16x8xf32>
    %c0_25 = arith.constant 0 : index
    %c0_26 = arith.constant 0 : index
    %c32 = arith.constant 32 : index
    %43 = vector.load %arg10[%c0_25, %c0_26, %c32] : memref<16x16x72xf32, #tpu.memory_space<vmem>>, vector<16x16x8xf32>
    tpu.vector_store %arg10[%c0_25, %c0_26, %c32], %42 {strides = array<i32>} : memref<16x16x72xf32, #tpu.memory_space<vmem>>, vector<16x16x8xf32>,
    %44 = vector.extract_strided_slice %33 {offsets = [1, 2, 0], sizes = [16, 16, 8], strides = [1, 1, 1]} : vector<18x18x8xf32> to vector<16x16x8xf32>
    %c0_27 = arith.constant 0 : index
    %c0_28 = arith.constant 0 : index
    %c40 = arith.constant 40 : index
    %45 = vector.load %arg10[%c0_27, %c0_28, %c40] : memref<16x16x72xf32, #tpu.memory_space<vmem>>, vector<16x16x8xf32>
    tpu.vector_store %arg10[%c0_27, %c0_28, %c40], %44 {strides = array<i32>} : memref<16x16x72xf32, #tpu.memory_space<vmem>>, vector<16x16x8xf32>,
    %46 = vector.extract_strided_slice %33 {offsets = [2, 0, 0], sizes = [16, 16, 8], strides = [1, 1, 1]} : vector<18x18x8xf32> to vector<16x16x8xf32>
    %c0_29 = arith.constant 0 : index
    %c0_30 = arith.constant 0 : index
    %c48 = arith.constant 48 : index
    %47 = vector.load %arg10[%c0_29, %c0_30, %c48] : memref<16x16x72xf32, #tpu.memory_space<vmem>>, vector<16x16x8xf32>
    tpu.vector_store %arg10[%c0_29, %c0_30, %c48], %46 {strides = array<i32>} : memref<16x16x72xf32, #tpu.memory_space<vmem>>, vector<16x16x8xf32>,
    %48 = vector.extract_strided_slice %33 {offsets = [2, 1, 0], sizes = [16, 16, 8], strides = [1, 1, 1]} : vector<18x18x8xf32> to vector<16x16x8xf32>
    %c0_31 = arith.constant 0 : index
    %c0_32 = arith.constant 0 : index
    %c56 = arith.constant 56 : index
    %49 = vector.load %arg10[%c0_31, %c0_32, %c56] : memref<16x16x72xf32, #tpu.memory_space<vmem>>, vector<16x16x8xf32>
    tpu.vector_store %arg10[%c0_31, %c0_32, %c56], %48 {strides = array<i32>} : memref<16x16x72xf32, #tpu.memory_space<vmem>>, vector<16x16x8xf32>,
    %50 = vector.extract_strided_slice %33 {offsets = [2, 2, 0], sizes = [16, 16, 8], strides = [1, 1, 1]} : vector<18x18x8xf32> to vector<16x16x8xf32>
    %c0_33 = arith.constant 0 : index
    %c0_34 = arith.constant 0 : index
    %c64 = arith.constant 64 : index
    %51 = vector.load %arg10[%c0_33, %c0_34, %c64] : memref<16x16x72xf32, #tpu.memory_space<vmem>>, vector<16x16x8xf32>
    tpu.vector_store %arg10[%c0_33, %c0_34, %c64], %50 {strides = array<i32>} : memref<16x16x72xf32, #tpu.memory_space<vmem>>, vector<16x16x8xf32>,
    %c0_35 = arith.constant 0 : index
    %c0_36 = arith.constant 0 : index
    %c0_37 = arith.constant 0 : index
    %52 = vector.load %arg10[%c0_35, %c0_36, %c0_37] : memref<16x16x72xf32, #tpu.memory_space<vmem>>, vector<16x16x72xf32>
    %53 = vector.shape_cast %52 : vector<16x16x72xf32> to vector<256x72xf32>
    %c0_38 = arith.constant 0 : index
    %c0_39 = arith.constant 0 : index
    %54 = vector.load %arg4[%c0_38, %c0_39] : memref<72x16xf32, #tpu.memory_space<vmem>>, vector<72x16xf32>
    %cst_40 = arith.constant dense<0.000000e+00> : vector<256x16xf32>
    %55 = tpu.matmul %53, %54, %cst_40 {dimension_numbers = #tpu.dot_dimension_numbers<[1], [0], [0], [1], [0, 0, 1, 1], [], []>} : vector<256x72xf32>, vector<72x16xf32>, vector<256x16xf32> -> vector<256x16xf32>
    %c0_41 = arith.constant 0 : index
    %c0_42 = arith.constant 0 : index
    %56 = vector.load %arg5[%c0_41, %c0_42] : memref<1x16xf32, #tpu.memory_space<vmem>>, vector<1x16xf32>
    %57 = vector.broadcast %56 : vector<1x16xf32> to vector<256x16xf32>
    %58 = arith.addf %55, %57 : vector<256x16xf32>
    %cst_43 = arith.constant 0.000000e+00 : f32
    %59 = vector.broadcast %cst_43 : f32 to vector<256x16xf32>
    %60 = arith.maximumf %58, %59 : vector<256x16xf32>
    %cst_44 = arith.constant 0xFF800000 : f32
    %61 = vector.shape_cast %16 : vector<18x18x1xi1> to vector<18x18x1xi1>
    %62 = vector.broadcast %61 : vector<18x18x1xi1> to vector<18x18x4xi1>
    %63 = vector.broadcast %cst_44 : f32 to vector<18x18x4xf32>
    %64 = arith.select %62, %63, %3 : vector<18x18x4xi1>, vector<18x18x4xf32>
    %65 = vector.extract_strided_slice %64 {offsets = [0, 0, 0], sizes = [18, 16, 4], strides = [1, 1, 1]} : vector<18x18x4xf32> to vector<18x16x4xf32>
    %66 = vector.extract_strided_slice %64 {offsets = [0, 1, 0], sizes = [18, 16, 4], strides = [1, 1, 1]} : vector<18x18x4xf32> to vector<18x16x4xf32>
    %67 = arith.maximumf %65, %66 : vector<18x16x4xf32>
    %68 = vector.extract_strided_slice %64 {offsets = [0, 2, 0], sizes = [18, 16, 4], strides = [1, 1, 1]} : vector<18x18x4xf32> to vector<18x16x4xf32>
    %69 = arith.maximumf %67, %68 : vector<18x16x4xf32>
    %70 = vector.extract_strided_slice %69 {offsets = [0, 0, 0], sizes = [16, 16, 4], strides = [1, 1, 1]} : vector<18x16x4xf32> to vector<16x16x4xf32>
    %71 = vector.extract_strided_slice %69 {offsets = [1, 0, 0], sizes = [16, 16, 4], strides = [1, 1, 1]} : vector<18x16x4xf32> to vector<16x16x4xf32>
    %72 = arith.maximumf %70, %71 : vector<16x16x4xf32>
    %73 = vector.extract_strided_slice %69 {offsets = [2, 0, 0], sizes = [16, 16, 4], strides = [1, 1, 1]} : vector<18x16x4xf32> to vector<16x16x4xf32>
    %74 = arith.maximumf %72, %73 : vector<16x16x4xf32>
    %75 = vector.shape_cast %74 : vector<16x16x4xf32> to vector<256x4xf32>
    %c0_45 = arith.constant 0 : index
    %c0_46 = arith.constant 0 : index
    %76 = vector.load %arg6[%c0_45, %c0_46] : memref<4x8xf32, #tpu.memory_space<vmem>>, vector<4x8xf32>
    %cst_47 = arith.constant dense<0.000000e+00> : vector<256x8xf32>
    %77 = tpu.matmul %75, %76, %cst_47 {dimension_numbers = #tpu.dot_dimension_numbers<[1], [0], [0], [1], [0, 0, 1, 1], [], []>} : vector<256x4xf32>, vector<4x8xf32>, vector<256x8xf32> -> vector<256x8xf32>
    %c0_48 = arith.constant 0 : index
    %c0_49 = arith.constant 0 : index
    %78 = vector.load %arg7[%c0_48, %c0_49] : memref<1x8xf32, #tpu.memory_space<vmem>>, vector<1x8xf32>
    %79 = vector.broadcast %78 : vector<1x8xf32> to vector<256x8xf32>
    %80 = arith.addf %77, %79 : vector<256x8xf32>
    %cst_50 = arith.constant 0.000000e+00 : f32
    %81 = vector.broadcast %cst_50 : f32 to vector<256x8xf32>
    %82 = arith.maximumf %80, %81 : vector<256x8xf32>
    %c0_51 = arith.constant 0 : index
    %c0_52 = arith.constant 0 : index
    %c0_53 = arith.constant 0 : index
    %c0_54 = arith.constant 0 : index
    %83 = vector.load %arg8[%c0_51, %c0_52, %c0_53, %c0_54] : memref<1x16x16x32xf32, #tpu.memory_space<vmem>>, vector<1x16x16x8xf32>
    %84 = vector.shape_cast %83 : vector<1x16x16x8xf32> to vector<16x16x8xf32>
    %85 = vector.shape_cast %27 : vector<16x16x8xf32> to vector<1x16x16x8xf32>
    tpu.vector_store %arg8[%c0_51, %c0_52, %c0_53, %c0_54], %85 {strides = array<i32>} : memref<1x16x16x32xf32, #tpu.memory_space<vmem>>, vector<1x16x16x8xf32>,
    %86 = vector.shape_cast %60 : vector<256x16xf32> to vector<16x16x16xf32>
    %c0_55 = arith.constant 0 : index
    %c0_56 = arith.constant 0 : index
    %c0_57 = arith.constant 0 : index
    %c8_58 = arith.constant 8 : index
    %87 = vector.load %arg8[%c0_55, %c0_56, %c0_57, %c8_58] : memref<1x16x16x32xf32, #tpu.memory_space<vmem>>, vector<1x16x16x16xf32>
    %88 = vector.shape_cast %87 : vector<1x16x16x16xf32> to vector<16x16x16xf32>
    %89 = vector.shape_cast %86 : vector<16x16x16xf32> to vector<1x16x16x16xf32>
    tpu.vector_store %arg8[%c0_55, %c0_56, %c0_57, %c8_58], %89 {strides = array<i32>} : memref<1x16x16x32xf32, #tpu.memory_space<vmem>>, vector<1x16x16x16xf32>,
    %90 = vector.shape_cast %82 : vector<256x8xf32> to vector<16x16x8xf32>
    %c0_59 = arith.constant 0 : index
    %c0_60 = arith.constant 0 : index
    %c0_61 = arith.constant 0 : index
    %c24_62 = arith.constant 24 : index
    %91 = vector.load %arg8[%c0_59, %c0_60, %c0_61, %c24_62] : memref<1x16x16x32xf32, #tpu.memory_space<vmem>>, vector<1x16x16x8xf32>
    %92 = vector.shape_cast %91 : vector<1x16x16x8xf32> to vector<16x16x8xf32>
    %93 = vector.shape_cast %90 : vector<16x16x8xf32> to vector<1x16x16x8xf32>
    tpu.vector_store %arg8[%c0_59, %c0_60, %c0_61, %c24_62], %93 {strides = array<i32>} : memref<1x16x16x32xf32, #tpu.memory_space<vmem>>, vector<1x16x16x8xf32>,
    return
  }
  func.func @transform_0(%arg0: i32) -> (i32, i32, i32, i32) {
    %c0_i32 = arith.constant 0 : i32
    %c0_i32_0 = arith.constant 0 : i32
    %c0_i32_1 = arith.constant 0 : i32
    %c0_i32_2 = arith.constant 0 : i32
    return %arg0, %c0_i32, %c0_i32_0, %c0_i32_1 : i32, i32, i32, i32
  }
  func.func @transform_1(%arg0: i32) -> (i32, i32) {
    %c0_i32 = arith.constant 0 : i32
    %c0_i32_0 = arith.constant 0 : i32
    %c0_i32_1 = arith.constant 0 : i32
    return %c0_i32, %c0_i32_0 : i32, i32
  }
  func.func @transform_2(%arg0: i32) -> (i32, i32) {
    %c0_i32 = arith.constant 0 : i32
    %c0_i32_0 = arith.constant 0 : i32
    %c0_i32_1 = arith.constant 0 : i32
    return %c0_i32, %c0_i32_0 : i32, i32
  }
  func.func @transform_3(%arg0: i32) -> (i32, i32) {
    %c0_i32 = arith.constant 0 : i32
    %c0_i32_0 = arith.constant 0 : i32
    %c0_i32_1 = arith.constant 0 : i32
    return %c0_i32, %c0_i32_0 : i32, i32
  }
  func.func @transform_4(%arg0: i32) -> (i32, i32) {
    %c0_i32 = arith.constant 0 : i32
    %c0_i32_0 = arith.constant 0 : i32
    %c0_i32_1 = arith.constant 0 : i32
    return %c0_i32, %c0_i32_0 : i32, i32
  }
  func.func @transform_5(%arg0: i32) -> (i32, i32) {
    %c0_i32 = arith.constant 0 : i32
    %c0_i32_0 = arith.constant 0 : i32
    %c0_i32_1 = arith.constant 0 : i32
    return %c0_i32, %c0_i32_0 : i32, i32
  }
  func.func @transform_6(%arg0: i32) -> (i32, i32) {
    %c0_i32 = arith.constant 0 : i32
    %c0_i32_0 = arith.constant 0 : i32
    %c0_i32_1 = arith.constant 0 : i32
    return %c0_i32, %c0_i32_0 : i32, i32
  }
  func.func @transform_7(%arg0: i32) -> (i32, i32, i32, i32) {
    %c0_i32 = arith.constant 0 : i32
    %c0_i32_0 = arith.constant 0 : i32
    %c0_i32_1 = arith.constant 0 : i32
    %c0_i32_2 = arith.constant 0 : i32
    return %arg0, %c0_i32, %c0_i32_0, %c0_i32_1 : i32, i32, i32, i32
  }
}

</mosaic_0001>

<bundles_post_ra>
// kernel: inception_forward.1
= control target key start
LH: loop header
LB: loop body
LE: loop exit
PB: predicated region body
PF: predicated region fallthrough
CT: control target
= control target key end

     0   :  { %12 = vsyncpa [#allocation5], 0  ;;  %s10985_s0 = inlined_call_operand.vmem [shape: f32[2,16,16,4], index: 0, kind: input, shape index: {}]   ;;  %s10986_s1 = inlined_call_operand.vmem [shape: f32[4,16], index: 1, kind: input, shape index: {}]   ;;  %s10987_s2 = inlined_call_operand.vmem [shape: f32[1,16], index: 2, kind: input, shape index: {}]   ;;  %s10988_s3 = inlined_call_operand.vmem [shape: f32[72,16], index: 3, kind: input, shape index: {}]   ;;  %s10989_s4 = inlined_call_operand.vmem [shape: f32[1,16], index: 4, kind: input, shape index: {}]   ;;  %s10990_s5 = inlined_call_operand.vmem [shape: f32[4,8], index: 5, kind: input, shape index: {}]   ;;  %s10991_s6 = inlined_call_operand.vmem [shape: f32[1,8], index: 6, kind: input, shape index: {}]   ;;  %s10992_s7 = inlined_call_operand.hbm [shape: f32[2,16,16,32], index: 7, kind: output, shape index: {}]  }
   0x1   :  { %14 = vsyncpa [#allocation5 + $0x1], 0  ;;  %s8061_s24 = smov 0   ;;  %s8063_s25 = smov 0  }
   0x2   :  { %s8065_s26 = smov 0   ;;  %s8067_s27 = smov 0  }
   0x3 LB: > { %s8082_s28 = sadd.s32 4294967295, %s8004_s27   ;;  %s7273_s29 = sadd.s32 4294967294, %s8004_s27   ;;  %s8004_s27 = sphi %s8067_s27, %s11226_s27   ;;  %s8000_s26 = sphi %s8065_s26, %s11225_s26   ;;  %s7996_s25 = sphi %s8063_s25, %s11224_s25   ;;  %s7992_s24 = sphi %s8061_s24, %s11223_s24  }
   0x4   : > { %s8086_s30 = sadd.s32 1, %s8004_s27   ;;  %s179_s8 = sadd.s32 1, %s8000_s26 }
   0x5   : > { %s176_s9 = ssub.s32 %s8004_s27, %s8086_s30  ;;  %p189_p0 = scmp.ne.s32.totalorder %s8000_s26, %s7996_s25 }
   0x6   : > { %p177_p1 = scmp.eq.s32.totalorder %s176_s9, 0  ;;  %p190_p2 = scmp.eq.s32.totalorder %s8082_s28, 1 }
   0x7   : > { %p195_p3 = scmp.ne.s32.totalorder %s7996_s25, %s7992_s24  ;;  %p196_p4 = scmp.eq.s32.totalorder %s7273_s29, 1 }
   0x8   : > { %s8097_s10 = scalar_select %p177_p1, %s8000_s26, %s179_s8  }
   0x9   : > { %p8099_p5 = por %p190_p2, %p189_p0  ;;  %p8103_p6 = por %p196_p4, %p195_p3 }
   0xa   : > { %p7276_p7 = scmp.ge.s32.totalorder %s8004_s27, 1  ;;  %p240_p8 = scmp.lt.s32.totalorder %s8004_s27, 3 }
   0xc   : > { %p241_p9 = pnand %p7276_p7, %p240_p8 }
   0xd   : > { %v1211_v0 = vld [vmem:[%s10986_s1] sm:$0xf] (!%p241_p9)  ;;  %vm10995_vm0 = vcmask (!%p241_p9), 1043456   ;;  %v8006_v1 = vmov (!%p241_p9), 0.0   ;;  %vm8007_vm1 = vmmov (!%p241_p9), 0   ;;  %v397_v3 = vlaneseq (!%p241_p9)  ;;  %v344_v4 = vld [vmem:[#allocation2 + $0x8] sm:$0xff] (!%p241_p9) }
   0xe   : > { %244 = sbr.rel (%p241_p9) target bundleno = 1625 (0x659), region = 48  ;;  %7515 = vmatprep.subr.mxu0 (!%p241_p9), %v8006_v1  ;;  %7517 = vmatprep.mubr.msk.f32.mxu0 (!%p241_p9), %vm8007_vm1, %v8006_v1  ;;  %v343_v2 = vld [vmem:[#allocation2] sm:$0xff] (!%p241_p9)  ;;  %p272_p10 = scmp.lt.s32.totalorder (!%p241_p9), %s8082_s28, 1  ;;  %v8008_v5 = vmov (!%p241_p9), 1983009808   ;;  %v490_v10 = vcombine.high (!%p241_p9), %v344_v4, %v344_v4  ;;  %v394_v11 = vld [vmem:[#allocation2 + $0x198] sm:$0xff] (!%p241_p9) }
   0xf   : > { %7516 = vmatpush3.msk.msra.mxu0 (!%p241_p9), %vm10995_vm0, %v1211_v0  ;;  %v475_v6 = vunpack.c.l.s4 (!%p241_p9), %v8008_v5  ;;  %7772 = vmatprep.subr.mxu1 (!%p241_p9), %v8006_v1  ;;  %v8118_v7 = vshrl.u32 (!%p241_p9), %v397_v3, 7  ;;  %v473_v8 = vcombine.high (!%p241_p9), %v343_v2, %v343_v2  ;;  %vm10994_vm2 = vcmask (!%p241_p9), 31744   ;;  %v7396_v47 = vld.sshfl [vmem:[#allocation2 + $0x10] sm:$0x3 pattern:$0x76325410] (!%p241_p9) }
  0x10   : > { %7773 = vmatpush3.msk.msra.mxu1 (!%p241_p9), %vm10995_vm0, %v1211_v0  ;;  %7628 = vmatprep.mubr.msk.f32.mxu1 (!%p241_p9), %vm8007_vm1, %v8006_v1  ;;  %v1170_v16 = vcombine.high (!%p241_p9), %v394_v11, %v394_v11  ;;  %s8009_s20 = smov (!%p241_p9), 8   ;;  %s8010_s21 = smov (!%p241_p9), 16   ;;  %vm3999_vm3 = vcmask (!%p241_p9), 64512   ;;  %vm10997_vm4 = vcmask (!%p241_p9), 122944   ;;  %vm4224_vm5 = vcmask (!%p241_p9), 130113  }
  0x11   : > { %v476_v9 = vunpack.c.0.s8 (!%p241_p9), %v475_v6  ;;  %4084 = vrot.lane.b32.xlu1 (!%p241_p9), %v8006_v1, %s8009_s20  ;;  %7828 = vrot.lane.b32.xlu0 (!%p241_p9), %v8006_v1, %s8009_s20  ;;  %4000 = vst.msk [vmem:[#allocation3] sm:$0xff] (!%p241_p9), %vm3999_vm3, %v8006_v1  ;;  %4001 = vst.msk [vmem:[#allocation3 + $0x8] sm:$0xff] (!%p241_p9), %vm3999_vm3, %v8006_v1  ;;  %vm4226_vm6 = vcmask (!%p241_p9), 130112   ;;  %vm4419_vm7 = vcmask (!%p241_p9), 195714   ;;  %vm10999_vm8 = vcmask (!%p241_p9), 195712   ;;  %s10993_s29 = sand.u32 (!%p241_p9), 1, %s7996_s25  }
  0x12   : > { %vm11002_vm9 = vcmask (!%p241_p9), 189568   ;;  %vm6829_vm10 = vcmask (!%p241_p9), 57344   ;;  %s7277_s8 = sshll.u32 (!%p241_p9), %s10993_s29, 8  ;;  %vm6826_vm11 = vcmask (!%p241_p9), 64513   ;;  %s8011_s9 = smov (!%p241_p9), 120   ;;  %vm10996_vm13 = vcmp.eq.s32.totalorder (!%p241_p9), %v8118_v7, 0 }
  0x13   : > { %v8125_v12 = vsub.s32 (!%p241_p9), %v476_v9, %v8118_v7  ;;  %s8515_s13 = scalar_lea.vmem (!%p241_p9), [#allocation4], %s7277_s8  ;;  %s8013_s17 = smov (!%p241_p9), 24   ;;  %vm4568_vm14 = vcmask (!%p241_p9), 261312   ;;  %vm4746_vm15 = vcmask (!%p241_p9), 326913   ;;  %vm4943_vm0 = vcmask (!%p241_p9), 392512  }
  0x14   : > { %s8014_s18 = smov (!%p241_p9), 40   ;;  %s8016_s22 = smov (!%p241_p9), 56  }
  0x15   : > { %s273_s15 = scalar_select %p272_p10, %s8082_s28, 1  ;;  %v480_v17 = vrot.slane %v343_v2, %v8125_v12  ;;  %v487_v18 = vrot.slane %v473_v8, %v8125_v12  ;;  %v497_v19 = vrot.slane %v344_v4, %v8125_v12  ;;  %v504_v20 = vrot.slane %v490_v10, %v8125_v12  ;;  %7833 = vrot.lane.b32.xlu1 %v8006_v1, %s8010_s21 }
  0x16   : > { %v8147_v24 = vrot.slane %v394_v11, %v8125_v12  ;;  %v8161_v35 = vrot.slane %v1170_v16, %v8125_v12  ;;  %4279 = vrot.lane.b32.xlu0 %v8006_v1, %s8010_s21  ;;  %s8017_s29 = smov 64  }
  0x17   : > { %s7395_s16 = sshll.u32 %s273_s15, 8  ;;  %v488_v28 = vcombine.high %v480_v17, %v480_v17  ;;  %v489_v29 = vcombine.high %v487_v18, %v487_v18  ;;  %v505_v30 = vcombine.high %v497_v19, %v497_v19  ;;  %v506_v31 = vcombine.high %v504_v20, %v504_v20  ;;  %s7211_s15 = sshll.u32 %s8515_s13, 4  ;;  %s10935_s15 = int_to_ptr.vmem [resolvable:$true] %s7211_s15 }
  0x18   : > { %s8130_s19 = scalar_lea.vmem %s10985_s0, %s7395_s16  ;;  %v1185_v36 = vcombine.high %v8147_v24, %v8147_v24  ;;  %s8012_s16 = smov 32  }
  0x19   : > { %v277_v13 = vld [vmem:[%s8130_s19] sm:$0xff]  ;;  %v307_v14 = vld [vmem:[%s8130_s19 + $0xf0] sm:$0xff]  ;;  %v308_v15 = vld [vmem:[%s8130_s19 + $0xf8] sm:$0xff]  ;;  %v1219_v40 = vcombine.low %v480_v17, %v488_v28  ;;  %v1220_v41 = vcombine.low %v487_v18, %v489_v29  ;;  %v1236_v42 = vcombine.low %v497_v19, %v505_v30  ;;  %v1237_v43 = vcombine.low %v504_v20, %v506_v31 }
  0x1a   : > { %311 = vst.msk [vmem:[#allocation2 + $0x19] sm:$0xff] %vm10994_vm2, %v277_v13  ;;  %341 = vst.msk [vmem:[#allocation2 + $0x181] sm:$0xff] %vm10994_vm2, %v307_v14  ;;  %v278_v21 = vld [vmem:[%s8130_s19 + $0x8] sm:$0xff]  ;;  %v279_v22 = vld [vmem:[%s8130_s19 + $0x10] sm:$0xff]  ;;  %v8194_v61 = vcombine.low %v1185_v36, %v8161_v35 }
  0x1b   : > { %342 = vst.msk [vmem:[#allocation2 + $0x189] sm:$0xff] %vm10994_vm2, %v308_v15  ;;  %v280_v23 = vld [vmem:[%s8130_s19 + $0x18] sm:$0xff]  ;;  %312 = vst.msk [vmem:[#allocation2 + $0x21] sm:$0xff] %vm10994_vm2, %v278_v21  ;;  %v281_v25 = vld [vmem:[%s8130_s19 + $0x20] sm:$0xff]  ;;  %v1227_v51 = vrot.slane %v1219_v40, %v8125_v12  ;;  %v1234_v52 = vrot.slane %v1220_v41, %v8125_v12  ;;  %v1244_v53 = vrot.slane %v1236_v42, %v8125_v12 }
  0x1c   : > { %313 = vst.msk [vmem:[#allocation2 + $0x31] sm:$0xff] %vm10994_vm2, %v279_v22  ;;  %314 = vst.msk [vmem:[#allocation2 + $0x39] sm:$0xff] %vm10994_vm2, %v280_v23  ;;  %v282_v26 = vld [vmem:[%s8130_s19 + $0x28] sm:$0xff]  ;;  %v283_v27 = vld [vmem:[%s8130_s19 + $0x30] sm:$0xff]  ;;  %v1251_v54 = vrot.slane %v1237_v43, %v8125_v12  ;;  %v1880_v28 = vrot.slane %v8194_v61, %v8125_v12 }
  0x1d   : > { %315 = vst.msk [vmem:[#allocation2 + $0x49] sm:$0xff] %vm10994_vm2, %v281_v25  ;;  %316 = vst.msk [vmem:[#allocation2 + $0x51] sm:$0xff] %vm10994_vm2, %v282_v26  ;;  %v284_v32 = vld [vmem:[%s8130_s19 + $0x38] sm:$0xff]  ;;  %v285_v33 = vld [vmem:[%s8130_s19 + $0x40] sm:$0xff]  ;;  %v1235_v62 = vcombine.low %v1227_v51, %v1234_v52 }
  0x1e   : > { %317 = vst.msk [vmem:[#allocation2 + $0x61] sm:$0xff] %vm10994_vm2, %v283_v27  ;;  %v286_v34 = vld [vmem:[%s8130_s19 + $0x48] sm:$0xff]  ;;  %318 = vst.msk [vmem:[#allocation2 + $0x69] sm:$0xff] %vm10994_vm2, %v284_v32  ;;  %v287_v37 = vld [vmem:[%s8130_s19 + $0x50] sm:$0xff]  ;;  %v1252_v63 = vcombine.low %v1244_v53, %v1251_v54 }
  0x1f   : > { %319 = vst.msk [vmem:[#allocation2 + $0x79] sm:$0xff] %vm10994_vm2, %v285_v33  ;;  %320 = vst.msk [vmem:[#allocation2 + $0x81] sm:$0xff] %vm10994_vm2, %v286_v34  ;;  %v288_v38 = vld [vmem:[%s8130_s19 + $0x58] sm:$0xff]  ;;  %v289_v39 = vld [vmem:[%s8130_s19 + $0x60] sm:$0xff]  ;;  %7518 = vmatmul.mubr.msk.f32.vlgmr.msra.gmra.mrb[0].mxu0 %vm10994_vm2, %v1235_v62 }
  0x20   : > { %321 = vst.msk [vmem:[#allocation2 + $0x91] sm:$0xff] %vm10994_vm2, %v287_v37  ;;  %322 = vst.msk [vmem:[#allocation2 + $0x99] sm:$0xff] %vm10994_vm2, %v288_v38  ;;  %v290_v44 = vld [vmem:[%s8130_s19 + $0x68] sm:$0xff]  ;;  %v291_v45 = vld [vmem:[%s8130_s19 + $0x70] sm:$0xff]  ;;  %7520 = vmatprep.mubr.msk.f32.mxu0 %vm8007_vm1, %v8006_v1 }
  0x21   : > { %323 = vst.msk [vmem:[#allocation2 + $0xa9] sm:$0xff] %vm10994_vm2, %v289_v39  ;;  %v292_v46 = vld [vmem:[%s8130_s19 + $0x78] sm:$0xff]  ;;  %324 = vst.msk [vmem:[#allocation2 + $0xb1] sm:$0xff] %vm10994_vm2, %v290_v44  ;;  %v293_v48 = vld [vmem:[%s8130_s19 + $0x80] sm:$0xff] }
  0x22   : > { %325 = vst.msk [vmem:[#allocation2 + $0xc1] sm:$0xff] %vm10994_vm2, %v291_v45  ;;  %326 = vst.msk [vmem:[#allocation2 + $0xc9] sm:$0xff] %vm10994_vm2, %v292_v46  ;;  %v294_v49 = vld [vmem:[%s8130_s19 + $0x88] sm:$0xff]  ;;  %v295_v50 = vld [vmem:[%s8130_s19 + $0x90] sm:$0xff] }
  0x23   : > { %327 = vst.msk [vmem:[#allocation2 + $0xd9] sm:$0xff] %vm10994_vm2, %v293_v48  ;;  %328 = vst.msk [vmem:[#allocation2 + $0xe1] sm:$0xff] %vm10994_vm2, %v294_v49  ;;  %v296_v55 = vld [vmem:[%s8130_s19 + $0x98] sm:$0xff]  ;;  %v297_v56 = vld [vmem:[%s8130_s19 + $0xa0] sm:$0xff]  ;;  %7521 = vmatmul.mubr.msk.f32.gmra.mrb[2].mxu0 %vm10994_vm2, %v1252_v63 }
  0x24   : > { %329 = vst.msk [vmem:[#allocation2 + $0xf1] sm:$0xff] %vm10994_vm2, %v295_v50  ;;  %v298_v57 = vld [vmem:[%s8130_s19 + $0xa8] sm:$0xff]  ;;  %v346_v58 = vld [vmem:[#allocation2 + $0x18] sm:$0xff]  ;;  %330 = vst.msk [vmem:[#allocation2 + $0xf9] sm:$0xff] %vm10994_vm2, %v296_v55  ;;  %7523 = vmatprep.mubr.msk.f32.mxu0 %vm8007_vm1, %v8006_v1 }
  0x25   : > { %v392_v59 = vld [vmem:[#allocation2 + $0x188] sm:$0xff]  ;;  %v7926_v60 = vld.sshfl [vmem:[#allocation2 + $0x190] sm:$0x3 pattern:$0x76325410]  ;;  %331 = vst.msk [vmem:[#allocation2 + $0x109] sm:$0xff] %vm10994_vm2, %v297_v56  ;;  %v514_v0 = vcombine.high %v346_v58, %v346_v58  ;;  %v521_v2 = vrot.slane %v346_v58, %v8125_v12 }
  0x26   : > { %332 = vst.msk [vmem:[#allocation2 + $0x111] sm:$0xff] %vm10994_vm2, %v298_v57  ;;  %v347_v3 = vld [vmem:[#allocation2 + $0x20] sm:$0xff]  ;;  %v1146_v4 = vcombine.high %v392_v59, %v392_v59  ;;  %v1153_v5 = vrot.slane %v392_v59, %v8125_v12  ;;  %v1865_v20 = vcombine.low %v7926_v60, %v8147_v24  ;;  %v7927_v25 = vld.sshfl [vmem:[#allocation2 + $0x28] sm:$0x3 pattern:$0x76325410] }
  0x27   : > { %v531_v6 = vcombine.high %v347_v3, %v347_v3  ;;  %v538_v8 = vrot.slane %v347_v3, %v8125_v12  ;;  %v528_v9 = vrot.slane %v514_v0, %v8125_v12  ;;  %v529_v10 = vcombine.high %v521_v2, %v521_v2  ;;  %v349_v29 = vld [vmem:[#allocation2 + $0x30] sm:$0xff]  ;;  %v350_v37 = vld [vmem:[#allocation2 + $0x38] sm:$0xff]  ;;  %v7928_v41 = vld.sshfl [vmem:[#allocation2 + $0x40] sm:$0x3 pattern:$0x76325410] }
  0x28   : > { %v1253_v11 = vcombine.low %v7396_v47, %v521_v2  ;;  %v1160_v13 = vrot.slane %v1146_v4, %v8125_v12  ;;  %v1161_v14 = vcombine.high %v1153_v5, %v1153_v5  ;;  %v1873_v36 = vrot.slane %v1865_v20, %v8125_v12  ;;  %v352_v42 = vld [vmem:[#allocation2 + $0x48] sm:$0xff]  ;;  %v299_v45 = vld [vmem:[%s8130_s19 + $0xb0] sm:$0xff]  ;;  %v300_v50 = vld [vmem:[%s8130_s19 + $0xb8] sm:$0xff] }
  0x29   : > { %v545_v15 = vrot.slane %v531_v6, %v8125_v12  ;;  %v546_v16 = vcombine.high %v538_v8, %v538_v8  ;;  %v1254_v17 = vcombine.low %v529_v10, %v528_v9  ;;  %v530_v19 = vcombine.high %v528_v9, %v528_v9  ;;  %333 = vst.msk [vmem:[#allocation2 + $0x121] sm:$0xff] %vm10994_vm2, %v299_v45  ;;  %v301_v51 = vld [vmem:[%s8130_s19 + $0xc0] sm:$0xff]  ;;  %v302_v52 = vld [vmem:[%s8130_s19 + $0xc8] sm:$0xff]  ;;  %v303_v56 = vld [vmem:[%s8130_s19 + $0xd0] sm:$0xff] }
  0x2a   : > { %v1261_v18 = vrot.slane %v1253_v11, %v8125_v12  ;;  %v1162_v21 = vcombine.high %v1160_v13, %v1160_v13  ;;  %v1848_v22 = vcombine.low %v1153_v5, %v1161_v14  ;;  %v562_v39 = vrot.slane %v349_v29, %v8125_v12  ;;  %334 = vst.msk [vmem:[#allocation2 + $0x129] sm:$0xff] %vm10994_vm2, %v300_v50  ;;  %v304_v57 = vld [vmem:[%s8130_s19 + $0xd8] sm:$0xff]  ;;  %v305_v58 = vld [vmem:[%s8130_s19 + $0xe0] sm:$0xff]  ;;  %v353_v63 = vld [vmem:[#allocation2 + $0x50] sm:$0xff] }
  0x2b   : > { %v1271_v23 = vcombine.low %v546_v16, %v545_v15  ;;  %v1268_v26 = vrot.slane %v1254_v17, %v8125_v12  ;;  %v1270_v27 = vcombine.low %v530_v19, %v538_v8  ;;  %v547_v32 = vcombine.high %v545_v15, %v545_v15  ;;  %335 = vst.msk [vmem:[#allocation2 + $0x139] sm:$0xff] %vm10994_vm2, %v301_v51  ;;  %v306_v0 = vld [vmem:[%s8130_s19 + $0xe8] sm:$0xff]  ;;  %v7929_v17 = vld.sshfl [vmem:[#allocation2 + $0x58] sm:$0x3 pattern:$0x76325410] }
  0x2c   : > { %v1849_v30 = vcombine.low %v1160_v13, %v1162_v21  ;;  %v1856_v24 = vrot.slane %v1848_v22, %v8125_v12  ;;  %v555_v40 = vcombine.high %v349_v29, %v349_v29  ;;  %v570_v47 = vcombine.high %v562_v39, %v562_v39  ;;  %336 = vst.msk [vmem:[#allocation2 + $0x141] sm:$0xff] %vm10994_vm2, %v302_v52  ;;  %v355_v22 = vld [vmem:[#allocation2 + $0x60] sm:$0xff]  ;;  %s8015_s19 = smov 48  }
  0x2d   : > { %v1285_v31 = vrot.slane %v1271_v23, %v8125_v12  ;;  %v1269_v33 = vcombine.low %v1261_v18, %v1268_v26  ;;  %v1278_v34 = vrot.slane %v1270_v27, %v8125_v12  ;;  %v1287_v44 = vcombine.low %v547_v32, %v7927_v25  ;;  %337 = vst.msk [vmem:[#allocation2 + $0x151] sm:$0xff] %vm10994_vm2, %v303_v56  ;;  %v356_v27 = vld [vmem:[#allocation2 + $0x68] sm:$0xff]  ;;  %v359_v56 = vld [vmem:[#allocation2 + $0x80] sm:$0xff] }
  0x2e   : > { %v1863_v38 = vrot.slane %v1849_v30, %v8125_v12  ;;  %v569_v48 = vrot.slane %v555_v40, %v8125_v12  ;;  %v579_v49 = vrot.slane %v350_v37, %v8125_v12  ;;  %v1881_v53 = vcombine.low %v1873_v36, %v1880_v28  ;;  %338 = vst.msk [vmem:[#allocation2 + $0x159] sm:$0xff] %vm10994_vm2, %v304_v57 }
  0x2f   : > { %7524 = vmatmul.mubr.msk.f32.gmra.mrb[4].mxu0 %vm10994_vm2, %v1269_v33  ;;  %v1286_v43 = vcombine.low %v1278_v34, %v1285_v31  ;;  %v572_v54 = vcombine.high %v350_v37, %v350_v37  ;;  %v603_v55 = vrot.slane %v352_v42, %v8125_v12  ;;  %v1288_v59 = vcombine.low %v562_v39, %v570_v47 }
  0x30   : > { %v1864_v46 = vcombine.low %v1856_v24, %v1863_v38  ;;  %7526 = vmatprep.mubr.msk.f32.mxu0 %vm8007_vm1, %v8006_v1  ;;  %v1295_v60 = vrot.slane %v1287_v44, %v8125_v12  ;;  %v571_v61 = vcombine.high %v569_v48, %v569_v48  ;;  %v587_v62 = vcombine.high %v579_v49, %v579_v49 }
  0x31   : > { %339 = vst.msk [vmem:[#allocation2 + $0x169] sm:$0xff] %vm10994_vm2, %v305_v58  ;;  %v586_v2 = vrot.slane %v572_v54, %v8125_v12  ;;  %v1322_v3 = vcombine.low %v7928_v41, %v603_v55  ;;  %340 = vst.msk [vmem:[#allocation2 + $0x171] sm:$0xff] %vm10994_vm2, %v306_v0  ;;  %v1302_v4 = vrot.slane %v1288_v59, %v8125_v12 }
  0x32   : > { %7629 = vmatmul.mubr.msk.f32.vlgmr.msra.gmra.mrb[0].mxu1 %vm10994_vm2, %v1864_v46  ;;  %v1304_v5 = vcombine.low %v569_v48, %v571_v61  ;;  %v1305_v6 = vcombine.low %v579_v49, %v587_v62  ;;  %v596_v8 = vcombine.high %v352_v42, %v352_v42  ;;  %v611_v10 = vcombine.high %v603_v55, %v603_v55  ;;  %v358_v42 = vld [vmem:[#allocation2 + $0x78] sm:$0xff]  ;;  %v7930_v49 = vld.sshfl [vmem:[#allocation2 + $0x70] sm:$0x3 pattern:$0x76325410] }
  0x33   : > { %7527 = vmatmul.mubr.msk.f32.gmra.mrb[6].mxu0 %vm10994_vm2, %v1286_v43  ;;  %7631 = vmatprep.mubr.msk.f32.mxu1 %vm8007_vm1, %v8006_v1  ;;  %v588_v9 = vcombine.high %v586_v2, %v586_v2  ;;  %v620_v11 = vrot.slane %v353_v63, %v8125_v12  ;;  %v1303_v13 = vcombine.low %v1295_v60, %v1302_v4 }
  0x34   : > { %7529 = vmatprep.mubr.msk.f32.mxu0 %vm8007_vm1, %v8006_v1  ;;  %v1312_v14 = vrot.slane %v1304_v5, %v8125_v12  ;;  %v1319_v15 = vrot.slane %v1305_v6, %v8125_v12  ;;  %v610_v16 = vrot.slane %v596_v8, %v8125_v12  ;;  %v1336_v19 = vrot.slane %v1322_v3, %v8125_v12  ;;  %v361_v3 = vld [vmem:[#allocation2 + $0x90] sm:$0xff] }
  0x35   : > { %v1321_v18 = vcombine.low %v586_v2, %v588_v9  ;;  %v613_v20 = vcombine.high %v353_v63, %v353_v63  ;;  %v628_v21 = vcombine.high %v620_v11, %v620_v11  ;;  %v637_v31 = vcombine.high %v355_v22, %v355_v22 }
  0x36   : > { %7632 = vmatmul.mubr.msk.f32.gmra.mrb[2].mxu1 %vm10994_vm2, %v1881_v53  ;;  %v1320_v23 = vcombine.low %v1312_v14, %v1319_v15  ;;  %v612_v25 = vcombine.high %v610_v16, %v610_v16  ;;  %v1338_v26 = vcombine.low %v611_v10, %v610_v16  ;;  %v644_v32 = vrot.slane %v355_v22, %v8125_v12  ;;  %v7931_v15 = vld.sshfl [vmem:[#allocation2 + $0x88] sm:$0x3 pattern:$0x76325410]  ;;  %v362_v16 = vld [vmem:[#allocation2 + $0x98] sm:$0xff] }
  0x37   : > { %7634 = vmatprep.mubr.msk.f32.mxu1 %vm8007_vm1, %v8006_v1  ;;  %7530 = vmatmul.mubr.msk.f32.gmra.mrb[8].mxu0 %vm10994_vm2, %v1303_v13  ;;  %v1329_v28 = vrot.slane %v1321_v18, %v8125_v12  ;;  %v627_v29 = vrot.slane %v613_v20, %v8125_v12  ;;  %v654_v37 = vcombine.high %v356_v27, %v356_v27 }
  0x38   : > { %7532 = vmatprep.mubr.msk.f32.mxu0 %vm8007_vm1, %v8006_v1  ;;  %v1339_v30 = vcombine.low %v612_v25, %v620_v11  ;;  %v1346_v24 = vrot.slane %v1338_v26, %v8125_v12  ;;  %v651_v39 = vrot.slane %v637_v31, %v8125_v12  ;;  %v652_v40 = vcombine.high %v644_v32, %v644_v32 }
  0x39   : > { %v1337_v33 = vcombine.low %v1329_v28, %v1336_v19  ;;  %v629_v34 = vcombine.high %v627_v29, %v627_v29  ;;  %v1355_v36 = vcombine.low %v628_v21, %v627_v29  ;;  %v661_v41 = vrot.slane %v356_v27, %v8125_v12  ;;  %v364_v29 = vld [vmem:[#allocation2 + $0xa8] sm:$0xff] }
  0x3a   : > { %v1353_v38 = vrot.slane %v1339_v30, %v8125_v12  ;;  %v668_v44 = vrot.slane %v654_v37, %v8125_v12  ;;  %v653_v45 = vcombine.high %v651_v39, %v651_v39  ;;  %v1372_v46 = vcombine.low %v644_v32, %v652_v40  ;;  %v365_v40 = vld [vmem:[#allocation2 + $0xb0] sm:$0xff] }
  0x3b   : > { %7533 = vmatmul.mubr.msk.f32.gmra.mrb[10].mxu0 %vm10994_vm2, %v1320_v23  ;;  %v1356_v43 = vcombine.low %v629_v34, %v7929_v17  ;;  %v669_v47 = vcombine.high %v661_v41, %v661_v41  ;;  %v678_v50 = vcombine.high %v358_v42, %v358_v42  ;;  %v685_v51 = vrot.slane %v358_v42, %v8125_v12  ;;  %v7932_v34 = vld.sshfl [vmem:[#allocation2 + $0xa0] sm:$0x3 pattern:$0x76325410] }
  0x3c   : > { %7535 = vmatprep.mubr.msk.f32.mxu0 %vm8007_vm1, %v8006_v1  ;;  %v670_v48 = vcombine.high %v668_v44, %v668_v44  ;;  %v1354_v52 = vcombine.low %v1346_v24, %v1353_v38  ;;  %v1363_v53 = vrot.slane %v1355_v36, %v8125_v12  ;;  %v1373_v55 = vcombine.low %v651_v39, %v653_v45 }
  0x3d   : > { %v1370_v54 = vrot.slane %v1356_v43, %v8125_v12  ;;  %v692_v57 = vrot.slane %v678_v50, %v8125_v12  ;;  %v693_v58 = vcombine.high %v685_v51, %v685_v51  ;;  %v1380_v59 = vrot.slane %v1372_v46, %v8125_v12  ;;  %v367_v50 = vld [vmem:[#allocation2 + $0xc0] sm:$0xff] }
  0x3e   : > { %v1389_v60 = vcombine.low %v661_v41, %v669_v47  ;;  %v1390_v61 = vcombine.low %v668_v44, %v670_v48  ;;  %v1387_v63 = vrot.slane %v1373_v55, %v8125_v12  ;;  %v695_v0 = vcombine.high %v359_v56, %v359_v56 }
  0x3f   : > { %7536 = vmatmul.mubr.msk.f32.gmra.mrb[12].mxu0 %vm10994_vm2, %v1337_v33  ;;  %v1371_v62 = vcombine.low %v1363_v53, %v1370_v54  ;;  %v702_v2 = vrot.slane %v359_v56, %v8125_v12  ;;  %v1406_v4 = vcombine.low %v7930_v49, %v685_v51  ;;  %v1407_v5 = vcombine.low %v693_v58, %v692_v57  ;;  %v7933_v56 = vld.sshfl [vmem:[#allocation2 + $0xb8] sm:$0x3 pattern:$0x76325410] }
  0x40   : > { %7538 = vmatprep.mubr.msk.f32.mxu0 %vm8007_vm1, %v8006_v1  ;;  %v1397_v6 = vrot.slane %v1389_v60, %v8125_v12  ;;  %v1404_v8 = vrot.slane %v1390_v61, %v8125_v12  ;;  %v694_v9 = vcombine.high %v692_v57, %v692_v57  ;;  %v726_v10 = vrot.slane %v361_v3, %v8125_v12 }
  0x41   : > { %v1388_v11 = vcombine.low %v1380_v59, %v1387_v63  ;;  %v709_v13 = vrot.slane %v695_v0, %v8125_v12  ;;  %v710_v14 = vcombine.high %v702_v2, %v702_v2  ;;  %v719_v17 = vcombine.high %v361_v3, %v361_v3 }
  0x42   : > { %v1414_v18 = vrot.slane %v1406_v4, %v8125_v12  ;;  %v1421_v19 = vrot.slane %v1407_v5, %v8125_v12  ;;  %v736_v20 = vcombine.high %v362_v16, %v362_v16  ;;  %v734_v22 = vcombine.high %v726_v10, %v726_v10 }
  0x43   : > { %7539 = vmatmul.mubr.msk.f32.gmra.mrb[14].mxu0 %vm10994_vm2, %v1354_v52  ;;  %v711_v21 = vcombine.high %v709_v13, %v709_v13  ;;  %v743_v23 = vrot.slane %v362_v16, %v8125_v12  ;;  %v1405_v25 = vcombine.low %v1397_v6, %v1404_v8  ;;  %v1423_v26 = vcombine.low %v694_v9, %v702_v2 }
  0x44   : > { %7541 = vmatprep.mubr.msk.f32.mxu0 %vm8007_vm1, %v8006_v1  ;;  %v1424_v27 = vcombine.low %v710_v14, %v709_v13  ;;  %v733_v28 = vrot.slane %v719_v17, %v8125_v12  ;;  %v750_v30 = vrot.slane %v736_v20, %v8125_v12  ;;  %v1422_v24 = vcombine.low %v1414_v18, %v1421_v19  ;;  %v370_v17 = vld [vmem:[#allocation2 + $0xd8] sm:$0xff] }
  0x45   : > { %v1440_v31 = vcombine.low %v711_v21, %v7931_v15  ;;  %v1441_v32 = vcombine.low %v726_v10, %v734_v22  ;;  %v751_v33 = vcombine.high %v743_v23, %v743_v23  ;;  %v1431_v36 = vrot.slane %v1423_v26, %v8125_v12 }
  0x46   : > { %v1438_v37 = vrot.slane %v1424_v27, %v8125_v12  ;;  %v735_v38 = vcombine.high %v733_v28, %v733_v28  ;;  %v760_v39 = vcombine.high %v364_v29, %v364_v29  ;;  %v752_v41 = vcombine.high %v750_v30, %v750_v30 }
  0x47   : > { %7542 = vmatmul.mubr.msk.f32.gmra.mrb[16].mxu0 %vm10994_vm2, %v1371_v62  ;;  %v767_v42 = vrot.slane %v364_v29, %v8125_v12  ;;  %v1448_v43 = vrot.slane %v1440_v31, %v8125_v12  ;;  %v1455_v44 = vrot.slane %v1441_v32, %v8125_v12  ;;  %v1458_v45 = vcombine.low %v743_v23, %v751_v33  ;;  %v368_v62 = vld [vmem:[#allocation2 + $0xc8] sm:$0xff]  ;;  %v371_v32 = vld [vmem:[#allocation2 + $0xe0] sm:$0xff] }
  0x48   : > { %7544 = vmatprep.mubr.msk.f32.mxu0 %vm8007_vm1, %v8006_v1  ;;  %v1439_v46 = vcombine.low %v1431_v36, %v1438_v37  ;;  %v1457_v47 = vcombine.low %v733_v28, %v735_v38  ;;  %v774_v48 = vrot.slane %v760_v39, %v8125_v12  ;;  %v777_v49 = vcombine.high %v365_v40, %v365_v40  ;;  %v7934_v28 = vld.sshfl [vmem:[#allocation2 + $0xd0] sm:$0x3 pattern:$0x76325410] }
  0x49   : > { %v1474_v51 = vcombine.low %v750_v30, %v752_v41  ;;  %v1475_v52 = vcombine.low %v7932_v34, %v767_v42  ;;  %v1456_v53 = vcombine.low %v1448_v43, %v1455_v44  ;;  %v1472_v54 = vrot.slane %v1458_v45, %v8125_v12  ;;  %v373_v39 = vld [vmem:[#allocation2 + $0xf0] sm:$0xff] }
  0x4a   : > { %v775_v55 = vcombine.high %v767_v42, %v767_v42  ;;  %v801_v57 = vcombine.high %v367_v50, %v367_v50  ;;  %v1465_v58 = vrot.slane %v1457_v47, %v8125_v12  ;;  %v776_v59 = vcombine.high %v774_v48, %v774_v48 }
  0x4b   : > { %7545 = vmatmul.mubr.msk.f32.gmra.mrb[18].mxu0 %vm10994_vm2, %v1388_v11  ;;  %v784_v60 = vrot.slane %v365_v40, %v8125_v12  ;;  %v791_v61 = vrot.slane %v777_v49, %v8125_v12  ;;  %v1482_v63 = vrot.slane %v1474_v51, %v8125_v12  ;;  %v1489_v0 = vrot.slane %v1475_v52, %v8125_v12 }
  0x4c   : > { %7547 = vmatprep.mubr.msk.f32.mxu0 %vm8007_vm1, %v8006_v1  ;;  %v1491_v2 = vcombine.low %v775_v55, %v774_v48  ;;  %v808_v4 = vrot.slane %v367_v50, %v8125_v12  ;;  %v815_v5 = vrot.slane %v801_v57, %v8125_v12  ;;  %v1473_v6 = vcombine.low %v1465_v58, %v1472_v54  ;;  %v7935_v54 = vld.sshfl [vmem:[#allocation2 + $0xe8] sm:$0x3 pattern:$0x76325410]  ;;  %v374_v55 = vld [vmem:[#allocation2 + $0xf8] sm:$0xff] }
  0x4d   : > { %v792_v3 = vcombine.high %v784_v60, %v784_v60  ;;  %v1492_v8 = vcombine.low %v776_v59, %v784_v60  ;;  %v793_v9 = vcombine.high %v791_v61, %v791_v61  ;;  %v818_v10 = vcombine.high %v368_v62, %v368_v62 }
  0x4e   : > { %v1490_v11 = vcombine.low %v1482_v63, %v1489_v0  ;;  %v1499_v13 = vrot.slane %v1491_v2, %v8125_v12  ;;  %v816_v14 = vcombine.high %v808_v4, %v808_v4  ;;  %v817_v15 = vcombine.high %v815_v5, %v815_v5 }
  0x4f   : > { %7548 = vmatmul.mubr.msk.f32.gmra.mrb[20].mxu0 %vm10994_vm2, %v1405_v25  ;;  %v825_v16 = vrot.slane %v368_v62, %v8125_v12  ;;  %v1506_v18 = vrot.slane %v1492_v8, %v8125_v12  ;;  %v1508_v19 = vcombine.low %v792_v3, %v791_v61  ;;  %v1509_v20 = vcombine.low %v793_v9, %v7933_v56  ;;  %v376_v3 = vld [vmem:[#allocation2 + $0x108] sm:$0xff] }
  0x50   : > { %7550 = vmatprep.mubr.msk.f32.mxu0 %vm8007_vm1, %v8006_v1  ;;  %v832_v21 = vrot.slane %v818_v10, %v8125_v12  ;;  %v842_v22 = vcombine.high %v370_v17, %v370_v17  ;;  %v849_v23 = vrot.slane %v370_v17, %v8125_v12  ;;  %v1525_v25 = vcombine.low %v808_v4, %v816_v14  ;;  %v7936_v10 = vld.sshfl [vmem:[#allocation2 + $0x100] sm:$0x3 pattern:$0x76325410] }
  0x51   : > { %v1526_v26 = vcombine.low %v815_v5, %v817_v15  ;;  %v833_v27 = vcombine.high %v825_v16, %v825_v16  ;;  %v1507_v29 = vcombine.low %v1499_v13, %v1506_v18  ;;  %v1516_v30 = vrot.slane %v1508_v19, %v8125_v12 }
  0x52   : > { %v834_v31 = vcombine.high %v832_v21, %v832_v21  ;;  %v856_v33 = vrot.slane %v842_v22, %v8125_v12  ;;  %v857_v34 = vcombine.high %v849_v23, %v849_v23  ;;  %v1533_v36 = vrot.slane %v1525_v25, %v8125_v12 }
  0x53   : > { %7551 = vmatmul.mubr.msk.f32.gmra.mrb[22].mxu0 %vm10994_vm2, %v1422_v24  ;;  %v1523_v24 = vrot.slane %v1509_v20, %v8125_v12  ;;  %v1540_v37 = vrot.slane %v1526_v26, %v8125_v12  ;;  %v1542_v38 = vcombine.low %v825_v16, %v833_v27  ;;  %v859_v42 = vcombine.high %v371_v32, %v371_v32 }
  0x54   : > { %7553 = vmatprep.mubr.msk.f32.mxu0 %vm8007_vm1, %v8006_v1  ;;  %v1543_v41 = vcombine.low %v832_v21, %v834_v31  ;;  %v866_v43 = vrot.slane %v371_v32, %v8125_v12  ;;  %v1559_v44 = vcombine.low %v7934_v28, %v849_v23  ;;  %v1560_v45 = vcombine.low %v857_v34, %v856_v33  ;;  %v379_v23 = vld [vmem:[#allocation2 + $0x120] sm:$0xff]  ;;  %v7937_v28 = vld.sshfl [vmem:[#allocation2 + $0x118] sm:$0x3 pattern:$0x76325410] }
  0x55   : > { %v1524_v40 = vcombine.low %v1516_v30, %v1523_v24  ;;  %v1541_v47 = vcombine.low %v1533_v36, %v1540_v37  ;;  %v1550_v48 = vrot.slane %v1542_v38, %v8125_v12  ;;  %v883_v49 = vcombine.high %v373_v39, %v373_v39 }
  0x56   : > { %v1557_v50 = vrot.slane %v1543_v41, %v8125_v12  ;;  %v858_v51 = vcombine.high %v856_v33, %v856_v33  ;;  %v873_v52 = vrot.slane %v859_v42, %v8125_v12  ;;  %v1567_v56 = vrot.slane %v1559_v44, %v8125_v12 }
  0x57   : > { %7554 = vmatmul.mubr.msk.f32.gmra.mrb[24].mxu0 %vm10994_vm2, %v1439_v46  ;;  %v890_v46 = vrot.slane %v373_v39, %v8125_v12  ;;  %v1574_v57 = vrot.slane %v1560_v45, %v8125_v12  ;;  %v897_v60 = vrot.slane %v883_v49, %v8125_v12  ;;  %v907_v61 = vrot.slane %v374_v55, %v8125_v12  ;;  %v380_v39 = vld [vmem:[#allocation2 + $0x128] sm:$0xff] }
  0x58   : > { %7556 = vmatprep.mubr.msk.f32.mxu0 %vm8007_vm1, %v8006_v1  ;;  %v875_v59 = vcombine.high %v873_v52, %v873_v52  ;;  %v1558_v62 = vcombine.low %v1550_v48, %v1557_v50  ;;  %v1576_v63 = vcombine.low %v858_v51, %v866_v43  ;;  %v900_v2 = vcombine.high %v374_v55, %v374_v55 }
  0x59   : > { %v898_v58 = vcombine.high %v890_v46, %v890_v46  ;;  %v1575_v5 = vcombine.low %v1567_v56, %v1574_v57  ;;  %v899_v8 = vcombine.high %v897_v60, %v897_v60  ;;  %v915_v9 = vcombine.high %v907_v61, %v907_v61 }
  0x5a   : > { %v1584_v13 = vrot.slane %v1576_v63, %v8125_v12  ;;  %v914_v15 = vrot.slane %v900_v2, %v8125_v12  ;;  %v924_v16 = vcombine.high %v376_v3, %v376_v3  ;;  %v931_v22 = vrot.slane %v376_v3, %v8125_v12 }
  0x5b   : > { %7557 = vmatmul.mubr.msk.f32.gmra.mrb[26].mxu0 %vm10994_vm2, %v1456_v53  ;;  %v874_v53 = vcombine.high %v866_v43, %v866_v43  ;;  %v1594_v4 = vcombine.low %v890_v46, %v898_v58  ;;  %v1610_v20 = vcombine.low %v897_v60, %v899_v8  ;;  %v1611_v21 = vcombine.low %v907_v61, %v915_v9  ;;  %v383_v8 = vld [vmem:[#allocation2 + $0x140] sm:$0xff] }
  0x5c   : > { %7559 = vmatprep.mubr.msk.f32.mxu0 %vm8007_vm1, %v8006_v1  ;;  %v916_v26 = vcombine.high %v914_v15, %v914_v15  ;;  %v938_v27 = vrot.slane %v924_v16, %v8125_v12  ;;  %v965_v30 = vcombine.high %v379_v23, %v379_v23  ;;  %v1628_v33 = vcombine.low %v7936_v10, %v931_v22 }
  0x5d   : > { %v1577_v0 = vcombine.low %v874_v53, %v873_v52  ;;  %v1608_v17 = vrot.slane %v1594_v4, %v8125_v12  ;;  %v1618_v31 = vrot.slane %v1610_v20, %v8125_v12  ;;  %v1625_v32 = vrot.slane %v1611_v21, %v8125_v12 }
  0x5e   : > { %v1627_v34 = vcombine.low %v914_v15, %v916_v26  ;;  %v939_v36 = vcombine.high %v931_v22, %v931_v22  ;;  %v940_v37 = vcombine.high %v938_v27, %v938_v27  ;;  %v972_v42 = vrot.slane %v379_v23, %v8125_v12 }
  0x5f   : > { %7560 = vmatmul.mubr.msk.f32.gmra.mrb[28].mxu0 %vm10994_vm2, %v1473_v6  ;;  %v1593_v6 = vcombine.low %v875_v59, %v7935_v54  ;;  %v1591_v14 = vrot.slane %v1577_v0, %v8125_v12  ;;  %v979_v43 = vrot.slane %v965_v30, %v8125_v12  ;;  %v1642_v44 = vrot.slane %v1628_v33, %v8125_v12  ;;  %v382_v59 = vld [vmem:[#allocation2 + $0x138] sm:$0xff]  ;;  %v7938_v0 = vld.sshfl [vmem:[#allocation2 + $0x130] sm:$0x3 pattern:$0x76325410] }
  0x60   : > { %7562 = vmatprep.mubr.msk.f32.mxu0 %vm8007_vm1, %v8006_v1  ;;  %v982_v45 = vcombine.high %v380_v39, %v380_v39  ;;  %v1626_v46 = vcombine.low %v1618_v31, %v1625_v32  ;;  %v1644_v48 = vcombine.low %v939_v36, %v938_v27  ;;  %v980_v52 = vcombine.high %v972_v42, %v972_v42  ;;  %v7939_v27 = vld.sshfl [vmem:[#allocation2 + $0x148] sm:$0x3 pattern:$0x76325410]  ;;  %v386_v31 = vld [vmem:[#allocation2 + $0x158] sm:$0xff] }
  0x61   : > { %v1601_v19 = vrot.slane %v1593_v6, %v8125_v12  ;;  %v1592_v25 = vcombine.low %v1584_v13, %v1591_v14  ;;  %v981_v53 = vcombine.high %v979_v43, %v979_v43  ;;  %v989_v54 = vrot.slane %v380_v39, %v8125_v12 }
  0x62   : > { %v996_v55 = vrot.slane %v982_v45, %v8125_v12  ;;  %v1652_v57 = vrot.slane %v1644_v48, %v8125_v12  ;;  %v1006_v4 = vcombine.high %v382_v59, %v382_v59  ;;  %v388_v48 = vld [vmem:[#allocation2 + $0x168] sm:$0xff] }
  0x63   : > { %7563 = vmatmul.mubr.msk.f32.gmra.mrb[30].mxu0 %vm10994_vm2, %v1490_v11  ;;  %v377_v11 = vld [vmem:[#allocation2 + $0x110] sm:$0xff]  ;;  %v1609_v24 = vcombine.low %v1601_v19, %v1608_v17  ;;  %v1679_v63 = vcombine.low %v979_v43, %v981_v53  ;;  %v997_v2 = vcombine.high %v989_v54, %v989_v54  ;;  %v1023_v17 = vcombine.high %v383_v8, %v383_v8 }
  0x64   : > { %7565 = vmatprep.mubr.msk.f32.mxu0 %vm8007_vm1, %v8006_v1  ;;  %v941_v18 = vcombine.high %v377_v11, %v377_v11  ;;  %v948_v38 = vrot.slane %v377_v11, %v8125_v12  ;;  %v998_v3 = vcombine.high %v996_v55, %v996_v55  ;;  %v1020_v15 = vrot.slane %v1006_v4, %v8125_v12  ;;  %v385_v19 = vld [vmem:[#allocation2 + $0x150] sm:$0xff] }
  0x65   : > { %v1693_v11 = vrot.slane %v1679_v63, %v8125_v12  ;;  %v1695_v13 = vcombine.low %v989_v54, %v997_v2  ;;  %v1047_v22 = vcombine.high %v385_v19, %v385_v19  ;;  %v1037_v30 = vrot.slane %v1023_v17, %v8125_v12 }
  0x66   : > { %v1645_v49 = vcombine.low %v940_v37, %v948_v38  ;;  %v1696_v14 = vcombine.low %v996_v55, %v998_v3  ;;  %v1071_v37 = vrot.slane %v386_v31, %v8125_v12  ;;  %v1088_v53 = vcombine.high %v388_v48, %v388_v48 }
  0x67   : > { %7566 = vmatmul.mubr.msk.f32.gmra.mrb[32].mxu0 %vm10994_vm2, %v1507_v29  ;;  %v955_v29 = vrot.slane %v941_v18, %v8125_v12  ;;  %v1030_v18 = vrot.slane %v383_v8, %v8125_v12  ;;  %v1703_v23 = vrot.slane %v1695_v13, %v8125_v12  ;;  %v1061_v33 = vrot.slane %v1047_v22, %v8125_v12 }
  0x68   : > { %7568 = vmatprep.mubr.msk.f32.mxu0 %vm8007_vm1, %v8006_v1  ;;  %v1659_v58 = vrot.slane %v1645_v49, %v8125_v12  ;;  %v1095_v55 = vrot.slane %v388_v48, %v8125_v12 }
  0x69   : > { %v957_v41 = vcombine.high %v955_v29, %v955_v29  ;;  %v1063_v43 = vcombine.high %v1061_v33, %v1061_v33 }
  0x6a   : > { %v1660_v6 = vcombine.low %v1652_v57, %v1659_v58  ;;  %v1103_v8 = vcombine.high %v1095_v55, %v1095_v55 }
  0x6b   : > { %7569 = vmatmul.mubr.msk.f32.gmra.mrb[34].mxu0 %vm10994_vm2, %v1524_v40  ;;  %v956_v40 = vcombine.high %v948_v38, %v948_v38  ;;  %v1662_v51 = vcombine.low %v957_v41, %v7937_v28  ;;  %v1054_v28 = vrot.slane %v385_v19, %v8125_v12  ;;  %v1064_v38 = vcombine.high %v386_v31, %v386_v31 }
  0x6c   : > { %7571 = vmatprep.mubr.msk.f32.mxu0 %vm8007_vm1, %v8006_v1  ;;  %v1763_v54 = vcombine.low %v1061_v33, %v1063_v43 }
  0x6d   : > { %v1661_v50 = vcombine.low %v956_v40, %v955_v29  ;;  %v1676_v61 = vrot.slane %v1662_v51, %v8125_v12  ;;  %v1022_v29 = vcombine.high %v1020_v15, %v1020_v15  ;;  %v1062_v36 = vcombine.high %v1054_v28, %v1054_v28 }
  0x6e   : > { %v1078_v49 = vrot.slane %v1064_v38, %v8125_v12  ;;  %v1771_v2 = vrot.slane %v1763_v54, %v8125_v12 }
  0x6f   : > { %7572 = vmatmul.mubr.msk.f32.gmra.mrb[36].mxu0 %vm10994_vm2, %v1541_v47  ;;  %v1635_v47 = vrot.slane %v1627_v34, %v8125_v12  ;;  %v1669_v60 = vrot.slane %v1661_v50, %v8125_v12  ;;  %v1039_v34 = vcombine.high %v1037_v30, %v1037_v30  ;;  %v1729_v41 = vcombine.low %v1022_v29, %v1030_v18 }
  0x70   : > { %7574 = vmatprep.mubr.msk.f32.mxu0 %vm8007_vm1, %v8006_v1  ;;  %v1747_v45 = vcombine.low %v1054_v28, %v1062_v36 }
  0x71   : > { %v1643_v56 = vcombine.low %v1635_v47, %v1642_v44  ;;  %v1677_v9 = vcombine.low %v1669_v60, %v1676_v61  ;;  %v1746_v44 = vcombine.low %v1039_v34, %v7939_v27  ;;  %v7940_v47 = vld.sshfl [vmem:[#allocation2 + $0x160] sm:$0x3 pattern:$0x76325410]  ;;  %v1737_v51 = vrot.slane %v1729_v41, %v8125_v12  ;;  %v389_v60 = vld [vmem:[#allocation2 + $0x170] sm:$0xff] }
  0x72   : > { %v1761_v57 = vrot.slane %v1747_v45, %v8125_v12  ;;  %v1105_v63 = vcombine.high %v389_v60, %v389_v60  ;;  %v1781_v3 = vcombine.low %v7940_v47, %v1095_v55  ;;  %v8485_v47 = vld [vmem:[%s10987_s2] ss:$0 sm:$0xff] }
  0x73   : > { %7575 = vmatmul.mubr.msk.f32.gmra.mrb[38].mxu0 %vm10994_vm2, %v1558_v62  ;;  %v1678_v62 = vcombine.low %v972_v42, %v980_v52 }
  0x74   : > { %7577 = vmatprep.mubr.msk.f32.mxu0 %vm8007_vm1, %v8006_v1  ;;  %v1119_v13 = vrot.slane %v1105_v63, %v8125_v12 }
  0x75   : > { %v1686_v10 = vrot.slane %v1678_v62, %v8125_v12  ;;  %v1102_v62 = vrot.slane %v1088_v53, %v8125_v12 }
  0x77   : > { %7578 = vmatmul.mubr.msk.f32.gmra.mrb[40].mxu0 %vm10994_vm2, %v1575_v5  ;;  %v1013_v5 = vrot.slane %v382_v59, %v8125_v12  ;;  %v1694_v20 = vcombine.low %v1686_v10, %v1693_v11  ;;  %v1080_v59 = vcombine.high %v1078_v49, %v1078_v49  ;;  %v1104_v10 = vcombine.high %v1102_v62, %v1102_v62 }
  0x78   : > { %7580 = vmatprep.mubr.msk.f32.mxu0 %vm8007_vm1, %v8006_v1  ;;  %v1112_v11 = vrot.slane %v389_v60, %v8125_v12 }
  0x79   : > { %v1021_v16 = vcombine.high %v1013_v5, %v1013_v5  ;;  %v1712_v21 = vcombine.low %v7938_v0, %v1013_v5  ;;  %v391_v0 = vld [vmem:[#allocation2 + $0x180] sm:$0xff] }
  0x7a   : > { %v1120_v19 = vcombine.high %v1112_v11, %v1112_v11  ;;  %v1136_v22 = vrot.slane %v391_v0, %v8125_v12 }
  0x7b   : > { %7581 = vmatmul.mubr.msk.f32.gmra.mrb[42].mxu0 %vm10994_vm2, %v1592_v25  ;;  %v1710_v25 = vrot.slane %v1696_v14, %v8125_v12  ;;  %v1713_v26 = vcombine.low %v1021_v16, %v1020_v15  ;;  %v1720_v32 = vrot.slane %v1712_v21, %v8125_v12  ;;  %v1129_v14 = vcombine.high %v391_v0, %v391_v0 }
  0x7c   : > { %7583 = vmatprep.mubr.msk.f32.mxu0 %vm8007_vm1, %v8006_v1  ;;  %v1795_v15 = vrot.slane %v1781_v3, %v8125_v12  ;;  %v1121_v21 = vcombine.high %v1119_v13, %v1119_v13  ;;  %v1814_v27 = vcombine.low %v1120_v19, %v1119_v13 }
  0x7d   : > { %v1711_v39 = vcombine.low %v1703_v23, %v1710_v25  ;;  %v1727_v40 = vrot.slane %v1713_v26, %v8125_v12  ;;  %v1143_v23 = vrot.slane %v1129_v14, %v8125_v12 }
  0x7e   : > { %v1822_v31 = vrot.slane %v1814_v27, %v8125_v12 }
  0x7f   : > { %7584 = vmatmul.mubr.msk.f32.gmra.mrb[44].mxu0 %vm10994_vm2, %v1609_v24  ;;  %v1038_v24 = vcombine.high %v1030_v18, %v1030_v18  ;;  %v1728_v50 = vcombine.low %v1720_v32, %v1727_v40  ;;  %v1797_v18 = vcombine.low %v1103_v8, %v1102_v62 }
  0x80   : > { %7586 = vmatprep.mubr.msk.f32.mxu0 %vm8007_vm1, %v8006_v1 }
  0x81   : > { %v1730_v42 = vcombine.low %v1038_v24, %v1037_v30  ;;  %v1805_v26 = vrot.slane %v1797_v18, %v8125_v12  ;;  %v1144_v30 = vcombine.high %v1136_v22, %v1136_v22  ;;  %v1145_v24 = vcombine.high %v1143_v23, %v1143_v23 }
  0x83   : > { %7587 = vmatmul.mubr.msk.f32.gmra.mrb[46].mxu0 %vm10994_vm2, %v1626_v46  ;;  %v1079_v46 = vcombine.high %v1071_v37, %v1071_v37  ;;  %v1744_v52 = vrot.slane %v1730_v42, %v8125_v12  ;;  %v1831_v34 = vcombine.low %v1136_v22, %v1144_v30  ;;  %v1832_v36 = vcombine.low %v1143_v23, %v1145_v24  ;;  %v4085_v43 = vpop.permute.xlu1 %4084 }
  0x84   : > { %7589 = vmatprep.mubr.msk.f32.mxu0 %vm8007_vm1, %v8006_v1  ;;  %4229 = vst.msk [vmem:[#allocation3 + $0xf] sm:$0x1] %vm10997_vm4, %v4085_v43 }
  0x85   : > { %v1764_v58 = vcombine.low %v1071_v37, %v1079_v46  ;;  %v1745_v61 = vcombine.low %v1737_v51, %v1744_v52  ;;  %v1839_v38 = vrot.slane %v1831_v34, %v8125_v12  ;;  %v7829_v46 = vpop.permute.xlu0 %7828 }
  0x86   : > { %v7831_v51 = vunpack.i.h.bf16 %v7829_v46  ;;  %v7830_v52 = vunpack.i.l.bf16 %v7829_v46 }
  0x87   : > { %7590 = vmatmul.mubr.msk.f32.gmra.mrb[48].mxu0 %vm10994_vm2, %v1643_v56  ;;  %v1754_v56 = vrot.slane %v1746_v44, %v8125_v12  ;;  %v1778_v5 = vrot.slane %v1764_v58, %v8125_v12  ;;  %v7834_v53 = vpop.permute.xlu1 %7833 }
  0x88   : > { %7592 = vmatprep.mubr.msk.f32.mxu0 %vm8007_vm1, %v8006_v1  ;;  %v7836_v54 = vunpack.i.h.bf16 %v7834_v53  ;;  %v7835_v55 = vunpack.i.l.bf16 %v7834_v53  ;;  %4225 = vst.msk [vmem:[#allocation3 - $0x1] sm:$0xfe] %vm4224_vm5, %v7830_v52 }
  0x89   : > { %v1762_v4 = vcombine.low %v1754_v56, %v1761_v57  ;;  %v1779_v16 = vcombine.low %v1771_v2, %v1778_v5  ;;  %v4280_v58 = vpop.permute.xlu0 %4279  ;;  %4227 = vst.msk [vmem:[#allocation3 + $0x7] sm:$0xff] %vm4226_vm6, %v7831_v51 }
  0x8a   : > { %4420 = vst.msk [vmem:[#allocation3 - $0x2] sm:$0xfc] %vm4419_vm7, %v7835_v55 }
  0x8b   : > { %7593 = vmatmul.mubr.msk.f32.gmra.mrb[50].mxu0 %vm10994_vm2, %v1660_v6  ;;  %v1780_v6 = vcombine.low %v1078_v49, %v1080_v59  ;;  %4422 = vst.msk [vmem:[#allocation3 + $0x6] sm:$0xff] %vm10999_vm8, %v7836_v54 }
  0x8c   : > { %7595 = vmatprep.mubr.msk.f32.mxu0 %vm8007_vm1, %v8006_v1  ;;  %4424 = vst.msk [vmem:[#allocation3 + $0xe] sm:$0x3] %vm11002_vm9, %v4280_v58 }
  0x8d   : > { %v1788_v17 = vrot.slane %v1780_v6, %v8125_v12 }
  0x8f   : > { %7596 = vmatmul.mubr.msk.f32.gmra.mrb[52].mxu0 %vm10994_vm2, %v1677_v9  ;;  %v7941_v9 = vld.sshfl [vmem:[#allocation2 + $0x178] sm:$0x3 pattern:$0x76325410]  ;;  %v1796_v25 = vcombine.low %v1788_v17, %v1795_v15 }
  0x90   : > { %7598 = vmatprep.mubr.msk.f32.mxu0 %vm8007_vm1, %v8006_v1  ;;  %v1815_v29 = vcombine.low %v1121_v21, %v7941_v9 }
  0x92   : > { %v1829_v33 = vrot.slane %v1815_v29, %v8125_v12 }
  0x93   : > { %7599 = vmatmul.mubr.msk.f32.gmra.mrb[54].mxu0 %vm10994_vm2, %v1694_v20  ;;  %v1798_v20 = vcombine.low %v1104_v10, %v1112_v11 }
  0x94   : > { %7601 = vmatprep.mubr.msk.f32.mxu0 %vm8007_vm1, %v8006_v1  ;;  %v1830_v37 = vcombine.low %v1822_v31, %v1829_v33 }
  0x95   : > { %v1812_v28 = vrot.slane %v1798_v20, %v8125_v12 }
  0x97   : > { %7602 = vmatmul.mubr.msk.f32.gmra.mrb[56].mxu0 %vm10994_vm2, %v1711_v39  ;;  %v1813_v32 = vcombine.low %v1805_v26, %v1812_v28  ;;  %v1846_v39 = vrot.slane %v1832_v36, %v8125_v12 }
  0x98   : > { %7604 = vmatprep.mubr.msk.f32.mxu0 %vm8007_vm1, %v8006_v1 }
  0x99   : > { %v1847_v40 = vcombine.low %v1839_v38, %v1846_v39 }
  0x9b   : > { %7605 = vmatmul.mubr.msk.f32.gmra.mrb[58].mxu0 %vm10994_vm2, %v1728_v50 }
  0x9c   : > { %7607 = vmatprep.mubr.msk.f32.mxu0 %vm8007_vm1, %v8006_v1 }
  0x9f   : > { %7608 = vmatmul.mubr.msk.f32.gmra.mrb[60].mxu0 %vm10994_vm2, %v1745_v61 }
  0xa0   : > { %7610 = vmatprep.mubr.msk.f32.mxu0 %vm8007_vm1, %v8006_v1 }
  0xa3   : > { %7611 = vmatmul.mubr.msk.f32.gmra.mrb[62].mxu0 %vm10994_vm2, %v1762_v4 }
  0xa4   : > { %7613 = vmatprep.mubr.msk.f32.mxu0 %vm8007_vm1, %v8006_v1 }
  0xa7   : > { %7614 = vmatmul.mubr.msk.f32.gmra.mrb[64].mxu0 %vm10994_vm2, %v1779_v16 }
  0xa8   : > { %7616 = vmatprep.mubr.msk.f32.mxu0 %vm8007_vm1, %v8006_v1 }
  0xab   : > { %7617 = vmatmul.mubr.msk.f32.gmra.mrb[66].mxu0 %vm10994_vm2, %v1796_v25 }
  0xac   : > { %7619 = vmatprep.mubr.msk.f32.mxu0 %vm8007_vm1, %v8006_v1 }
  0xaf   : > { %7620 = vmatmul.mubr.msk.f32.gmra.mrb[68].mxu0 %vm10994_vm2, %v1813_v32 }
  0xb0   : > { %7622 = vmatprep.mubr.msk.f32.mxu0 %vm8007_vm1, %v8006_v1 }
  0xb3   : > { %7623 = vmatmul.mubr.msk.f32.gmra.mrb[70].mxu0 %vm10994_vm2, %v1830_v37 }
  0xb4   : > { %7625 = vmatprep.mubr.msk.f32.mxu0 %vm8007_vm1, %v8006_v1 }
  0xb7   : > { %7626 = vmatmul.mubr.msk.f32.gmra.mrb[72].mxu0 %vm10994_vm2, %v1847_v40 }
  0xf2   : > { %v2059_v41 = vpop.f32.mrb[0].mxu0 }
  0xf3   : > { %v7519_v42 = vpop.f32.mrb[1].mxu0 }
  0xf6   : > { %v2064_v44 = vpop.f32.mrb[2].mxu0 }
  0xf7   : > { %v7522_v45 = vpop.f32.mrb[3].mxu0 }
 0x102   : > { %v2069_v48 = vpop.f32.mrb[4].mxu0 }
 0x103   : > { %v2070_v49 = vadd.f32 %v8485_v47, %v2069_v48  ;;  %v7525_v50 = vpop.f32.mrb[5].mxu0 }
 0x105   : > { %v2265_v56 = vmax.f32 %v2070_v49, 0.0  ;;  %v2244_v57 = vpop.f32.mrb[0].mxu1 }
 0x106   : > { %v2245_v59 = vadd.f32 %v8485_v47, %v2244_v57  ;;  %v2074_v60 = vpop.f32.mrb[6].mxu0  ;;  %v7630_v61 = vpop.f32.mrb[1].mxu1 }
 0x107   : > { %v2359_v62 = vcombine.high %v2265_v56, %v2265_v56  ;;  %v2366_v63 = vrot.slane %v2265_v56, %v8125_v12  ;;  %v2075_v0 = vadd.f32 %v8485_v47, %v2074_v60  ;;  %v7528_v2 = vpop.f32.mrb[7].mxu0 }
 0x108   : > { %v2300_v3 = vmax.f32 %v2245_v59, 0.0 }
 0x109   : > { %v2373_v4 = vrot.slane %v2359_v62, %v8125_v12  ;;  %v2374_v5 = vcombine.high %v2366_v63, %v2366_v63  ;;  %v2266_v6 = vmax.f32 %v2075_v0, 0.0  ;;  %v2249_v8 = vpop.f32.mrb[2].mxu1 }
 0x10a   : > { %v2954_v9 = vcombine.high %v2300_v3, %v2300_v3  ;;  %v2961_v10 = vrot.slane %v2300_v3, %v8125_v12  ;;  %v2250_v11 = vadd.f32 %v8485_v47, %v2249_v8  ;;  %v7633_v13 = vpop.f32.mrb[3].mxu1  ;;  %v2079_v18 = vpop.f32.mrb[8].mxu0 }
 0x10b   : > { %v3086_v14 = vcombine.low %v2374_v5, %v2373_v4  ;;  %v2375_v15 = vcombine.high %v2373_v4, %v2373_v4  ;;  %v2376_v16 = vcombine.high %v2266_v6, %v2266_v6  ;;  %v2383_v17 = vrot.slane %v2266_v6, %v8125_v12  ;;  %v7531_v23 = vpop.f32.mrb[9].mxu0 }
 0x10c   : > { %v2968_v19 = vrot.slane %v2954_v9, %v8125_v12  ;;  %v2969_v20 = vcombine.high %v2961_v10, %v2961_v10  ;;  %v2301_v21 = vmax.f32 %v2250_v11, 0.0  ;;  %v2080_v22 = vadd.f32 %v8485_v47, %v2079_v18 }
 0x10d   : > { %v2390_v25 = vrot.slane %v2376_v16, %v8125_v12  ;;  %v2391_v26 = vcombine.high %v2383_v17, %v2383_v17  ;;  %v3087_v27 = vcombine.low %v2375_v15, %v2383_v17  ;;  %v3094_v33 = vrot.slane %v3086_v14, %v8125_v12 }
 0x10e   : > { %v2970_v28 = vcombine.high %v2968_v19, %v2968_v19  ;;  %v2977_v29 = vrot.slane %v2301_v21, %v8125_v12  ;;  %v2267_v30 = vmax.f32 %v2080_v22, 0.0  ;;  %v3718_v24 = vcombine.low %v2961_v10, %v2969_v20  ;;  %v2084_v32 = vpop.f32.mrb[10].mxu0 }
 0x10f   : > { %v2392_v31 = vcombine.high %v2390_v25, %v2390_v25  ;;  %v3101_v34 = vrot.slane %v3087_v27, %v8125_v12  ;;  %v2085_v39 = vadd.f32 %v8485_v47, %v2084_v32  ;;  %v7534_v40 = vpop.f32.mrb[11].mxu0  ;;  %v3103_v41 = vcombine.low %v2391_v26, %v2390_v25 }
 0x110   : > { %v3719_v36 = vcombine.low %v2968_v19, %v2970_v28  ;;  %v2393_v37 = vcombine.high %v2267_v30, %v2267_v30  ;;  %v2400_v38 = vrot.slane %v2267_v30, %v8125_v12  ;;  %v3741_v42 = vrot.slane %v2977_v29, %v8125_v12 }
 0x111   : > { %v3102_v43 = vcombine.low %v3094_v33, %v3101_v34  ;;  %v2268_v48 = vmax.f32 %v2085_v39, 0.0  ;;  %v3726_v50 = vrot.slane %v3718_v24, %v8125_v12  ;;  %v3111_v59 = vrot.slane %v3103_v41, %v8125_v12 }
 0x112   : > { %v2407_v44 = vrot.slane %v2393_v37, %v8125_v12  ;;  %v2408_v45 = vcombine.high %v2400_v38, %v2400_v38  ;;  %v3104_v46 = vcombine.low %v2392_v31, %v2400_v38  ;;  %3883 = vrot.lane.b32.xlu1 %v3741_v42, %s8011_s9  ;;  %6875 = vst.msk [vmem:[%s8515_s13 + $0xff] sm:$0x1] %vm6829_vm10, %v3741_v42  ;;  %v2089_v49 = vpop.f32.mrb[12].mxu0 }
 0x113   : > { %3789 = vrot.lane.b32.xlu0 %v3102_v43, %s8011_s9  ;;  %6827 = vst.msk [vmem:[%s8515_s13 - $0x1] sm:$0xfe] %vm6826_vm11, %v3102_v43  ;;  %v3733_v51 = vrot.slane %v3719_v36, %v8125_v12  ;;  %v2410_v53 = vcombine.high %v2268_v48, %v2268_v48  ;;  %v2417_v54 = vrot.slane %v2268_v48, %v8125_v12  ;;  %v7537_v56 = vpop.f32.mrb[13].mxu0 }
 0x114   : > { %v2409_v52 = vcombine.high %v2407_v44, %v2407_v44  ;;  %v2090_v55 = vadd.f32 %v8485_v47, %v2089_v49  ;;  %v3126_v57 = vrot.slane %v2408_v45, %v8125_v12  ;;  %v3118_v60 = vrot.slane %v3104_v46, %v8125_v12 }
 0x115   : > { %v3734_v58 = vcombine.low %v3726_v50, %v3733_v51  ;;  %v2424_v62 = vrot.slane %v2410_v53, %v8125_v12  ;;  %v2425_v63 = vcombine.high %v2417_v54, %v2417_v54 }
 0x116   : > { %v3127_v61 = vcombine.low %v2407_v44, %v2409_v52  ;;  %v2269_v0 = vmax.f32 %v2090_v55, 0.0  ;;  %3793 = vrot.lane.b32.xlu1 %v3126_v57, %s8011_s9  ;;  %6830 = vst.msk [vmem:[%s8515_s13 + $0xf] sm:$0x1] %vm6829_vm10, %v3126_v57  ;;  %v2094_v2 = vpop.f32.mrb[14].mxu0  ;;  %v3119_v3 = vcombine.low %v3111_v59, %v3118_v60 }
 0x117   : > { %3881 = vrot.lane.b32.xlu0 %v3734_v58, %s8011_s9  ;;  %6874 = vst.msk [vmem:[%s8515_s13 + $0xf7] sm:$0xff] %vm3999_vm3, %v3734_v58  ;;  %v2426_v4 = vcombine.high %v2424_v62, %v2424_v62  ;;  %v3128_v5 = vcombine.low %v2417_v54, %v2425_v63  ;;  %v7540_v9 = vpop.f32.mrb[15].mxu0  ;;  %v2095_v10 = vadd.f32 %v8485_v47, %v2094_v2 }
 0x118   : > { %v2427_v6 = vcombine.high %v2269_v0, %v2269_v0  ;;  %v2434_v8 = vrot.slane %v2269_v0, %v8125_v12  ;;  %6828 = vst.msk [vmem:[%s8515_s13 + $0x7] sm:$0xff] %vm3999_vm3, %v3119_v3  ;;  %v3135_v11 = vrot.slane %v3127_v61, %v8125_v12 }
 0x119   : > { %v3144_v13 = vcombine.low %v2424_v62, %v2426_v4  ;;  %v3142_v16 = vrot.slane %v3128_v5, %v8125_v12  ;;  %v2270_v17 = vmax.f32 %v2095_v10, 0.0 }
 0x11a   : > { %v2441_v14 = vrot.slane %v2427_v6, %v8125_v12  ;;  %v2442_v15 = vcombine.high %v2434_v8, %v2434_v8  ;;  %v2099_v18 = vpop.f32.mrb[16].mxu0 }
 0x11b   : > { %3791 = vrot.lane.b32.xlu0 %v3119_v3, %s8011_s9  ;;  %v2100_v21 = vadd.f32 %v8485_v47, %v2099_v18  ;;  %v7543_v22 = vpop.f32.mrb[17].mxu0  ;;  %v3143_v23 = vcombine.low %v3135_v11, %v3142_v16  ;;  %v2444_v25 = vcombine.high %v2270_v17, %v2270_v17  ;;  %v2451_v26 = vrot.slane %v2270_v17, %v8125_v12 }
 0x11c   : > { %v3145_v19 = vcombine.low %v2434_v8, %v2442_v15  ;;  %v2443_v20 = vcombine.high %v2441_v14, %v2441_v14  ;;  %v3167_v27 = vrot.slane %v2441_v14, %v8125_v12  ;;  %v3152_v29 = vrot.slane %v3144_v13, %v8125_v12 }
 0x11d   : > { %v2271_v28 = vmax.f32 %v2100_v21, 0.0  ;;  %3795 = vrot.lane.b32.xlu1 %v3143_v23, %s8011_s9  ;;  %6831 = vst.msk [vmem:[%s8515_s13 + $0xf] sm:$0xfe] %vm6826_vm11, %v3143_v23  ;;  %v2458_v24 = vrot.slane %v2444_v25, %v8125_v12  ;;  %v2459_v31 = vcombine.high %v2451_v26, %v2451_v26 }
 0x11e   : > { %v3159_v30 = vrot.slane %v3145_v19, %v8125_v12  ;;  %v3168_v32 = vcombine.low %v2443_v20, %v2451_v26  ;;  %v2104_v33 = vpop.f32.mrb[18].mxu0  ;;  %6833 = vst.msk [vmem:[%s8515_s13 + $0x1f] sm:$0x1] %vm6829_vm10, %v3167_v27 }
 0x11f   : > { %v2461_v34 = vcombine.high %v2271_v28, %v2271_v28  ;;  %v2468_v36 = vrot.slane %v2271_v28, %v8125_v12  ;;  %v2105_v37 = vadd.f32 %v8485_v47, %v2104_v33  ;;  %v7546_v38 = vpop.f32.mrb[19].mxu0  ;;  %v3169_v40 = vcombine.low %v2459_v31, %v2458_v24 }
 0x120   : > { %v3160_v39 = vcombine.low %v3152_v29, %v3159_v30  ;;  %v2460_v41 = vcombine.high %v2458_v24, %v2458_v24  ;;  %v3176_v48 = vrot.slane %v3168_v32, %v8125_v12 }
 0x121   : > { %v2475_v42 = vrot.slane %v2461_v34, %v8125_v12  ;;  %v2476_v43 = vcombine.high %v2468_v36, %v2468_v36  ;;  %v2272_v44 = vmax.f32 %v2105_v37, 0.0  ;;  %3799 = vrot.lane.b32.xlu1 %v3167_v27, %s8011_s9  ;;  %v3183_v49 = vrot.slane %v3169_v40, %v8125_v12 }
 0x122   : > { %3797 = vrot.lane.b32.xlu0 %v3160_v39, %s8011_s9  ;;  %6832 = vst.msk [vmem:[%s8515_s13 + $0x17] sm:$0xff] %vm3999_vm3, %v3160_v39  ;;  %v3185_v45 = vcombine.low %v2460_v41, %v2468_v36  ;;  %v2109_v46 = vpop.f32.mrb[20].mxu0 }
 0x123   : > { %v3186_v50 = vcombine.low %v2476_v43, %v2475_v42  ;;  %v2478_v51 = vcombine.high %v2272_v44, %v2272_v44  ;;  %v2485_v52 = vrot.slane %v2272_v44, %v8125_v12  ;;  %v2110_v53 = vadd.f32 %v8485_v47, %v2109_v46  ;;  %v7549_v54 = vpop.f32.mrb[21].mxu0 }
 0x124   : > { %v3184_v55 = vcombine.low %v3176_v48, %v3183_v49  ;;  %v2477_v56 = vcombine.high %v2475_v42, %v2475_v42  ;;  %v3193_v62 = vrot.slane %v3185_v45, %v8125_v12 }
 0x125   : > { %v2492_v57 = vrot.slane %v2478_v51, %v8125_v12  ;;  %v2493_v58 = vcombine.high %v2485_v52, %v2485_v52  ;;  %v2273_v59 = vmax.f32 %v2110_v53, 0.0  ;;  %v3200_v60 = vrot.slane %v3186_v50, %v8125_v12 }
 0x126   : > { %3801 = vrot.lane.b32.xlu0 %v3184_v55, %s8011_s9  ;;  %6834 = vst.msk [vmem:[%s8515_s13 + $0x1f] sm:$0xfe] %vm6826_vm11, %v3184_v55  ;;  %v2114_v61 = vpop.f32.mrb[22].mxu0  ;;  %v3208_v63 = vrot.slane %v2477_v56, %v8125_v12 }
 0x127   : > { %v2494_v0 = vcombine.high %v2492_v57, %v2492_v57  ;;  %v3209_v2 = vcombine.low %v2485_v52, %v2493_v58  ;;  %v2495_v3 = vcombine.high %v2273_v59, %v2273_v59  ;;  %v2502_v4 = vrot.slane %v2273_v59, %v8125_v12  ;;  %v7552_v5 = vpop.f32.mrb[23].mxu0 }
 0x128   : > { %v2115_v6 = vadd.f32 %v8485_v47, %v2114_v61  ;;  %v3201_v8 = vcombine.low %v3193_v62, %v3200_v60  ;;  %6836 = vst.msk [vmem:[%s8515_s13 + $0x2f] sm:$0x1] %vm6829_vm10, %v3208_v63 }
 0x129   : > { %v3210_v9 = vcombine.low %v2492_v57, %v2494_v0  ;;  %v2509_v10 = vrot.slane %v2495_v3, %v8125_v12  ;;  %v2510_v11 = vcombine.high %v2502_v4, %v2502_v4  ;;  %v3217_v15 = vrot.slane %v3209_v2, %v8125_v12 }
 0x12a   : > { %v2274_v13 = vmax.f32 %v2115_v6, 0.0  ;;  %3803 = vrot.lane.b32.xlu1 %v3201_v8, %s8011_s9  ;;  %6835 = vst.msk [vmem:[%s8515_s13 + $0x27] sm:$0xff] %vm3999_vm3, %v3201_v8  ;;  %3805 = vrot.lane.b32.xlu0 %v3208_v63, %s8011_s9  ;;  %v2119_v14 = vpop.f32.mrb[24].mxu0 }
 0x12b   : > { %v2511_v16 = vcombine.high %v2509_v10, %v2509_v10  ;;  %v3226_v17 = vcombine.low %v2502_v4, %v2510_v11  ;;  %v2120_v18 = vadd.f32 %v8485_v47, %v2119_v14  ;;  %v7555_v19 = vpop.f32.mrb[25].mxu0  ;;  %v3224_v20 = vrot.slane %v3210_v9, %v8125_v12 }
 0x12c   : > { %v2512_v21 = vcombine.high %v2274_v13, %v2274_v13  ;;  %v2519_v22 = vrot.slane %v2274_v13, %v8125_v12 }
 0x12d   : > { %v3227_v23 = vcombine.low %v2509_v10, %v2511_v16  ;;  %v2275_v25 = vmax.f32 %v2120_v18, 0.0  ;;  %v3225_v26 = vcombine.low %v3217_v15, %v3224_v20  ;;  %v3234_v30 = vrot.slane %v3226_v17, %v8125_v12 }
 0x12e   : > { %v2526_v27 = vrot.slane %v2512_v21, %v8125_v12  ;;  %v2527_v28 = vcombine.high %v2519_v22, %v2519_v22  ;;  %v2124_v29 = vpop.f32.mrb[26].mxu0  ;;  %v3249_v24 = vrot.slane %v2519_v22, %v8125_v12 }
 0x12f   : > { %v2529_v31 = vcombine.high %v2275_v25, %v2275_v25  ;;  %v2536_v32 = vrot.slane %v2275_v25, %v8125_v12  ;;  %v2125_v33 = vadd.f32 %v8485_v47, %v2124_v29  ;;  %3807 = vrot.lane.b32.xlu1 %v3225_v26, %s8011_s9  ;;  %6837 = vst.msk [vmem:[%s8515_s13 + $0x2f] sm:$0xfe] %vm6826_vm11, %v3225_v26  ;;  %v7558_v34 = vpop.f32.mrb[27].mxu0 }
 0x130   : > { %v3241_v36 = vrot.slane %v3227_v23, %v8125_v12  ;;  %v3250_v37 = vcombine.low %v2527_v28, %v2526_v27  ;;  %v2528_v38 = vcombine.high %v2526_v27, %v2526_v27  ;;  %6839 = vst.msk [vmem:[%s8515_s13 + $0x3f] sm:$0x1] %vm6829_vm10, %v3249_v24 }
 0x131   : > { %v2543_v39 = vrot.slane %v2529_v31, %v8125_v12  ;;  %v2544_v40 = vcombine.high %v2536_v32, %v2536_v32  ;;  %v2276_v41 = vmax.f32 %v2125_v33, 0.0 }
 0x132   : > { %v3242_v42 = vcombine.low %v3234_v30, %v3241_v36  ;;  %v3251_v43 = vcombine.low %v2528_v38, %v2536_v32  ;;  %v2129_v44 = vpop.f32.mrb[28].mxu0  ;;  %v3258_v52 = vrot.slane %v3250_v37, %v8125_v12 }
 0x133   : > { %v3267_v45 = vcombine.low %v2544_v40, %v2543_v39  ;;  %v2545_v46 = vcombine.high %v2543_v39, %v2543_v39  ;;  %v2546_v48 = vcombine.high %v2276_v41, %v2276_v41  ;;  %v2553_v49 = vrot.slane %v2276_v41, %v8125_v12  ;;  %v7561_v50 = vpop.f32.mrb[29].mxu0  ;;  %3811 = vrot.lane.b32.xlu1 %v3249_v24, %s8011_s9 }
 0x134   : > { %3809 = vrot.lane.b32.xlu0 %v3242_v42, %s8011_s9  ;;  %6838 = vst.msk [vmem:[%s8515_s13 + $0x37] sm:$0xff] %vm3999_vm3, %v3242_v42  ;;  %v2130_v51 = vadd.f32 %v8485_v47, %v2129_v44  ;;  %v3265_v53 = vrot.slane %v3251_v43, %v8125_v12 }
 0x135   : > { %v2560_v54 = vrot.slane %v2546_v48, %v8125_v12  ;;  %v2561_v55 = vcombine.high %v2553_v49, %v2553_v49  ;;  %v3268_v56 = vcombine.low %v2545_v46, %v2553_v49  ;;  %v3275_v60 = vrot.slane %v3267_v45, %v8125_v12 }
 0x136   : > { %v2277_v57 = vmax.f32 %v2130_v51, 0.0  ;;  %v2134_v58 = vpop.f32.mrb[30].mxu0  ;;  %v3266_v59 = vcombine.low %v3258_v52, %v3265_v53 }
 0x137   : > { %v2562_v61 = vcombine.high %v2560_v54, %v2560_v54  ;;  %v2135_v62 = vadd.f32 %v8485_v47, %v2134_v58  ;;  %v7564_v63 = vpop.f32.mrb[31].mxu0  ;;  %v3282_v0 = vrot.slane %v3268_v56, %v8125_v12  ;;  %v3290_v2 = vrot.slane %v2561_v55, %v8125_v12 }
 0x138   : > { %v2563_v3 = vcombine.high %v2277_v57, %v2277_v57  ;;  %v2570_v4 = vrot.slane %v2277_v57, %v8125_v12  ;;  %3813 = vrot.lane.b32.xlu0 %v3266_v59, %s8011_s9  ;;  %6840 = vst.msk [vmem:[%s8515_s13 + $0x3f] sm:$0xfe] %vm6826_vm11, %v3266_v59 }
 0x139   : > { %v2278_v5 = vmax.f32 %v2135_v62, 0.0  ;;  %v3283_v6 = vcombine.low %v3275_v60, %v3282_v0  ;;  %6842 = vst.msk [vmem:[%s8515_s13 + $0x4f] sm:$0x1] %vm6829_vm10, %v3290_v2  ;;  %v3291_v8 = vcombine.low %v2560_v54, %v2562_v61 }
 0x13a   : > { %v2577_v9 = vrot.slane %v2563_v3, %v8125_v12  ;;  %v2578_v10 = vcombine.high %v2570_v4, %v2570_v4  ;;  %v2139_v11 = vpop.f32.mrb[32].mxu0 }
 0x13b   : > { %v2580_v13 = vcombine.high %v2278_v5, %v2278_v5  ;;  %v2587_v14 = vrot.slane %v2278_v5, %v8125_v12  ;;  %v2140_v15 = vadd.f32 %v8485_v47, %v2139_v11  ;;  %3815 = vrot.lane.b32.xlu1 %v3283_v6, %s8011_s9  ;;  %6841 = vst.msk [vmem:[%s8515_s13 + $0x47] sm:$0xff] %vm3999_vm3, %v3283_v6  ;;  %v7567_v16 = vpop.f32.mrb[33].mxu0 }
 0x13c   : > { %v2579_v17 = vcombine.high %v2577_v9, %v2577_v9  ;;  %v3292_v18 = vcombine.low %v2570_v4, %v2578_v10  ;;  %3817 = vrot.lane.b32.xlu0 %v3290_v2, %s8011_s9  ;;  %v3299_v25 = vrot.slane %v3291_v8, %v8125_v12 }
 0x13d   : > { %v2594_v19 = vrot.slane %v2580_v13, %v8125_v12  ;;  %v2595_v20 = vcombine.high %v2587_v14, %v2587_v14  ;;  %v2279_v21 = vmax.f32 %v2140_v15, 0.0 }
 0x13e   : > { %v3308_v22 = vcombine.low %v2577_v9, %v2579_v17  ;;  %v2144_v23 = vpop.f32.mrb[34].mxu0  ;;  %v3306_v26 = vrot.slane %v3292_v18, %v8125_v12 }
 0x13f   : > { %v3309_v27 = vcombine.low %v2587_v14, %v2595_v20  ;;  %v2596_v28 = vcombine.high %v2594_v19, %v2594_v19  ;;  %v2597_v29 = vcombine.high %v2279_v21, %v2279_v21  ;;  %v2604_v30 = vrot.slane %v2279_v21, %v8125_v12  ;;  %v7570_v24 = vpop.f32.mrb[35].mxu0 }
 0x140   : > { %v2145_v31 = vadd.f32 %v8485_v47, %v2144_v23  ;;  %v3307_v32 = vcombine.low %v3299_v25, %v3306_v26  ;;  %v3316_v33 = vrot.slane %v3308_v22, %v8125_v12  ;;  %v3331_v34 = vrot.slane %v2594_v19, %v8125_v12 }
 0x141   : > { %v2611_v36 = vrot.slane %v2597_v29, %v8125_v12  ;;  %v2612_v37 = vcombine.high %v2604_v30, %v2604_v30  ;;  %v3332_v38 = vcombine.low %v2596_v28, %v2604_v30  ;;  %v3323_v39 = vrot.slane %v3309_v27, %v8125_v12 }
 0x142   : > { %v2280_v40 = vmax.f32 %v2145_v31, 0.0  ;;  %3819 = vrot.lane.b32.xlu1 %v3307_v32, %s8011_s9  ;;  %6843 = vst.msk [vmem:[%s8515_s13 + $0x4f] sm:$0xfe] %vm6826_vm11, %v3307_v32  ;;  %v2149_v41 = vpop.f32.mrb[36].mxu0 }
 0x143   : > { %6845 = vst.msk [vmem:[%s8515_s13 + $0x5f] sm:$0x1] %vm6829_vm10, %v3331_v34  ;;  %v3333_v42 = vcombine.low %v2612_v37, %v2611_v36  ;;  %v2613_v43 = vcombine.high %v2611_v36, %v2611_v36  ;;  %v2150_v44 = vadd.f32 %v8485_v47, %v2149_v41  ;;  %v7573_v45 = vpop.f32.mrb[37].mxu0  ;;  %v3324_v46 = vcombine.low %v3316_v33, %v3323_v39 }
 0x144   : > { %v2614_v48 = vcombine.high %v2280_v40, %v2280_v40  ;;  %v2621_v49 = vrot.slane %v2280_v40, %v8125_v12  ;;  %v3340_v51 = vrot.slane %v3332_v38, %v8125_v12 }
 0x145   : > { %v2281_v50 = vmax.f32 %v2150_v44, 0.0  ;;  %3821 = vrot.lane.b32.xlu0 %v3324_v46, %s8011_s9  ;;  %6844 = vst.msk [vmem:[%s8515_s13 + $0x57] sm:$0xff] %vm3999_vm3, %v3324_v46  ;;  %v3347_v52 = vrot.slane %v3333_v42, %v8125_v12 }
 0x146   : > { %v2628_v53 = vrot.slane %v2614_v48, %v8125_v12  ;;  %v2629_v54 = vcombine.high %v2621_v49, %v2621_v49  ;;  %v3349_v55 = vcombine.low %v2613_v43, %v2621_v49  ;;  %3823 = vrot.lane.b32.xlu1 %v3331_v34, %s8011_s9  ;;  %v2154_v56 = vpop.f32.mrb[38].mxu0 }
 0x147   : > { %v2631_v57 = vcombine.high %v2281_v50, %v2281_v50  ;;  %v2638_v58 = vrot.slane %v2281_v50, %v8125_v12  ;;  %v2155_v59 = vadd.f32 %v8485_v47, %v2154_v56  ;;  %v7576_v60 = vpop.f32.mrb[39].mxu0  ;;  %v3348_v61 = vcombine.low %v3340_v51, %v3347_v52 }
 0x148   : > { %v3350_v62 = vcombine.low %v2629_v54, %v2628_v53  ;;  %v2630_v63 = vcombine.high %v2628_v53, %v2628_v53  ;;  %v3357_v5 = vrot.slane %v3349_v55, %v8125_v12 }
 0x149   : > { %v2645_v0 = vrot.slane %v2631_v57, %v8125_v12  ;;  %v2646_v2 = vcombine.high %v2638_v58, %v2638_v58  ;;  %v2282_v3 = vmax.f32 %v2155_v59, 0.0  ;;  %3825 = vrot.lane.b32.xlu0 %v3348_v61, %s8011_s9  ;;  %6846 = vst.msk [vmem:[%s8515_s13 + $0x5f] sm:$0xfe] %vm6826_vm11, %v3348_v61 }
 0x14a   : > { %v2159_v4 = vpop.f32.mrb[40].mxu0  ;;  %v3364_v6 = vrot.slane %v3350_v62, %v8125_v12  ;;  %v3372_v8 = vrot.slane %v2630_v63, %v8125_v12 }
 0x14b   : > { %v2647_v9 = vcombine.high %v2645_v0, %v2645_v0  ;;  %v3373_v10 = vcombine.low %v2638_v58, %v2646_v2  ;;  %v2648_v11 = vcombine.high %v2282_v3, %v2282_v3  ;;  %v2655_v13 = vrot.slane %v2282_v3, %v8125_v12  ;;  %v7579_v14 = vpop.f32.mrb[41].mxu0 }
 0x14c   : > { %v2160_v15 = vadd.f32 %v8485_v47, %v2159_v4  ;;  %v3365_v16 = vcombine.low %v3357_v5, %v3364_v6  ;;  %6848 = vst.msk [vmem:[%s8515_s13 + $0x6f] sm:$0x1] %vm6829_vm10, %v3372_v8 }
 0x14d   : > { %v3374_v17 = vcombine.low %v2645_v0, %v2647_v9  ;;  %v2662_v18 = vrot.slane %v2648_v11, %v8125_v12  ;;  %v2663_v19 = vcombine.high %v2655_v13, %v2655_v13  ;;  %3829 = vrot.lane.b32.xlu0 %v3372_v8, %s8011_s9  ;;  %v3381_v22 = vrot.slane %v3373_v10, %v8125_v12 }
 0x14e   : > { %v2283_v20 = vmax.f32 %v2160_v15, 0.0  ;;  %3827 = vrot.lane.b32.xlu1 %v3365_v16, %s8011_s9  ;;  %6847 = vst.msk [vmem:[%s8515_s13 + $0x67] sm:$0xff] %vm3999_vm3, %v3365_v16  ;;  %v2164_v21 = vpop.f32.mrb[42].mxu0 }
 0x14f   : > { %v2664_v23 = vcombine.high %v2662_v18, %v2662_v18  ;;  %v3390_v25 = vcombine.low %v2655_v13, %v2663_v19  ;;  %v2165_v26 = vadd.f32 %v8485_v47, %v2164_v21  ;;  %v7582_v27 = vpop.f32.mrb[43].mxu0  ;;  %v3388_v28 = vrot.slane %v3374_v17, %v8125_v12 }
 0x150   : > { %v2665_v29 = vcombine.high %v2283_v20, %v2283_v20  ;;  %v2672_v30 = vrot.slane %v2283_v20, %v8125_v12 }
 0x151   : > { %v3391_v24 = vcombine.low %v2662_v18, %v2664_v23  ;;  %v2284_v31 = vmax.f32 %v2165_v26, 0.0  ;;  %v3389_v32 = vcombine.low %v3381_v22, %v3388_v28  ;;  %v3398_v37 = vrot.slane %v3390_v25, %v8125_v12 }
 0x152   : > { %v2679_v33 = vrot.slane %v2665_v29, %v8125_v12  ;;  %v2680_v34 = vcombine.high %v2672_v30, %v2672_v30  ;;  %v2169_v36 = vpop.f32.mrb[44].mxu0  ;;  %v3413_v38 = vrot.slane %v2672_v30, %v8125_v12 }
 0x153   : > { %v2682_v39 = vcombine.high %v2284_v31, %v2284_v31  ;;  %v2689_v40 = vrot.slane %v2284_v31, %v8125_v12  ;;  %v2170_v41 = vadd.f32 %v8485_v47, %v2169_v36  ;;  %3831 = vrot.lane.b32.xlu1 %v3389_v32, %s8011_s9  ;;  %6849 = vst.msk [vmem:[%s8515_s13 + $0x6f] sm:$0xfe] %vm6826_vm11, %v3389_v32  ;;  %v7585_v42 = vpop.f32.mrb[45].mxu0 }
 0x154   : > { %v3405_v43 = vrot.slane %v3391_v24, %v8125_v12  ;;  %v3414_v44 = vcombine.low %v2680_v34, %v2679_v33  ;;  %v2681_v45 = vcombine.high %v2679_v33, %v2679_v33  ;;  %6851 = vst.msk [vmem:[%s8515_s13 + $0x7f] sm:$0x1] %vm6829_vm10, %v3413_v38 }
 0x155   : > { %v2696_v46 = vrot.slane %v2682_v39, %v8125_v12  ;;  %v2697_v48 = vcombine.high %v2689_v40, %v2689_v40  ;;  %v2285_v49 = vmax.f32 %v2170_v41, 0.0 }
 0x156   : > { %v3406_v50 = vcombine.low %v3398_v37, %v3405_v43  ;;  %v3415_v51 = vcombine.low %v2681_v45, %v2689_v40  ;;  %v2174_v52 = vpop.f32.mrb[46].mxu0  ;;  %v3422_v59 = vrot.slane %v3414_v44, %v8125_v12 }
 0x157   : > { %v3431_v53 = vcombine.low %v2697_v48, %v2696_v46  ;;  %v2698_v54 = vcombine.high %v2696_v46, %v2696_v46  ;;  %v2699_v55 = vcombine.high %v2285_v49, %v2285_v49  ;;  %v2706_v56 = vrot.slane %v2285_v49, %v8125_v12  ;;  %v7588_v57 = vpop.f32.mrb[47].mxu0  ;;  %3835 = vrot.lane.b32.xlu1 %v3413_v38, %s8011_s9 }
 0x158   : > { %3833 = vrot.lane.b32.xlu0 %v3406_v50, %s8011_s9  ;;  %6850 = vst.msk [vmem:[%s8515_s13 + $0x77] sm:$0xff] %vm3999_vm3, %v3406_v50  ;;  %v2175_v58 = vadd.f32 %v8485_v47, %v2174_v52  ;;  %v3429_v60 = vrot.slane %v3415_v51, %v8125_v12 }
 0x159   : > { %v2713_v61 = vrot.slane %v2699_v55, %v8125_v12  ;;  %v2714_v62 = vcombine.high %v2706_v56, %v2706_v56  ;;  %v3432_v63 = vcombine.low %v2698_v54, %v2706_v56  ;;  %v3439_v4 = vrot.slane %v3431_v53, %v8125_v12 }
 0x15a   : > { %v2286_v0 = vmax.f32 %v2175_v58, 0.0  ;;  %v2179_v2 = vpop.f32.mrb[48].mxu0  ;;  %v3430_v3 = vcombine.low %v3422_v59, %v3429_v60 }
 0x15b   : > { %v2715_v5 = vcombine.high %v2713_v61, %v2713_v61  ;;  %v2180_v6 = vadd.f32 %v8485_v47, %v2179_v2  ;;  %v7591_v8 = vpop.f32.mrb[49].mxu0  ;;  %v3446_v9 = vrot.slane %v3432_v63, %v8125_v12  ;;  %v3454_v10 = vrot.slane %v2714_v62, %v8125_v12 }
 0x15c   : > { %v2716_v11 = vcombine.high %v2286_v0, %v2286_v0  ;;  %v2723_v13 = vrot.slane %v2286_v0, %v8125_v12  ;;  %3837 = vrot.lane.b32.xlu0 %v3430_v3, %s8011_s9  ;;  %6852 = vst.msk [vmem:[%s8515_s13 + $0x7f] sm:$0xfe] %vm6826_vm11, %v3430_v3 }
 0x15d   : > { %v2287_v14 = vmax.f32 %v2180_v6, 0.0  ;;  %v3447_v15 = vcombine.low %v3439_v4, %v3446_v9  ;;  %6854 = vst.msk [vmem:[%s8515_s13 + $0x8f] sm:$0x1] %vm6829_vm10, %v3454_v10  ;;  %v3455_v16 = vcombine.low %v2713_v61, %v2715_v5 }
 0x15e   : > { %v2730_v17 = vrot.slane %v2716_v11, %v8125_v12  ;;  %v2731_v18 = vcombine.high %v2723_v13, %v2723_v13  ;;  %v2184_v19 = vpop.f32.mrb[50].mxu0 }
 0x15f   : > { %v2733_v20 = vcombine.high %v2287_v14, %v2287_v14  ;;  %v2740_v21 = vrot.slane %v2287_v14, %v8125_v12  ;;  %v2185_v22 = vadd.f32 %v8485_v47, %v2184_v19  ;;  %3839 = vrot.lane.b32.xlu1 %v3447_v15, %s8011_s9  ;;  %6853 = vst.msk [vmem:[%s8515_s13 + $0x87] sm:$0xff] %vm3999_vm3, %v3447_v15  ;;  %v7594_v23 = vpop.f32.mrb[51].mxu0 }
 0x160   : > { %v2732_v25 = vcombine.high %v2730_v17, %v2730_v17  ;;  %v3456_v26 = vcombine.low %v2723_v13, %v2731_v18  ;;  %3841 = vrot.lane.b32.xlu0 %v3454_v10, %s8011_s9  ;;  %v3463_v31 = vrot.slane %v3455_v16, %v8125_v12 }
 0x161   : > { %v2747_v27 = vrot.slane %v2733_v20, %v8125_v12  ;;  %v2748_v28 = vcombine.high %v2740_v21, %v2740_v21  ;;  %v2288_v29 = vmax.f32 %v2185_v22, 0.0 }
 0x162   : > { %v3472_v30 = vcombine.low %v2730_v17, %v2732_v25  ;;  %v2189_v24 = vpop.f32.mrb[52].mxu0  ;;  %v3470_v32 = vrot.slane %v3456_v26, %v8125_v12 }
 0x163   : > { %v3473_v33 = vcombine.low %v2740_v21, %v2748_v28  ;;  %v2749_v34 = vcombine.high %v2747_v27, %v2747_v27  ;;  %v2750_v36 = vcombine.high %v2288_v29, %v2288_v29  ;;  %v2757_v37 = vrot.slane %v2288_v29, %v8125_v12  ;;  %v7597_v38 = vpop.f32.mrb[53].mxu0 }
 0x164   : > { %v2190_v39 = vadd.f32 %v8485_v47, %v2189_v24  ;;  %v3471_v40 = vcombine.low %v3463_v31, %v3470_v32  ;;  %v3480_v41 = vrot.slane %v3472_v30, %v8125_v12  ;;  %v3495_v42 = vrot.slane %v2747_v27, %v8125_v12 }
 0x165   : > { %v2764_v43 = vrot.slane %v2750_v36, %v8125_v12  ;;  %v2765_v44 = vcombine.high %v2757_v37, %v2757_v37  ;;  %v3496_v45 = vcombine.low %v2749_v34, %v2757_v37  ;;  %v3487_v46 = vrot.slane %v3473_v33, %v8125_v12 }
 0x166   : > { %v2289_v48 = vmax.f32 %v2190_v39, 0.0  ;;  %3843 = vrot.lane.b32.xlu1 %v3471_v40, %s8011_s9  ;;  %6855 = vst.msk [vmem:[%s8515_s13 + $0x8f] sm:$0xfe] %vm6826_vm11, %v3471_v40  ;;  %v2194_v49 = vpop.f32.mrb[54].mxu0 }
 0x167   : > { %6857 = vst.msk [vmem:[%s8515_s13 + $0x9f] sm:$0x1] %vm6829_vm10, %v3495_v42  ;;  %v3497_v50 = vcombine.low %v2765_v44, %v2764_v43  ;;  %v2766_v51 = vcombine.high %v2764_v43, %v2764_v43  ;;  %v2195_v52 = vadd.f32 %v8485_v47, %v2194_v49  ;;  %v7600_v53 = vpop.f32.mrb[55].mxu0  ;;  %v3488_v54 = vcombine.low %v3480_v41, %v3487_v46 }
 0x168   : > { %v2767_v55 = vcombine.high %v2289_v48, %v2289_v48  ;;  %v2774_v56 = vrot.slane %v2289_v48, %v8125_v12  ;;  %v3504_v58 = vrot.slane %v3496_v45, %v8125_v12 }
 0x169   : > { %v2290_v57 = vmax.f32 %v2195_v52, 0.0  ;;  %3845 = vrot.lane.b32.xlu0 %v3488_v54, %s8011_s9  ;;  %6856 = vst.msk [vmem:[%s8515_s13 + $0x97] sm:$0xff] %vm3999_vm3, %v3488_v54  ;;  %v3511_v59 = vrot.slane %v3497_v50, %v8125_v12 }
 0x16a   : > { %v2781_v60 = vrot.slane %v2767_v55, %v8125_v12  ;;  %v2782_v61 = vcombine.high %v2774_v56, %v2774_v56  ;;  %v3513_v62 = vcombine.low %v2766_v51, %v2774_v56  ;;  %3847 = vrot.lane.b32.xlu1 %v3495_v42, %s8011_s9  ;;  %v2199_v63 = vpop.f32.mrb[56].mxu0 }
 0x16b   : > { %v2784_v0 = vcombine.high %v2290_v57, %v2290_v57  ;;  %v2791_v2 = vrot.slane %v2290_v57, %v8125_v12  ;;  %v2200_v3 = vadd.f32 %v8485_v47, %v2199_v63  ;;  %v7603_v4 = vpop.f32.mrb[57].mxu0  ;;  %v3512_v5 = vcombine.low %v3504_v58, %v3511_v59 }
 0x16c   : > { %v3514_v6 = vcombine.low %v2782_v61, %v2781_v60  ;;  %v2783_v8 = vcombine.high %v2781_v60, %v2781_v60  ;;  %v3521_v14 = vrot.slane %v3513_v62, %v8125_v12 }
 0x16d   : > { %v2798_v9 = vrot.slane %v2784_v0, %v8125_v12  ;;  %v2799_v10 = vcombine.high %v2791_v2, %v2791_v2  ;;  %v2291_v11 = vmax.f32 %v2200_v3, 0.0  ;;  %3849 = vrot.lane.b32.xlu0 %v3512_v5, %s8011_s9  ;;  %6858 = vst.msk [vmem:[%s8515_s13 + $0x9f] sm:$0xfe] %vm6826_vm11, %v3512_v5  ;;  %v8771_v0 = vld [vmem:[%s10987_s2] ss:$0 sm:$0xff]  ;;  %v8778_v5 = vadd.s32 16, %v8118_v7 }
 0x16e   : > { %v2204_v13 = vpop.f32.mrb[58].mxu0  ;;  %v3528_v15 = vrot.slane %v3514_v6, %v8125_v12  ;;  %v3536_v16 = vrot.slane %v2783_v8, %v8125_v12 }
 0x16f   : > { %v2800_v17 = vcombine.high %v2798_v9, %v2798_v9  ;;  %v3537_v18 = vcombine.low %v2791_v2, %v2799_v10  ;;  %v2801_v19 = vcombine.high %v2291_v11, %v2291_v11  ;;  %v2808_v20 = vrot.slane %v2291_v11, %v8125_v12  ;;  %v7606_v21 = vpop.f32.mrb[59].mxu0 }
 0x170   : > { %v2205_v22 = vadd.f32 %v8485_v47, %v2204_v13  ;;  %v3529_v23 = vcombine.low %v3521_v14, %v3528_v15  ;;  %6860 = vst.msk [vmem:[%s8515_s13 + $0xaf] sm:$0x1] %vm6829_vm10, %v3536_v16  ;;  %vm412_vm12 = vcmp.eq.s32.totalorder %v8778_v5, 17 }
 0x171   : > { %v3538_v25 = vcombine.low %v2798_v9, %v2800_v17  ;;  %v2815_v26 = vrot.slane %v2801_v19, %v8125_v12  ;;  %v2816_v27 = vcombine.high %v2808_v20, %v2808_v20  ;;  %3853 = vrot.lane.b32.xlu0 %v3536_v16, %s8011_s9  ;;  %v3545_v30 = vrot.slane %v3537_v18, %v8125_v12 }
 0x172   : > { %v2292_v28 = vmax.f32 %v2205_v22, 0.0  ;;  %3851 = vrot.lane.b32.xlu1 %v3529_v23, %s8011_s9  ;;  %6859 = vst.msk [vmem:[%s8515_s13 + $0xa7] sm:$0xff] %vm3999_vm3, %v3529_v23  ;;  %v2209_v29 = vpop.f32.mrb[60].mxu0 }
 0x173   : > { %v2817_v24 = vcombine.high %v2815_v26, %v2815_v26  ;;  %v3554_v31 = vcombine.low %v2808_v20, %v2816_v27  ;;  %v2210_v32 = vadd.f32 %v8485_v47, %v2209_v29  ;;  %v7609_v33 = vpop.f32.mrb[61].mxu0  ;;  %v3552_v34 = vrot.slane %v3538_v25, %v8125_v12 }
 0x174   : > { %v2818_v36 = vcombine.high %v2292_v28, %v2292_v28  ;;  %v2825_v37 = vrot.slane %v2292_v28, %v8125_v12 }
 0x175   : > { %v3555_v38 = vcombine.low %v2815_v26, %v2817_v24  ;;  %v2293_v39 = vmax.f32 %v2210_v32, 0.0  ;;  %v3553_v40 = vcombine.low %v3545_v30, %v3552_v34  ;;  %v3562_v44 = vrot.slane %v3554_v31, %v8125_v12 }
 0x176   : > { %v2832_v41 = vrot.slane %v2818_v36, %v8125_v12  ;;  %v2833_v42 = vcombine.high %v2825_v37, %v2825_v37  ;;  %v2214_v43 = vpop.f32.mrb[62].mxu0  ;;  %v3577_v45 = vrot.slane %v2825_v37, %v8125_v12 }
 0x177   : > { %v2835_v46 = vcombine.high %v2293_v39, %v2293_v39  ;;  %v2842_v48 = vrot.slane %v2293_v39, %v8125_v12  ;;  %v2215_v49 = vadd.f32 %v8485_v47, %v2214_v43  ;;  %3855 = vrot.lane.b32.xlu1 %v3553_v40, %s8011_s9  ;;  %6861 = vst.msk [vmem:[%s8515_s13 + $0xaf] sm:$0xfe] %vm6826_vm11, %v3553_v40  ;;  %v7612_v50 = vpop.f32.mrb[63].mxu0 }
 0x178   : > { %v3569_v51 = vrot.slane %v3555_v38, %v8125_v12  ;;  %v3578_v52 = vcombine.low %v2833_v42, %v2832_v41  ;;  %v2834_v53 = vcombine.high %v2832_v41, %v2832_v41  ;;  %6863 = vst.msk [vmem:[%s8515_s13 + $0xbf] sm:$0x1] %vm6829_vm10, %v3577_v45 }
 0x179   : > { %v2849_v54 = vrot.slane %v2835_v46, %v8125_v12  ;;  %v2850_v55 = vcombine.high %v2842_v48, %v2842_v48  ;;  %v2294_v56 = vmax.f32 %v2215_v49, 0.0 }
 0x17a   : > { %v3570_v57 = vcombine.low %v3562_v44, %v3569_v51  ;;  %v3579_v58 = vcombine.low %v2834_v53, %v2842_v48  ;;  %v2219_v59 = vpop.f32.mrb[64].mxu0  ;;  %v3586_v3 = vrot.slane %v3578_v52, %v8125_v12 }
 0x17b   : > { %v3595_v47 = vcombine.low %v2850_v55, %v2849_v54  ;;  %v2851_v60 = vcombine.high %v2849_v54, %v2849_v54  ;;  %v2852_v61 = vcombine.high %v2294_v56, %v2294_v56  ;;  %v2859_v62 = vrot.slane %v2294_v56, %v8125_v12  ;;  %v7615_v63 = vpop.f32.mrb[65].mxu0  ;;  %3859 = vrot.lane.b32.xlu1 %v3577_v45, %s8011_s9 }
 0x17c   : > { %3857 = vrot.lane.b32.xlu0 %v3570_v57, %s8011_s9  ;;  %6862 = vst.msk [vmem:[%s8515_s13 + $0xb7] sm:$0xff] %vm3999_vm3, %v3570_v57  ;;  %v2220_v2 = vadd.f32 %v8771_v0, %v2219_v59  ;;  %v3593_v4 = vrot.slane %v3579_v58, %v8125_v12 }
 0x17d   : > { %v2866_v6 = vrot.slane %v2852_v61, %v8125_v12  ;;  %v2867_v8 = vcombine.high %v2859_v62, %v2859_v62  ;;  %v3596_v9 = vcombine.low %v2851_v60, %v2859_v62  ;;  %v3603_v13 = vrot.slane %v3595_v47, %v8125_v12 }
 0x17e   : > { %v2295_v10 = vmax.f32 %v2220_v2, 0.0  ;;  %v3594_v11 = vcombine.low %v3586_v3, %v3593_v4  ;;  %v2224_v14 = vpop.f32.mrb[66].mxu0 }
 0x17f   : > { %v2868_v15 = vcombine.high %v2866_v6, %v2866_v6  ;;  %v3610_v16 = vrot.slane %v3596_v9, %v8125_v12  ;;  %v3618_v17 = vrot.slane %v2867_v8, %v8125_v12  ;;  %v2225_v18 = vadd.f32 %v8771_v0, %v2224_v14  ;;  %v7618_v19 = vpop.f32.mrb[67].mxu0 }
 0x180   : > { %v2869_v20 = vcombine.high %v2295_v10, %v2295_v10  ;;  %v2876_v21 = vrot.slane %v2295_v10, %v8125_v12  ;;  %3861 = vrot.lane.b32.xlu0 %v3594_v11, %s8011_s9  ;;  %6864 = vst.msk [vmem:[%s8515_s13 + $0xbf] sm:$0xfe] %vm6826_vm11, %v3594_v11 }
 0x181   : > { %v3611_v22 = vcombine.low %v3603_v13, %v3610_v16  ;;  %6866 = vst.msk [vmem:[%s8515_s13 + $0xcf] sm:$0x1] %vm6829_vm10, %v3618_v17  ;;  %v2296_v23 = vmax.f32 %v2225_v18, 0.0  ;;  %v3619_v25 = vcombine.low %v2866_v6, %v2868_v15 }
 0x182   : > { %v2883_v26 = vrot.slane %v2869_v20, %v8125_v12  ;;  %v2884_v27 = vcombine.high %v2876_v21, %v2876_v21  ;;  %v2229_v28 = vpop.f32.mrb[68].mxu0 }
 0x183   : > { %3863 = vrot.lane.b32.xlu1 %v3611_v22, %s8011_s9  ;;  %6865 = vst.msk [vmem:[%s8515_s13 + $0xc7] sm:$0xff] %vm3999_vm3, %v3611_v22  ;;  %v2886_v29 = vcombine.high %v2296_v23, %v2296_v23  ;;  %v2893_v30 = vrot.slane %v2296_v23, %v8125_v12  ;;  %v2230_v24 = vadd.f32 %v8771_v0, %v2229_v28  ;;  %v7621_v31 = vpop.f32.mrb[69].mxu0 }
 0x184   : > { %v2885_v32 = vcombine.high %v2883_v26, %v2883_v26  ;;  %v3620_v33 = vcombine.low %v2876_v21, %v2884_v27  ;;  %v3884_v34 = vpop.permute.xlu1 %3883  ;;  %3865 = vrot.lane.b32.xlu0 %v3618_v17, %s8011_s9  ;;  %v3627_v43 = vrot.slane %v3619_v25, %v8125_v12 }
 0x185   : > { %v3790_v36 = vpop.permute.xlu0 %3789  ;;  %v8802_v37 = vsel %vm412_vm12, 0.0, %v3884_v34  ;;  %v2900_v38 = vrot.slane %v2886_v29, %v8125_v12  ;;  %v2901_v39 = vcombine.high %v2893_v30, %v2893_v30  ;;  %v2297_v42 = vmax.f32 %v2230_v24, 0.0 }
 0x186   : > { %v8807_v40 = vsel %vm10996_vm13, 0.0, %v3790_v36  ;;  %v3636_v41 = vcombine.low %v2883_v26, %v2885_v32  ;;  %v3634_v44 = vrot.slane %v3620_v33, %v8125_v12  ;;  %v2234_v45 = vpop.f32.mrb[70].mxu0 }
 0x187   : > { %4002 = vst.msk [vmem:[#allocation3 + $0x10] sm:$0xff] %vm3999_vm3, %v8807_v40  ;;  %v3637_v46 = vcombine.low %v2893_v30, %v2901_v39  ;;  %4696 = vrot.lane.b32.xlu1 %v8802_v37, %s8012_s16  ;;  %v2902_v48 = vcombine.high %v2900_v38, %v2900_v38  ;;  %v8816_v49 = vrot.slane %v2900_v38, %v8125_v12  ;;  %v7624_v51 = vpop.f32.mrb[71].mxu0 }
 0x188   : > { %v2235_v50 = vadd.f32 %v8771_v0, %v2234_v45  ;;  %4086 = vrot.lane.b32.xlu0 %v8807_v40, %s8009_s20  ;;  %v2903_v53 = vcombine.high %v2297_v42, %v2297_v42  ;;  %v2910_v54 = vrot.slane %v2297_v42, %v8125_v12  ;;  %v3635_v55 = vcombine.low %v3627_v43, %v3634_v44  ;;  %v3794_v62 = vpop.permute.xlu1 %3793 }
 0x189   : > { %v8821_v52 = vpop.permute.xlu0 %3881  ;;  %v3644_v56 = vrot.slane %v3636_v41, %v8125_v12  ;;  %6869 = vst.msk [vmem:[%s8515_s13 + $0xdf] sm:$0x1] %vm6829_vm10, %v8816_v49  ;;  %v3651_v58 = vrot.slane %v3637_v46, %v8125_v12  ;;  %v3950_v42 = vsel %vm412_vm12, 0.0, %v3794_v62  ;;  %v5546_v62 = vld [vmem:[%s10988_s3] sm:$0xff] }
 0x18a   : > { %v2298_v57 = vmax.f32 %v2235_v50, 0.0  ;;  %v2917_v59 = vrot.slane %v2903_v53, %v8125_v12  ;;  %v2918_v47 = vcombine.high %v2910_v54, %v2910_v54  ;;  %v3660_v60 = vcombine.low %v2902_v48, %v2910_v54  ;;  %6867 = vst.msk [vmem:[%s8515_s13 + $0xcf] sm:$0xfe] %vm6826_vm11, %v3635_v55  ;;  %v2239_v61 = vpop.f32.mrb[72].mxu0 }
 0x18b   : > { %4281 = vrot.lane.b32.xlu1 %v8807_v40, %s8010_s21  ;;  %v8835_v3 = vcombine.low %v3644_v56, %v3651_v58  ;;  %v2240_v4 = vadd.f32 %v8771_v0, %v2239_v61  ;;  %v7627_v6 = vpop.f32.mrb[73].mxu0 }
 0x18c   : > { %v2920_v63 = vcombine.high %v2298_v57, %v2298_v57  ;;  %v2927_v2 = vrot.slane %v2298_v57, %v8125_v12  ;;  %4472 = vrot.lane.b32.xlu0 %v8807_v40, %s8013_s17  ;;  %v3661_v9 = vcombine.low %v2918_v47, %v2917_v59  ;;  %v2919_v10 = vcombine.high %v2917_v59, %v2917_v59 }
 0x18d   : > { %v8840_v8 = vpop.permute.xlu0 %3791  ;;  %v3668_v11 = vrot.slane %v3660_v60, %v8125_v12  ;;  %6868 = vst.msk [vmem:[%s8515_s13 + $0xd7] sm:$0xff] %vm3999_vm3, %v8835_v3  ;;  %v2299_v0 = vmax.f32 %v2240_v4, 0.0 }
 0x18e   : > { %4003 = vst.msk [vmem:[#allocation3 + $0x18] sm:$0xff] %vm3999_vm3, %v8840_v8  ;;  %v2934_v13 = vrot.slane %v2920_v63, %v8125_v12  ;;  %v2935_v14 = vcombine.high %v2927_v2, %v2927_v2  ;;  %v3677_v15 = vcombine.low %v2919_v10, %v2927_v2  ;;  %v3675_v16 = vrot.slane %v3661_v9, %v8125_v12  ;;  %v5547_v63 = vld [vmem:[%s10988_s3 + $0x8] sm:$0xff] }
 0x18f   : > { %v3796_v17 = vpop.permute.xlu1 %3795  ;;  %4534 = vrot.lane.b32.xlu1 %v8821_v52, %s8013_s17  ;;  %v2937_v20 = vcombine.high %v2299_v0, %v2299_v0  ;;  %v2944_v21 = vrot.slane %v2299_v0, %v8125_v12  ;;  %v7756_v4 = vpack.c.bf16 %v5547_v63, %v5546_v62 }
 0x190   : > { %v3678_v18 = vcombine.low %v2935_v14, %v2934_v13  ;;  %v2936_v19 = vcombine.high %v2934_v13, %v2934_v13  ;;  %v8855_v22 = vsel %vm10996_vm13, 0.0, %v3796_v17  ;;  %4602 = vrot.lane.b32.xlu0 %v8807_v40, %s8012_s16  ;;  %v3676_v23 = vcombine.low %v3668_v11, %v3675_v16  ;;  %v5548_v11 = vld [vmem:[%s10988_s3 + $0x10] sm:$0xff]  ;;  %v5549_v13 = vld [vmem:[%s10988_s3 + $0x18] sm:$0xff] }
 0x191   : > { %v3685_v25 = vrot.slane %v3677_v15, %v8125_v12  ;;  %4004 = vst.msk [vmem:[#allocation3 + $0x20] sm:$0xff] %vm3999_vm3, %v8855_v22  ;;  %v2951_v27 = vrot.slane %v2937_v20, %v8125_v12  ;;  %v2952_v28 = vcombine.high %v2944_v21, %v2944_v21  ;;  %7757 = vmatprep.subr.bf16.mxu1 %v7756_v4  ;;  %v5550_v20 = vld [vmem:[%s10988_s3 + $0x20] sm:$0xff] }
 0x192   : > { %v8863_v26 = vrot.slane %v2936_v19, %v8125_v12  ;;  %v3692_v29 = vrot.slane %v3678_v18, %v8125_v12  ;;  %6870 = vst.msk [vmem:[%s8515_s13 + $0xdf] sm:$0xfe] %vm6826_vm11, %v3676_v23  ;;  %7759 = vmatpush3.bf16.msra.mxu1 %v7756_v4  ;;  %v7760_v0 = vpack.c.bf16 %v5549_v13, %v5548_v11 }
 0x193   : > { %3867 = vrot.lane.b32.xlu1 %v3635_v55, %s8011_s9  ;;  %v2953_v24 = vcombine.high %v2951_v27, %v2951_v27  ;;  %v3701_v31 = vcombine.low %v2944_v21, %v2952_v28  ;;  %v3800_v38 = vpop.permute.xlu1 %3799  ;;  %v1186_v15 = vcombine.high %v8161_v35, %v8161_v35  ;;  %v5551_v35 = vld [vmem:[%s10988_s3 + $0x28] sm:$0xff] }
 0x194   : > { %v8869_v30 = vpop.permute.xlu0 %3797  ;;  %6872 = vst.msk [vmem:[%s8515_s13 + $0xef] sm:$0x1] %vm6829_vm10, %v8863_v26  ;;  %v8875_v32 = vcombine.low %v3685_v25, %v3692_v29  ;;  %4797 = vrot.lane.b32.xlu0 %v8807_v40, %s8014_s18  ;;  %v3953_v54 = vsel %vm412_vm12, 0.0, %v3800_v38  ;;  %7761 = vmatprep.subr.bf16.mxu1 %v7760_v0  ;;  %vm11001_vm10 = vcmask 319744  }
 0x195   : > { %4005 = vst.msk [vmem:[#allocation3 + $0x28] sm:$0xff] %vm3999_vm3, %v8869_v30  ;;  %v3702_v33 = vcombine.low %v2951_v27, %v2953_v24  ;;  %v3709_v34 = vrot.slane %v3701_v31, %v8125_v12  ;;  %v5552_v24 = vld [vmem:[%s10988_s3 + $0x30] sm:$0xff]  ;;  %v5553_v31 = vld [vmem:[%s10988_s3 + $0x38] sm:$0xff] }
 0x196   : > { %6871 = vst.msk [vmem:[%s8515_s13 + $0xe7] sm:$0xff] %vm3999_vm3, %v8875_v32  ;;  %7763 = vmatpush3.bf16.msra.mxu1 %v7760_v0 }
 0x197   : > { %3871 = vrot.lane.b32.xlu1 %v8816_v49, %s8011_s9  ;;  %v3716_v36 = vrot.slane %v3702_v33, %v8125_v12  ;;  %v7397_v33 = vld.sshfl [vmem:[#allocation2 + $0x1a8] sm:$0x3 pattern:$0x76325410] }
 0x198   : > { %v3802_v39 = vpop.permute.xlu0 %3801  ;;  %4694 = vrot.lane.b32.xlu0 %v8821_v52, %s8012_s16 }
 0x199   : > { %v8892_v41 = vsel %vm10996_vm13, 0.0, %v3802_v39  ;;  %v8894_v40 = vcombine.low %v3709_v34, %v3716_v36  ;;  %v7768_v36 = vpack.c.bf16 %v5553_v31, %v5552_v24 }
 0x19a   : > { %4006 = vst.msk [vmem:[#allocation3 + $0x30] sm:$0xff] %vm3999_vm3, %v8892_v41 }
 0x19b   : > { %4285 = vrot.lane.b32.xlu1 %v3950_v42, %s8010_s21  ;;  %6873 = vst.msk [vmem:[%s8515_s13 + $0xef] sm:$0xfe] %vm6826_vm11, %v8894_v40  ;;  %vm11000_vm11 = vcmask 326912  }
 0x19c   : > { %v8904_v43 = vpop.permute.xlu1 %3803  ;;  %4090 = vrot.lane.b32.xlu0 %v3950_v42, %s8009_s20  ;;  %v8912_v44 = vpop.permute.xlu0 %3805 }
 0x19d   : > { %4007 = vst.msk [vmem:[#allocation3 + $0x38] sm:$0xff] %vm3999_vm3, %v8904_v43 }
 0x19f   : > { %4088 = vrot.lane.b32.xlu1 %v8840_v8, %s8009_s20 }
 0x1a0   : > { %4606 = vrot.lane.b32.xlu0 %v3950_v42, %s8012_s16 }
 0x1a1   : > { %v3808_v45 = vpop.permute.xlu1 %3807 }
 0x1a2   : > { %v8916_v46 = vsel %vm10996_vm13, 0.0, %v3808_v45 }
 0x1a3   : > { %4008 = vst.msk [vmem:[#allocation3 + $0x40] sm:$0xff] %vm3999_vm3, %v8916_v46  ;;  %4474 = vrot.lane.b32.xlu1 %v8840_v8, %s8013_s17 }
 0x1a4   : > { %4801 = vrot.lane.b32.xlu0 %v3950_v42, %s8014_s18  ;;  %v5554_v42 = vld [vmem:[%s10988_s3 + $0x40] sm:$0xff] }
 0x1a5   : > { %v8931_v49 = vpop.permute.xlu1 %3811 }
 0x1a6   : > { %v8923_v48 = vpop.permute.xlu0 %3809 }
 0x1a7   : > { %4009 = vst.msk [vmem:[#allocation3 + $0x48] sm:$0xff] %vm3999_vm3, %v8923_v48  ;;  %4604 = vrot.lane.b32.xlu1 %v8840_v8, %s8012_s16 }
 0x1a8   : > { %4283 = vrot.lane.b32.xlu0 %v8840_v8, %s8010_s21 }
 0x1aa   : > { %v3814_v50 = vpop.permute.xlu0 %3813 }
 0x1ab   : > { %v8935_v51 = vsel %vm10996_vm13, 0.0, %v3814_v50  ;;  %4799 = vrot.lane.b32.xlu1 %v8840_v8, %s8014_s18  ;;  %v395_v8 = vld [vmem:[#allocation2 + $0x1a0] sm:$0xff] }
 0x1ac   : > { %4010 = vst.msk [vmem:[#allocation3 + $0x50] sm:$0xff] %vm3999_vm3, %v8935_v51  ;;  %3869 = vrot.lane.b32.xlu0 %v8835_v3, %s8011_s9  ;;  %v1187_v9 = vcombine.high %v395_v8, %v395_v8  ;;  %v1194_v10 = vrot.slane %v395_v8, %v8125_v12 }
 0x1ad   : > { %v8943_v53 = vpop.permute.xlu1 %3815 }
 0x1ae   : > { %4011 = vst.msk [vmem:[#allocation3 + $0x58] sm:$0xff] %vm3999_vm3, %v8943_v53  ;;  %v8952_v55 = vpop.permute.xlu0 %3817  ;;  %v1201_v16 = vrot.slane %v1187_v9, %v8125_v12  ;;  %v1202_v17 = vcombine.high %v1194_v10, %v1194_v10  ;;  %v1882_v18 = vcombine.low %v1186_v15, %v1194_v10  ;;  %v3956_v9 = vsel %vm412_vm12, 0.0, %v8912_v44 }
 0x1af   : > { %4092 = vrot.lane.b32.xlu1 %v8855_v22, %s8009_s20 }
 0x1b0   : > { %3873 = vrot.lane.b32.xlu0 %v3676_v23, %s8011_s9  ;;  %v1883_v19 = vcombine.low %v1202_v17, %v1201_v16  ;;  %v1890_v23 = vrot.slane %v1882_v18, %v8125_v12  ;;  %v1203_v29 = vcombine.high %v1201_v16, %v1201_v16 }
 0x1b2   : > { %v1897_v25 = vrot.slane %v1883_v19, %v8125_v12  ;;  %v1899_v38 = vcombine.low %v1203_v29, %v7397_v33 }
 0x1b3   : > { %4096 = vrot.lane.b32.xlu1 %v3953_v54, %s8009_s20 }
 0x1b4   : > { %v3820_v56 = vpop.permute.xlu1 %3819  ;;  %4287 = vrot.lane.b32.xlu0 %v8855_v22, %s8010_s21  ;;  %v1898_v28 = vcombine.low %v1890_v23, %v1897_v25  ;;  %v1906_v39 = vrot.slane %v1899_v38, %v8125_v12 }
 0x1b5   : > { %v8959_v57 = vsel %vm10996_vm13, 0.0, %v3820_v56 }
 0x1b6   : > { %4012 = vst.msk [vmem:[#allocation3 + $0x60] sm:$0xff] %vm3999_vm3, %v8959_v57  ;;  %7635 = vmatmul.mubr.msk.f32.gmra.mrb[4].mxu1 %vm10994_vm2, %v1898_v28  ;;  %v9198_v28 = vsel %vm412_vm12, 0.0, %v8931_v49 }
 0x1b7   : > { %v8963_v58 = vpop.permute.xlu0 %3821  ;;  %4608 = vrot.lane.b32.xlu1 %v8855_v22, %s8012_s16  ;;  %7637 = vmatprep.mubr.msk.f32.mxu1 %vm8007_vm1, %v8006_v1  ;;  %vm10998_vm1 = vcmask 392514  }
 0x1b8   : > { %4013 = vst.msk [vmem:[#allocation3 + $0x68] sm:$0xff] %vm3999_vm3, %v8963_v58  ;;  %4291 = vrot.lane.b32.xlu0 %v3953_v54, %s8010_s21  ;;  %v8971_v47 = vpop.permute.xlu1 %3823 }
 0x1ba   : > { %7638 = vmatmul.mubr.msk.f32.gmra.mrb[6].mxu1 %vm10994_vm2, %v1906_v39  ;;  %vm4945_vm2 = vcmask 386368  }
 0x1bb   : > { %v3826_v59 = vpop.permute.xlu0 %3825  ;;  %4612 = vrot.lane.b32.xlu1 %v3953_v54, %s8012_s16 }
 0x1bc   : > { %v8975_v60 = vsel %vm10996_vm13, 0.0, %v3826_v59  ;;  %4476 = vrot.lane.b32.xlu0 %v8855_v22, %s8013_s17 }
 0x1bd   : > { %4014 = vst.msk [vmem:[#allocation3 + $0x70] sm:$0xff] %vm3999_vm3, %v8975_v60 }
 0x1bf   : > { %4803 = vrot.lane.b32.xlu1 %v8855_v22, %s8014_s18  ;;  %v8998_v2 = vpop.permute.xlu0 %3829 }
 0x1c0   : > { %v8983_v61 = vpop.permute.xlu1 %3827  ;;  %4994 = vrot.lane.b32.xlu0 %v8855_v22, %s8015_s19 }
 0x1c1   : > { %4015 = vst.msk [vmem:[#allocation3 + $0x78] sm:$0xff] %vm3999_vm3, %v8983_v61 }
 0x1c3   : > { %4807 = vrot.lane.b32.xlu1 %v3953_v54, %s8014_s18 }
 0x1c4   : > { %5124 = vrot.lane.b32.xlu0 %v8855_v22, %s8016_s22 }
 0x1c5   : > { %v3832_v3 = vpop.permute.xlu1 %3831 }
 0x1c6   : > { %v9002_v6 = vsel %vm10996_vm13, 0.0, %v3832_v3 }
 0x1c7   : > { %4016 = vst.msk [vmem:[#allocation3 + $0x80] sm:$0xff] %vm3999_vm3, %v9002_v6  ;;  %5319 = vrot.lane.b32.xlu1 %v8855_v22, %s8017_s29  ;;  %v7764_v22 = vpack.c.bf16 %v5551_v35, %v5550_v20 }
 0x1c8   : > { %5128 = vrot.lane.b32.xlu0 %v3953_v54, %s8016_s22 }
 0x1c9   : > { %v9032_v21 = vpop.permute.xlu1 %3835  ;;  %7765 = vmatprep.subr.bf16.mxu1 %v7764_v22 }
 0x1ca   : > { %v9016_v14 = vpop.permute.xlu0 %3833  ;;  %7767 = vmatpush3.bf16.msra.mxu1 %v7764_v22 }
 0x1cb   : > { %4017 = vst.msk [vmem:[#allocation3 + $0x88] sm:$0xff] %vm3999_vm3, %v9016_v14  ;;  %5323 = vrot.lane.b32.xlu1 %v3953_v54, %s8017_s29  ;;  %7769 = vmatprep.subr.bf16.mxu1 %v7768_v36 }
 0x1cc   : > { %3877 = vrot.lane.b32.xlu0 %v8863_v26, %s8011_s9 }
 0x1ce   : > { %v3838_v27 = vpop.permute.xlu0 %3837  ;;  %7771 = vmatpush3.bf16.msra.mxu1 %v7768_v36 }
 0x1cf   : > { %v9038_v26 = vsel %vm10996_vm13, 0.0, %v3838_v27  ;;  %4289 = vrot.lane.b32.xlu1 %v8869_v30, %s8010_s21  ;;  %7656 = vmatprep.subr.mxu1 %v5554_v42 }
 0x1d0   : > { %4018 = vst.msk [vmem:[#allocation3 + $0x90] sm:$0xff] %vm3999_vm3, %v9038_v26  ;;  %4094 = vrot.lane.b32.xlu0 %v8869_v30, %s8009_s20 }
 0x1d1   : > { %v9052_v34 = vpop.permute.xlu1 %3839 }
 0x1d2   : > { %4019 = vst.msk [vmem:[#allocation3 + $0x98] sm:$0xff] %vm3999_vm3, %v9052_v34  ;;  %v9068_v45 = vpop.permute.xlu0 %3841  ;;  %7657 = vmatpush3.msra.mxu1 %v5554_v42 }
 0x1d3   : > { %4478 = vrot.lane.b32.xlu1 %v8869_v30, %s8013_s17 }
 0x1d4   : > { %4610 = vrot.lane.b32.xlu0 %v8869_v30, %s8012_s16 }
 0x1d7   : > { %4996 = vrot.lane.b32.xlu1 %v8869_v30, %s8015_s19 }
 0x1d8   : > { %v3844_v50 = vpop.permute.xlu1 %3843  ;;  %4805 = vrot.lane.b32.xlu0 %v8869_v30, %s8014_s18 }
 0x1d9   : > { %v9076_v12 = vsel %vm10996_vm13, 0.0, %v3844_v50 }
 0x1da   : > { %4020 = vst.msk [vmem:[#allocation3 + $0xa0] sm:$0xff] %vm3999_vm3, %v9076_v12 }
 0x1db   : > { %v9080_v54 = vpop.permute.xlu0 %3845  ;;  %5126 = vrot.lane.b32.xlu1 %v8869_v30, %s8016_s22 }
 0x1dc   : > { %4021 = vst.msk [vmem:[#allocation3 + $0xa8] sm:$0xff] %vm3999_vm3, %v9080_v54  ;;  %5321 = vrot.lane.b32.xlu0 %v8869_v30, %s8017_s29  ;;  %v9090_v59 = vpop.permute.xlu1 %3847 }
 0x1df   : > { %v3850_v56 = vpop.permute.xlu0 %3849  ;;  %3875 = vrot.lane.b32.xlu1 %v8875_v32, %s8011_s9 }
 0x1e0   : > { %v9094_v62 = vsel %vm10996_vm13, 0.0, %v3850_v56  ;;  %4098 = vrot.lane.b32.xlu0 %v8892_v41, %s8009_s20 }
 0x1e1   : > { %4022 = vst.msk [vmem:[#allocation3 + $0xb0] sm:$0xff] %vm3999_vm3, %v9094_v62 }
 0x1e3   : > { %4293 = vrot.lane.b32.xlu1 %v8892_v41, %s8010_s21  ;;  %v9112_v32 = vpop.permute.xlu0 %3853 }
 0x1e4   : > { %v9102_v30 = vpop.permute.xlu1 %3851  ;;  %4480 = vrot.lane.b32.xlu0 %v8892_v41, %s8013_s17 }
 0x1e5   : > { %4023 = vst.msk [vmem:[#allocation3 + $0xb8] sm:$0xff] %vm3999_vm3, %v9102_v30 }
 0x1e7   : > { %5325 = vrot.lane.b32.xlu1 %v8892_v41, %s8017_s29 }
 0x1e8   : > { %4614 = vrot.lane.b32.xlu0 %v8892_v41, %s8012_s16 }
 0x1e9   : > { %v3856_v63 = vpop.permute.xlu1 %3855 }
 0x1ea   : > { %v9116_v3 = vsel %vm10996_vm13, 0.0, %v3856_v63 }
 0x1eb   : > { %4024 = vst.msk [vmem:[#allocation3 + $0xc0] sm:$0xff] %vm3999_vm3, %v9116_v3  ;;  %4809 = vrot.lane.b32.xlu1 %v8892_v41, %s8014_s18 }
 0x1ec   : > { %4998 = vrot.lane.b32.xlu0 %v8892_v41, %s8015_s19 }
 0x1ed   : > { %v9132_v8 = vpop.permute.xlu1 %3859 }
 0x1ee   : > { %v9124_v4 = vpop.permute.xlu0 %3857 }
 0x1ef   : > { %4025 = vst.msk [vmem:[#allocation3 + $0xc8] sm:$0xff] %vm3999_vm3, %v9124_v4  ;;  %3879 = vrot.lane.b32.xlu1 %v8894_v40, %s8011_s9 }
 0x1f0   : > { %5130 = vrot.lane.b32.xlu0 %v8892_v41, %s8016_s22 }
 0x1f2   : > { %v3862_v10 = vpop.permute.xlu0 %3861 }
 0x1f3   : > { %v9139_v11 = vsel %vm10996_vm13, 0.0, %v3862_v10  ;;  %4297 = vrot.lane.b32.xlu1 %v3956_v9, %s8010_s21 }
 0x1f4   : > { %4026 = vst.msk [vmem:[#allocation3 + $0xd0] sm:$0xff] %vm3999_vm3, %v9139_v11  ;;  %4102 = vrot.lane.b32.xlu0 %v3956_v9, %s8009_s20 }
 0x1f5   : > { %v9145_v40 = vpop.permute.xlu1 %3863 }
 0x1f6   : > { %4027 = vst.msk [vmem:[#allocation3 + $0xd8] sm:$0xff] %vm3999_vm3, %v9145_v40  ;;  %v9149_v41 = vpop.permute.xlu0 %3865 }
 0x1f7   : > { %4813 = vrot.lane.b32.xlu1 %v3956_v9, %s8014_s18 }
 0x1f8   : > { %4618 = vrot.lane.b32.xlu0 %v3956_v9, %s8012_s16 }
 0x1f9   : > { %v9153_v44 = vpop.permute.xlu1 %4696 }
 0x1fa   : > { %v4087_v13 = vpop.permute.xlu0 %4086 }
 0x1fb   : > { %4230 = vst.msk [vmem:[#allocation3 + $0xf] sm:$0xfe] %vm4224_vm5, %v4087_v13  ;;  %4100 = vrot.lane.b32.xlu1 %v8904_v43, %s8009_s20 }
 0x1fc   : > { %5134 = vrot.lane.b32.xlu0 %v3956_v9, %s8016_s22 }
 0x1fd   : > { %v4282_v0 = vpop.permute.xlu1 %4281 }
 0x1fe   : > { %4425 = vst.msk [vmem:[#allocation3 + $0xe] sm:$0xfc] %vm4419_vm7, %v4282_v0  ;;  %v4473_v15 = vpop.permute.xlu0 %4472 }
 0x1ff   : > { %4569 = vst.msk [vmem:[#allocation3] sm:$0xff] %vm4568_vm14, %v4473_v15  ;;  %4482 = vrot.lane.b32.xlu1 %v8904_v43, %s8013_s17 }
 0x200   : > { %5329 = vrot.lane.b32.xlu0 %v3956_v9, %s8017_s29 }
 0x201   : > { %v9164_v16 = vpop.permute.xlu1 %4534 }
 0x202   : > { %v4603_v17 = vpop.permute.xlu0 %4602 }
 0x203   : > { %4747 = vst.msk [vmem:[#allocation3 - $0x1] sm:$0xfe] %vm4746_vm15, %v4603_v17  ;;  %4616 = vrot.lane.b32.xlu1 %v8904_v43, %s8012_s16 }
 0x204   : > { %4295 = vrot.lane.b32.xlu0 %v8904_v43, %s8010_s21 }
 0x205   : > { %v3868_v18 = vpop.permute.xlu1 %3867 }
 0x206   : > { %v4798_v19 = vpop.permute.xlu0 %4797  ;;  %v9173_v20 = vsel %vm10996_vm13, 0.0, %v3868_v18  ;;  %v9264_v18 = vsel %vm412_vm12, 0.0, %v8952_v55 }
 0x207   : > { %4942 = vst.msk [vmem:[#allocation3 - $0x2] sm:$0xfc] %vm10998_vm1, %v4798_v19  ;;  %5000 = vrot.lane.b32.xlu1 %v8904_v43, %s8015_s19 }
 0x208   : > { %4028 = vst.msk [vmem:[#allocation3 + $0xe0] sm:$0xff] %vm3999_vm3, %v9173_v20  ;;  %5327 = vrot.lane.b32.xlu0 %v8904_v43, %s8017_s29 }
 0x209   : > { %v9182_v35 = vpop.permute.xlu1 %3871 }
 0x20a   : > { %v9184_v22 = vpop.permute.xlu0 %4694 }
 0x20b   : > { %5132 = vrot.lane.b32.xlu1 %v8904_v43, %s8016_s22 }
 0x20c   : > { %4811 = vrot.lane.b32.xlu0 %v8904_v43, %s8014_s18 }
 0x20d   : > { %v4286_v23 = vpop.permute.xlu1 %4285 }
 0x20e   : > { %v4091_v25 = vpop.permute.xlu0 %4090 }
 0x20f   : > { %4232 = vst.msk [vmem:[#allocation3 + $0x1f] sm:$0x1] %vm10997_vm4, %v4091_v25  ;;  %4104 = vrot.lane.b32.xlu1 %v8916_v46, %s8009_s20 }
 0x210   : > { %4299 = vrot.lane.b32.xlu0 %v8916_v46, %s8010_s21 }
 0x211   : > { %v4089_v27 = vpop.permute.xlu1 %4088 }
 0x212   : > { %v4607_v29 = vpop.permute.xlu0 %4606  ;;  %4231 = vst.msk [vmem:[#allocation3 + $0x17] sm:$0xff] %vm4226_vm6, %v4089_v27 }
 0x213   : > { %4427 = vst.msk [vmem:[#allocation3 + $0x1e] sm:$0x3] %vm11002_vm9, %v4286_v23  ;;  %4108 = vrot.lane.b32.xlu1 %v9198_v28, %s8009_s20 }
 0x214   : > { %4303 = vrot.lane.b32.xlu0 %v9198_v28, %s8010_s21 }
 0x215   : > { %v4475_v43 = vpop.permute.xlu1 %4474 }
 0x216   : > { %v4802_v24 = vpop.permute.xlu0 %4801  ;;  %4570 = vst.msk [vmem:[#allocation3 + $0x8] sm:$0xff] %vm4568_vm14, %v4475_v43 }
 0x217   : > { %4751 = vst.msk [vmem:[#allocation3 + $0xf] sm:$0x1] %vm11001_vm10, %v4607_v29  ;;  %4620 = vrot.lane.b32.xlu1 %v8916_v46, %s8012_s16 }
 0x218   : > { %4484 = vrot.lane.b32.xlu0 %v8916_v46, %s8013_s17 }
 0x219   : > { %v4605_v49 = vpop.permute.xlu1 %4604 }
 0x21a   : > { %v4284_v31 = vpop.permute.xlu0 %4283  ;;  %4749 = vst.msk [vmem:[#allocation3 + $0x7] sm:$0xff] %vm11000_vm11, %v4605_v49 }
 0x21b   : > { %4426 = vst.msk [vmem:[#allocation3 + $0x16] sm:$0xff] %vm10999_vm8, %v4284_v31  ;;  %4624 = vrot.lane.b32.xlu1 %v9198_v28, %s8012_s16  ;;  %v9293_v31 = vsel %vm412_vm12, 0.0, %v8971_v47 }
 0x21c   : > { %4946 = vst.msk [vmem:[#allocation3 + $0xe] sm:$0x3] %vm4945_vm2, %v4802_v24  ;;  %4106 = vrot.lane.b32.xlu0 %v8923_v48, %s8009_s20 }
 0x21d   : > { %v4800_v33 = vpop.permute.xlu1 %4799 }
 0x21e   : > { %v9219_v36 = vpop.permute.xlu0 %3869  ;;  %4944 = vst.msk [vmem:[#allocation3 + $0x6] sm:$0xff] %vm4943_vm0, %v4800_v33 }
 0x21f   : > { %4029 = vst.msk [vmem:[#allocation3 + $0xe8] sm:$0xff] %vm3999_vm3, %v9219_v36  ;;  %5002 = vrot.lane.b32.xlu1 %v8916_v46, %s8015_s19 }
 0x220   : > { %4622 = vrot.lane.b32.xlu0 %v8923_v48, %s8012_s16 }
 0x221   : > { %v4093_v38 = vpop.permute.xlu1 %4092 }
 0x222   : > { %4233 = vst.msk [vmem:[#allocation3 + $0x1f] sm:$0xfe] %vm4224_vm5, %v4093_v38  ;;  %v3874_v39 = vpop.permute.xlu0 %3873 }
 0x223   : > { %v9231_v42 = vsel %vm10996_vm13, 0.0, %v3874_v39  ;;  %5136 = vrot.lane.b32.xlu1 %v8916_v46, %s8016_s22  ;;  %vm5090_vm13 = vcmask 458112  }
 0x224   : > { %4030 = vst.msk [vmem:[#allocation3 + $0xf0] sm:$0xff] %vm3999_vm3, %v9231_v42  ;;  %5004 = vrot.lane.b32.xlu0 %v8923_v48, %s8015_s19 }
 0x225   : > { %v4097_v50 = vpop.permute.xlu1 %4096 }
 0x226   : > { %4235 = vst.msk [vmem:[#allocation3 + $0x2f] sm:$0x1] %vm10997_vm4, %v4097_v50  ;;  %v4288_v56 = vpop.permute.xlu0 %4287  ;;  %vm11005_vm4 = vcmask 523713  }
 0x227   : > { %4428 = vst.msk [vmem:[#allocation3 + $0x1e] sm:$0xfc] %vm4419_vm7, %v4288_v56  ;;  %5140 = vrot.lane.b32.xlu1 %v9198_v28, %s8016_s22 }
 0x228   : > { %5138 = vrot.lane.b32.xlu0 %v8923_v48, %s8016_s22 }
 0x229   : > { %v4609_v63 = vpop.permute.xlu1 %4608 }
 0x22a   : > { %v4292_v9 = vpop.permute.xlu0 %4291 }
 0x22b   : > { %4301 = vrot.lane.b32.xlu1 %v8923_v48, %s8010_s21 }
 0x22c   : > { %4110 = vrot.lane.b32.xlu0 %v8935_v51, %s8009_s20 }
 0x22d   : > { %v4613_v10 = vpop.permute.xlu1 %4612 }
 0x22e   : > { %v4477_v13 = vpop.permute.xlu0 %4476 }
 0x22f   : > { %4571 = vst.msk [vmem:[#allocation3 + $0x10] sm:$0xff] %vm4568_vm14, %v4477_v13  ;;  %4486 = vrot.lane.b32.xlu1 %v8923_v48, %s8013_s17 }
 0x230   : > { %4752 = vst.msk [vmem:[#allocation3 + $0xf] sm:$0xfe] %vm4746_vm15, %v4609_v63  ;;  %4488 = vrot.lane.b32.xlu0 %v8935_v51, %s8013_s17 }
 0x231   : > { %v4804_v0 = vpop.permute.xlu1 %4803 }
 0x232   : > { %4947 = vst.msk [vmem:[#allocation3 + $0xe] sm:$0xfc] %vm10998_vm1, %v4804_v0  ;;  %v4995_v15 = vpop.permute.xlu0 %4994  ;;  %vm11004_vm1 = vcmask 589314  }
 0x233   : > { %5091 = vst.msk [vmem:[#allocation3] sm:$0xff] %vm5090_vm13, %v4995_v15  ;;  %4305 = vrot.lane.b32.xlu1 %v8935_v51, %s8010_s21 }
 0x234   : > { %4626 = vrot.lane.b32.xlu0 %v8935_v51, %s8012_s16 }
 0x235   : > { %v4808_v17 = vpop.permute.xlu1 %4807 }
 0x236   : > { %v5125_v19 = vpop.permute.xlu0 %5124 }
 0x237   : > { %5269 = vst.msk [vmem:[#allocation3 - $0x1] sm:$0xfe] %vm11005_vm4, %v5125_v19  ;;  %4309 = vrot.lane.b32.xlu1 %v9264_v18, %s8010_s21 }
 0x238   : > { %4114 = vrot.lane.b32.xlu0 %v9264_v18, %s8009_s20 }
 0x239   : > { %v5320_v23 = vpop.permute.xlu1 %5319 }
 0x23a   : > { %5464 = vst.msk [vmem:[#allocation3 - $0x2] sm:$0xfc] %vm11004_vm1, %v5320_v23  ;;  %v5129_v25 = vpop.permute.xlu0 %5128 }
 0x23b   : > { %4112 = vrot.lane.b32.xlu1 %v8943_v53, %s8009_s20 }
 0x23c   : > { %4630 = vrot.lane.b32.xlu0 %v9264_v18, %s8012_s16 }
 0x23d   : > { %v5324_v55 = vpop.permute.xlu1 %5323 }
 0x23e   : > { %v9276_v27 = vpop.permute.xlu0 %3877 }
 0x23f   : > { %4490 = vrot.lane.b32.xlu1 %v8943_v53, %s8013_s17 }
 0x240   : > { %4307 = vrot.lane.b32.xlu0 %v8943_v53, %s8010_s21 }
 0x241   : > { %v4290_v29 = vpop.permute.xlu1 %4289 }
 0x242   : > { %v4095_v43 = vpop.permute.xlu0 %4094 }
 0x243   : > { %4234 = vst.msk [vmem:[#allocation3 + $0x27] sm:$0xff] %vm4226_vm6, %v4095_v43  ;;  %4628 = vrot.lane.b32.xlu1 %v8943_v53, %s8012_s16 }
 0x244   : > { %4429 = vst.msk [vmem:[#allocation3 + $0x26] sm:$0xff] %vm10999_vm8, %v4290_v29  ;;  %4311 = vrot.lane.b32.xlu0 %v8959_v57, %s8010_s21  ;;  %vm5272_vm8 = vcmask 516544  }
 0x245   : > { %4430 = vst.msk [vmem:[#allocation3 + $0x2e] sm:$0x3] %vm11002_vm9, %v4292_v9  ;;  %v4479_v24 = vpop.permute.xlu1 %4478  ;;  %vm5465_vm9 = vcmask 589312  }
 0x246   : > { %4572 = vst.msk [vmem:[#allocation3 + $0x18] sm:$0xff] %vm4568_vm14, %v4479_v24  ;;  %v4611_v49 = vpop.permute.xlu0 %4610 }
 0x247   : > { %4754 = vst.msk [vmem:[#allocation3 + $0x1f] sm:$0x1] %vm11001_vm10, %v4613_v10  ;;  %4116 = vrot.lane.b32.xlu1 %v8959_v57, %s8009_s20  ;;  %vm11003_vm10 = vcmask 583168  }
 0x248   : > { %4753 = vst.msk [vmem:[#allocation3 + $0x17] sm:$0xff] %vm11000_vm11, %v4611_v49  ;;  %4315 = vrot.lane.b32.xlu0 %v9293_v31, %s8010_s21  ;;  %vm5270_vm11 = vcmask 523712  }
 0x249   : > { %4949 = vst.msk [vmem:[#allocation3 + $0x1e] sm:$0x3] %vm4945_vm2, %v4808_v17  ;;  %v4997_v33 = vpop.permute.xlu1 %4996 }
 0x24a   : > { %5092 = vst.msk [vmem:[#allocation3 + $0x8] sm:$0xff] %vm5090_vm13, %v4997_v33  ;;  %v4806_v38 = vpop.permute.xlu0 %4805 }
 0x24b   : > { %5273 = vst.msk [vmem:[#allocation3 + $0xf] sm:$0x1] %vm5272_vm8, %v5129_v25  ;;  %4120 = vrot.lane.b32.xlu1 %v9293_v31, %s8009_s20  ;;  %v9349_v25 = vsel %vm412_vm12, 0.0, %v8998_v2 }
 0x24c   : > { %4948 = vst.msk [vmem:[#allocation3 + $0x16] sm:$0xff] %vm4943_vm0, %v4806_v38  ;;  %4492 = vrot.lane.b32.xlu0 %v8959_v57, %s8013_s17 }
 0x24d   : > { %v5127_v47 = vpop.permute.xlu1 %5126 }
 0x24e   : > { %5271 = vst.msk [vmem:[#allocation3 + $0x7] sm:$0xff] %vm5270_vm11, %v5127_v47  ;;  %v5322_v39 = vpop.permute.xlu0 %5321 }
 0x24f   : > { %5468 = vst.msk [vmem:[#allocation3 + $0xe] sm:$0x3] %vm11003_vm10, %v5324_v55  ;;  %4632 = vrot.lane.b32.xlu1 %v8959_v57, %s8012_s16  ;;  %vm5562_vm10 = vcmask 588800  }
 0x250   : > { %5466 = vst.msk [vmem:[#allocation3 + $0x6] sm:$0xff] %vm5465_vm9, %v5322_v39  ;;  %4118 = vrot.lane.b32.xlu0 %v8963_v58, %s8009_s20  ;;  %v9376_v39 = vsel %vm412_vm12, 0.0, %v9032_v21 }
 0x251   : > { %v9316_v50 = vpop.permute.xlu1 %3875 }
 0x252   : > { %4031 = vst.msk [vmem:[#allocation3 + $0xf8] sm:$0xff] %vm3999_vm3, %v9316_v50  ;;  %v4099_v56 = vpop.permute.xlu0 %4098  ;;  %vm11031_vm3 = vcmask 392514  }
 0x253   : > { %4236 = vst.msk [vmem:[#allocation3 + $0x2f] sm:$0xfe] %vm4224_vm5, %v4099_v56  ;;  %4636 = vrot.lane.b32.xlu1 %v9293_v31, %s8012_s16 }
 0x254   : > { %4634 = vrot.lane.b32.xlu0 %v8963_v58, %s8012_s16 }
 0x255   : > { %v4294_v63 = vpop.permute.xlu1 %4293 }
 0x256   : > { %4431 = vst.msk [vmem:[#allocation3 + $0x2e] sm:$0xfc] %vm4419_vm7, %v4294_v63  ;;  %v4481_v9 = vpop.permute.xlu0 %4480 }
 0x257   : > { %v5514_v10 = vld [vmem:[#allocation3] sm:$0xff]  ;;  %v5515_v13 = vld [vmem:[#allocation3 + $0x8] sm:$0xff]  ;;  %4573 = vst.msk [vmem:[#allocation3 + $0x20] sm:$0xff] %vm4568_vm14, %v4481_v9  ;;  %4313 = vrot.lane.b32.xlu1 %v8963_v58, %s8010_s21 }
 0x258   : > { %7658 = vmatprep.mubr.msk.f32.mxu1 %vm5562_vm10, %v5514_v10  ;;  %4122 = vrot.lane.b32.xlu0 %v8975_v60, %s8009_s20 }
 0x259   : > { %7659 = vmatmul.mubr.msk.f32.vlgmr.msra.gmra.mrb[8].mxu1 %vm5562_vm10, %v5515_v13  ;;  %v5326_v0 = vpop.permute.xlu1 %5325 }
 0x25a   : > { %v4615_v15 = vpop.permute.xlu0 %4614 }
 0x25b   : > { %4755 = vst.msk [vmem:[#allocation3 + $0x1f] sm:$0xfe] %vm4746_vm15, %v4615_v15  ;;  %4494 = vrot.lane.b32.xlu1 %v8963_v58, %s8013_s17 }
 0x25c   : > { %4496 = vrot.lane.b32.xlu0 %v8975_v60, %s8013_s17 }
 0x25d   : > { %v4810_v17 = vpop.permute.xlu1 %4809 }
 0x25e   : > { %4950 = vst.msk [vmem:[#allocation3 + $0x1e] sm:$0xfc] %vm11031_vm3, %v4810_v17  ;;  %v4999_v19 = vpop.permute.xlu0 %4998  ;;  %vm11032_vm3 = vcmask 122944  }
 0x25f   : > { %5093 = vst.msk [vmem:[#allocation3 + $0x10] sm:$0xff] %vm5090_vm13, %v4999_v19  ;;  %4317 = vrot.lane.b32.xlu1 %v8975_v60, %s8010_s21 }
 0x260   : > { %4638 = vrot.lane.b32.xlu0 %v8975_v60, %s8012_s16 }
 0x261   : > { %v9344_v23 = vpop.permute.xlu1 %3879 }
 0x262   : > { %v5131_v55 = vpop.permute.xlu0 %5130 }
 0x263   : > { %5274 = vst.msk [vmem:[#allocation3 + $0xf] sm:$0xfe] %vm11005_vm4, %v5131_v55  ;;  %4321 = vrot.lane.b32.xlu1 %v9349_v25, %s8010_s21  ;;  %vm11036_vm4 = vcmask 195712  }
 0x264   : > { %5469 = vst.msk [vmem:[#allocation3 + $0xe] sm:$0xfc] %vm11004_vm1, %v5326_v0  ;;  %4126 = vrot.lane.b32.xlu0 %v9349_v25, %s8009_s20  ;;  %vm11033_vm1 = vcmask 189568  }
 0x265   : > { %v4298_v29 = vpop.permute.xlu1 %4297 }
 0x266   : > { %v4103_v43 = vpop.permute.xlu0 %4102 }
 0x267   : > { %4238 = vst.msk [vmem:[#allocation3 + $0x3f] sm:$0x1] %vm11032_vm3, %v4103_v43  ;;  %4124 = vrot.lane.b32.xlu1 %v8983_v61, %s8009_s20  ;;  %vm11034_vm3 = vcmask 319744  }
 0x268   : > { %4642 = vrot.lane.b32.xlu0 %v9349_v25, %s8012_s16 }
 0x269   : > { %v4814_v2 = vpop.permute.xlu1 %4813 }
 0x26a   : > { %v4619_v24 = vpop.permute.xlu0 %4618 }
 0x26b   : > { %4498 = vrot.lane.b32.xlu1 %v8983_v61, %s8013_s17 }
 0x26c   : > { %4319 = vrot.lane.b32.xlu0 %v8983_v61, %s8010_s21 }
 0x26d   : > { %v4101_v49 = vpop.permute.xlu1 %4100 }
 0x26e   : > { %v5135_v33 = vpop.permute.xlu0 %5134  ;;  %4237 = vst.msk [vmem:[#allocation3 + $0x37] sm:$0xff] %vm4226_vm6, %v4101_v49  ;;  %v9426_v49 = vsel %vm412_vm12, 0.0, %v9068_v45 }
 0x26f   : > { %4433 = vst.msk [vmem:[#allocation3 + $0x3e] sm:$0x3] %vm11033_vm1, %v4298_v29  ;;  %4640 = vrot.lane.b32.xlu1 %v8983_v61, %s8012_s16  ;;  %vm11035_vm1 = vcmask 326912  }
 0x270   : > { %4323 = vrot.lane.b32.xlu0 %v9002_v6, %s8010_s21 }
 0x271   : > { %v4483_v38 = vpop.permute.xlu1 %4482 }
 0x272   : > { %v5330_v47 = vpop.permute.xlu0 %5329  ;;  %4574 = vst.msk [vmem:[#allocation3 + $0x28] sm:$0xff] %vm4568_vm14, %v4483_v38 }
 0x273   : > { %4757 = vst.msk [vmem:[#allocation3 + $0x2f] sm:$0x1] %vm11034_vm3, %v4619_v24  ;;  %4128 = vrot.lane.b32.xlu1 %v9002_v6, %s8009_s20  ;;  %vm11038_vm3 = vcmask 122944  }
 0x274   : > { %4327 = vrot.lane.b32.xlu0 %v9376_v39, %s8010_s21 }
 0x275   : > { %v4617_v56 = vpop.permute.xlu1 %4616 }
 0x276   : > { %v4296_v63 = vpop.permute.xlu0 %4295  ;;  %4756 = vst.msk [vmem:[#allocation3 + $0x27] sm:$0xff] %vm11035_vm1, %v4617_v56  ;;  %vm11039_vm1 = vcmask 189568  }
 0x277   : > { %4432 = vst.msk [vmem:[#allocation3 + $0x36] sm:$0xff] %vm11036_vm4, %v4296_v63  ;;  %4132 = vrot.lane.b32.xlu1 %v9376_v39, %s8009_s20  ;;  %vm11037_vm4 = vcmask 583168  }
 0x278   : > { %4952 = vst.msk [vmem:[#allocation3 + $0x2e] sm:$0x3] %vm4945_vm2, %v4814_v2  ;;  %4500 = vrot.lane.b32.xlu0 %v9002_v6, %s8013_s17 }
 0x279   : > { %v5001_v21 = vpop.permute.xlu1 %5000 }
 0x27a   : > { %v5328_v9 = vpop.permute.xlu0 %5327  ;;  %5094 = vst.msk [vmem:[#allocation3 + $0x18] sm:$0xff] %vm5090_vm13, %v5001_v21 }
 0x27b   : > { %5276 = vst.msk [vmem:[#allocation3 + $0x1f] sm:$0x1] %vm5272_vm8, %v5135_v33  ;;  %4644 = vrot.lane.b32.xlu1 %v9002_v6, %s8012_s16 }
 0x27c   : > { %4130 = vrot.lane.b32.xlu0 %v9016_v14, %s8009_s20 }
 0x27d   : > { %v5133_v10 = vpop.permute.xlu1 %5132 }
 0x27e   : > { %v4812_v13 = vpop.permute.xlu0 %4811  ;;  %5275 = vst.msk [vmem:[#allocation3 + $0x17] sm:$0xff] %vm5270_vm11, %v5133_v10 }
 0x27f   : > { %4951 = vst.msk [vmem:[#allocation3 + $0x26] sm:$0xff] %vm4943_vm0, %v4812_v13  ;;  %4648 = vrot.lane.b32.xlu1 %v9376_v39, %s8012_s16  ;;  %v9455_v13 = vsel %vm412_vm12, 0.0, %v9090_v59 }
 0x280   : > { %5470 = vst.msk [vmem:[#allocation3 + $0x16] sm:$0xff] %vm5465_vm9, %v5328_v9  ;;  %4646 = vrot.lane.b32.xlu0 %v9016_v14, %s8012_s16 }
 0x281   : > { %5471 = vst.msk [vmem:[#allocation3 + $0x1e] sm:$0x3] %vm11037_vm4, %v5330_v47  ;;  %v4105_v0 = vpop.permute.xlu1 %4104  ;;  %vm11040_vm4 = vcmask 523713  }
 0x282   : > { %v4300_v15 = vpop.permute.xlu0 %4299  ;;  %4239 = vst.msk [vmem:[#allocation3 + $0x3f] sm:$0xfe] %vm4224_vm5, %v4105_v0 }
 0x283   : > { %4434 = vst.msk [vmem:[#allocation3 + $0x3e] sm:$0xfc] %vm4419_vm7, %v4300_v15  ;;  %4325 = vrot.lane.b32.xlu1 %v9016_v14, %s8010_s21 }
 0x284   : > { %4134 = vrot.lane.b32.xlu0 %v9038_v26, %s8009_s20 }
 0x285   : > { %v4109_v17 = vpop.permute.xlu1 %4108 }
 0x286   : > { %v4304_v19 = vpop.permute.xlu0 %4303  ;;  %4241 = vst.msk [vmem:[#allocation3 + $0x4f] sm:$0x1] %vm11038_vm3, %v4109_v17  ;;  %vm11041_vm3 = vcmask 195712  }
 0x287   : > { %v5516_v55 = vld [vmem:[#allocation3 + $0x10] sm:$0xff]  ;;  %4502 = vrot.lane.b32.xlu1 %v9016_v14, %s8013_s17 }
 0x288   : > { %v5517_v29 = vld [vmem:[#allocation3 + $0x18] sm:$0xff]  ;;  %7661 = vmatprep.mubr.msk.f32.mxu1 %vm5562_vm10, %v5516_v55  ;;  %4504 = vrot.lane.b32.xlu0 %v9038_v26, %s8013_s17 }
 0x289   : > { %7662 = vmatmul.mubr.msk.f32.gmra.mrb[10].mxu1 %vm5562_vm10, %v5517_v29  ;;  %v4621_v43 = vpop.permute.xlu1 %4620  ;;  %v2254_v59 = vpop.f32.mrb[4].mxu1 }
 0x28a   : > { %v4485_v2 = vpop.permute.xlu0 %4484 }
 0x28b   : > { %4575 = vst.msk [vmem:[#allocation3 + $0x30] sm:$0xff] %vm4568_vm14, %v4485_v2  ;;  %4329 = vrot.lane.b32.xlu1 %v9038_v26, %s8010_s21 }
 0x28c   : > { %4758 = vst.msk [vmem:[#allocation3 + $0x2f] sm:$0xfe] %vm4746_vm15, %v4621_v43  ;;  %4650 = vrot.lane.b32.xlu0 %v9038_v26, %s8012_s16 }
 0x28d   : > { %v4625_v24 = vpop.permute.xlu1 %4624 }
 0x28e   : > { %v4107_v33 = vpop.permute.xlu0 %4106 }
 0x28f   : > { %4240 = vst.msk [vmem:[#allocation3 + $0x47] sm:$0xff] %vm4226_vm6, %v4107_v33  ;;  %4333 = vrot.lane.b32.xlu1 %v9426_v49, %s8010_s21 }
 0x290   : > { %4436 = vst.msk [vmem:[#allocation3 + $0x4e] sm:$0x3] %vm11039_vm1, %v4304_v19  ;;  %4138 = vrot.lane.b32.xlu0 %v9426_v49, %s8009_s20  ;;  %vm11042_vm1 = vcmask 319744   ;;  %v7636_v19 = vpop.f32.mrb[5].mxu1 }
 0x291   : > { %v5003_v38 = vpop.permute.xlu1 %5002  ;;  %v2259_v29 = vpop.f32.mrb[6].mxu1 }
 0x292   : > { %v4623_v47 = vpop.permute.xlu0 %4622  ;;  %5095 = vst.msk [vmem:[#allocation3 + $0x20] sm:$0xff] %vm5090_vm13, %v5003_v38  ;;  %v7639_v2 = vpop.f32.mrb[7].mxu1 }
 0x293   : > { %4136 = vrot.lane.b32.xlu1 %v9052_v34, %s8009_s20 }
 0x294   : > { %4654 = vrot.lane.b32.xlu0 %v9426_v49, %s8012_s16 }
 0x295   : > { %v5137_v45 = vpop.permute.xlu1 %5136 }
 0x296   : > { %v5005_v56 = vpop.permute.xlu0 %5004  ;;  %5277 = vst.msk [vmem:[#allocation3 + $0x1f] sm:$0xfe] %vm11040_vm4, %v5137_v45  ;;  %vm11043_vm4 = vcmask 326912  }
 0x297   : > { %5096 = vst.msk [vmem:[#allocation3 + $0x28] sm:$0xff] %vm5090_vm13, %v5005_v56  ;;  %4506 = vrot.lane.b32.xlu1 %v9052_v34, %s8013_s17 }
 0x298   : > { %4331 = vrot.lane.b32.xlu0 %v9052_v34, %s8010_s21 }
 0x299   : > { %v5141_v63 = vpop.permute.xlu1 %5140 }
 0x29a   : > { %v5139_v21 = vpop.permute.xlu0 %5138  ;;  %5279 = vst.msk [vmem:[#allocation3 + $0x2f] sm:$0x1] %vm5272_vm8, %v5141_v63 }
 0x29b   : > { %5278 = vst.msk [vmem:[#allocation3 + $0x27] sm:$0xff] %vm5270_vm11, %v5139_v21  ;;  %4652 = vrot.lane.b32.xlu1 %v9052_v34, %s8012_s16 }
 0x29c   : > { %4335 = vrot.lane.b32.xlu0 %v9076_v12, %s8010_s21 }
 0x29d   : > { %v4302_v9 = vpop.permute.xlu1 %4301 }
 0x29e   : > { %v4111_v10 = vpop.permute.xlu0 %4110  ;;  %4435 = vst.msk [vmem:[#allocation3 + $0x46] sm:$0xff] %vm11041_vm3, %v4302_v9  ;;  %vm11044_vm3 = vcmask 122944   ;;  %v9502_v9 = vsel %vm412_vm12, 0.0, %v9112_v32 }
 0x29f   : > { %4242 = vst.msk [vmem:[#allocation3 + $0x4f] sm:$0xfe] %vm4224_vm5, %v4111_v10  ;;  %4140 = vrot.lane.b32.xlu1 %v9076_v12, %s8009_s20 }
 0x2a0   : > { %4339 = vrot.lane.b32.xlu0 %v9455_v13, %s8010_s21 }
 0x2a1   : > { %v4487_v0 = vpop.permute.xlu1 %4486 }
 0x2a2   : > { %v4489_v15 = vpop.permute.xlu0 %4488  ;;  %4576 = vst.msk [vmem:[#allocation3 + $0x38] sm:$0xff] %vm4568_vm14, %v4487_v0 }
 0x2a3   : > { %4577 = vst.msk [vmem:[#allocation3 + $0x40] sm:$0xff] %vm4568_vm14, %v4489_v15  ;;  %4144 = vrot.lane.b32.xlu1 %v9455_v13, %s8009_s20 }
 0x2a4   : > { %4760 = vst.msk [vmem:[#allocation3 + $0x3f] sm:$0x1] %vm11042_vm1, %v4625_v24  ;;  %4508 = vrot.lane.b32.xlu0 %v9076_v12, %s8013_s17  ;;  %vm11045_vm1 = vcmask 189568  }
 0x2a5   : > { %4759 = vst.msk [vmem:[#allocation3 + $0x37] sm:$0xff] %vm11043_vm4, %v4623_v47  ;;  %v4306_v17 = vpop.permute.xlu1 %4305  ;;  %vm11046_vm4 = vcmask 195712  }
 0x2a6   : > { %v4627_v55 = vpop.permute.xlu0 %4626  ;;  %4437 = vst.msk [vmem:[#allocation3 + $0x4e] sm:$0xfc] %vm4419_vm7, %v4306_v17 }
 0x2a7   : > { %4761 = vst.msk [vmem:[#allocation3 + $0x3f] sm:$0xfe] %vm4746_vm15, %v4627_v55  ;;  %4656 = vrot.lane.b32.xlu1 %v9076_v12, %s8012_s16 }
 0x2a8   : > { %4142 = vrot.lane.b32.xlu0 %v9080_v54, %s8009_s20 }
 0x2a9   : > { %v4310_v43 = vpop.permute.xlu1 %4309 }
 0x2aa   : > { %v4115_v24 = vpop.permute.xlu0 %4114 }
 0x2ab   : > { %4244 = vst.msk [vmem:[#allocation3 + $0x5f] sm:$0x1] %vm11044_vm3, %v4115_v24  ;;  %4660 = vrot.lane.b32.xlu1 %v9455_v13, %s8012_s16  ;;  %vm11047_vm3 = vcmask 319744  }
 0x2ac   : > { %4658 = vrot.lane.b32.xlu0 %v9080_v54, %s8012_s16 }
 0x2ad   : > { %v4113_v33 = vpop.permute.xlu1 %4112 }
 0x2ae   : > { %v4631_v38 = vpop.permute.xlu0 %4630  ;;  %4243 = vst.msk [vmem:[#allocation3 + $0x57] sm:$0xff] %vm4226_vm6, %v4113_v33 }
 0x2af   : > { %4439 = vst.msk [vmem:[#allocation3 + $0x5e] sm:$0x3] %vm11045_vm1, %v4310_v43  ;;  %4337 = vrot.lane.b32.xlu1 %v9080_v54, %s8010_s21  ;;  %vm11048_vm1 = vcmask 326912   ;;  %v9531_v43 = vsel %vm412_vm12, 0.0, %v9132_v8 }
 0x2b0   : > { %4146 = vrot.lane.b32.xlu0 %v9094_v62, %s8009_s20 }
 0x2b1   : > { %v4491_v47 = vpop.permute.xlu1 %4490 }
 0x2b2   : > { %v4308_v45 = vpop.permute.xlu0 %4307  ;;  %4578 = vst.msk [vmem:[#allocation3 + $0x48] sm:$0xff] %vm4568_vm14, %v4491_v47 }
 0x2b3   : > { %4438 = vst.msk [vmem:[#allocation3 + $0x56] sm:$0xff] %vm11046_vm4, %v4308_v45  ;;  %4510 = vrot.lane.b32.xlu1 %v9080_v54, %s8013_s17  ;;  %vm11049_vm4 = vcmask 122944  }
 0x2b4   : > { %4763 = vst.msk [vmem:[#allocation3 + $0x4f] sm:$0x1] %vm11047_vm3, %v4631_v38  ;;  %4512 = vrot.lane.b32.xlu0 %v9094_v62, %s8013_s17  ;;  %vm11050_vm3 = vcmask 189568  }
 0x2b5   : > { %v4629_v56 = vpop.permute.xlu1 %4628 }
 0x2b6   : > { %v4312_v63 = vpop.permute.xlu0 %4311  ;;  %4762 = vst.msk [vmem:[#allocation3 + $0x47] sm:$0xff] %vm11048_vm1, %v4629_v56  ;;  %vm11051_vm1 = vcmask 195712  }
 0x2b7   : > { %4341 = vrot.lane.b32.xlu1 %v9094_v62, %s8010_s21 }
 0x2b8   : > { %4662 = vrot.lane.b32.xlu0 %v9094_v62, %s8012_s16 }
 0x2b9   : > { %v4117_v21 = vpop.permute.xlu1 %4116 }
 0x2ba   : > { %v4316_v10 = vpop.permute.xlu0 %4315  ;;  %4245 = vst.msk [vmem:[#allocation3 + $0x5f] sm:$0xfe] %vm4224_vm5, %v4117_v21 }
 0x2bb   : > { %4440 = vst.msk [vmem:[#allocation3 + $0x5e] sm:$0xfc] %vm4419_vm7, %v4312_v63  ;;  %4345 = vrot.lane.b32.xlu1 %v9502_v9, %s8010_s21 }
 0x2bc   : > { %4150 = vrot.lane.b32.xlu0 %v9502_v9, %s8009_s20 }
 0x2bd   : > { %v4121_v0 = vpop.permute.xlu1 %4120 }
 0x2be   : > { %v4493_v15 = vpop.permute.xlu0 %4492  ;;  %4247 = vst.msk [vmem:[#allocation3 + $0x6f] sm:$0x1] %vm11049_vm4, %v4121_v0  ;;  %vm11052_vm4 = vcmask 319744  }
 0x2bf   : > { %4579 = vst.msk [vmem:[#allocation3 + $0x50] sm:$0xff] %vm4568_vm14, %v4493_v15  ;;  %4148 = vrot.lane.b32.xlu1 %v9102_v30, %s8009_s20 }
 0x2c0   : > { %4666 = vrot.lane.b32.xlu0 %v9502_v9, %s8012_s16 }
 0x2c1   : > { %v4633_v32 = vpop.permute.xlu1 %4632 }
 0x2c2   : > { %v4119_v59 = vpop.permute.xlu0 %4118  ;;  %4764 = vst.msk [vmem:[#allocation3 + $0x4f] sm:$0xfe] %vm4746_vm15, %v4633_v32  ;;  %v9578_v32 = vsel %vm412_vm12, 0.0, %v9149_v41 }
 0x2c3   : > { %4246 = vst.msk [vmem:[#allocation3 + $0x67] sm:$0xff] %vm4226_vm6, %v4119_v59  ;;  %4514 = vrot.lane.b32.xlu1 %v9102_v30, %s8013_s17 }
 0x2c4   : > { %4442 = vst.msk [vmem:[#allocation3 + $0x6e] sm:$0x3] %vm11050_vm3, %v4316_v10  ;;  %4343 = vrot.lane.b32.xlu0 %v9102_v30, %s8010_s21  ;;  %vm11053_vm3 = vcmask 326912  }
 0x2c5   : > { %v4637_v17 = vpop.permute.xlu1 %4636 }
 0x2c6   : > { %v4635_v19 = vpop.permute.xlu0 %4634 }
 0x2c7   : > { %4664 = vrot.lane.b32.xlu1 %v9102_v30, %s8012_s16 }
 0x2c8   : > { %4347 = vrot.lane.b32.xlu0 %v9116_v3, %s8010_s21 }
 0x2c9   : > { %v4314_v55 = vpop.permute.xlu1 %4313 }
 0x2ca   : > { %v4123_v29 = vpop.permute.xlu0 %4122  ;;  %4441 = vst.msk [vmem:[#allocation3 + $0x66] sm:$0xff] %vm11051_vm1, %v4314_v55  ;;  %vm11054_vm1 = vcmask 122944  }
 0x2cb   : > { %4248 = vst.msk [vmem:[#allocation3 + $0x6f] sm:$0xfe] %vm4224_vm5, %v4123_v29  ;;  %4152 = vrot.lane.b32.xlu1 %v9116_v3, %s8009_s20 }
 0x2cc   : > { %4351 = vrot.lane.b32.xlu0 %v9531_v43, %s8010_s21 }
 0x2cd   : > { %v4495_v2 = vpop.permute.xlu1 %4494 }
 0x2ce   : > { %v4497_v24 = vpop.permute.xlu0 %4496  ;;  %4580 = vst.msk [vmem:[#allocation3 + $0x58] sm:$0xff] %vm4568_vm14, %v4495_v2 }
 0x2cf   : > { %4581 = vst.msk [vmem:[#allocation3 + $0x60] sm:$0xff] %vm4568_vm14, %v4497_v24  ;;  %4156 = vrot.lane.b32.xlu1 %v9531_v43, %s8009_s20 }
 0x2d0   : > { %4766 = vst.msk [vmem:[#allocation3 + $0x5f] sm:$0x1] %vm11052_vm4, %v4637_v17  ;;  %4516 = vrot.lane.b32.xlu0 %v9116_v3, %s8013_s17  ;;  %vm11055_vm4 = vcmask 189568  }
 0x2d1   : > { %4765 = vst.msk [vmem:[#allocation3 + $0x57] sm:$0xff] %vm11053_vm3, %v4635_v19  ;;  %v4318_v8 = vpop.permute.xlu1 %4317  ;;  %vm11056_vm3 = vcmask 195712  }
 0x2d2   : > { %v4639_v33 = vpop.permute.xlu0 %4638  ;;  %4443 = vst.msk [vmem:[#allocation3 + $0x6e] sm:$0xfc] %vm4419_vm7, %v4318_v8 }
 0x2d3   : > { %4767 = vst.msk [vmem:[#allocation3 + $0x5f] sm:$0xfe] %vm4746_vm15, %v4639_v33  ;;  %4668 = vrot.lane.b32.xlu1 %v9116_v3, %s8012_s16  ;;  %v9607_v33 = vsel %vm412_vm12, 0.0, %v9182_v35 }
 0x2d4   : > { %4154 = vrot.lane.b32.xlu0 %v9124_v4, %s8009_s20 }
 0x2d5   : > { %v4322_v38 = vpop.permute.xlu1 %4321 }
 0x2d6   : > { %v4127_v47 = vpop.permute.xlu0 %4126 }
 0x2d7   : > { %4250 = vst.msk [vmem:[#allocation3 + $0x7f] sm:$0x1] %vm11054_vm1, %v4127_v47  ;;  %4672 = vrot.lane.b32.xlu1 %v9531_v43, %s8012_s16  ;;  %vm11057_vm1 = vcmask 319744  }
 0x2d8   : > { %4670 = vrot.lane.b32.xlu0 %v9124_v4, %s8012_s16 }
 0x2d9   : > { %v4125_v45 = vpop.permute.xlu1 %4124 }
 0x2da   : > { %v4643_v56 = vpop.permute.xlu0 %4642  ;;  %4249 = vst.msk [vmem:[#allocation3 + $0x77] sm:$0xff] %vm4226_vm6, %v4125_v45 }
 0x2db   : > { %4445 = vst.msk [vmem:[#allocation3 + $0x7e] sm:$0x3] %vm11055_vm4, %v4322_v38  ;;  %4349 = vrot.lane.b32.xlu1 %v9124_v4, %s8010_s21  ;;  %vm11058_vm4 = vcmask 326912  }
 0x2dc   : > { %4158 = vrot.lane.b32.xlu0 %v9139_v11, %s8009_s20 }
 0x2dd   : > { %v4499_v63 = vpop.permute.xlu1 %4498 }
 0x2de   : > { %v4320_v21 = vpop.permute.xlu0 %4319  ;;  %4582 = vst.msk [vmem:[#allocation3 + $0x68] sm:$0xff] %vm4568_vm14, %v4499_v63 }
 0x2df   : > { %4444 = vst.msk [vmem:[#allocation3 + $0x76] sm:$0xff] %vm11056_vm3, %v4320_v21  ;;  %4518 = vrot.lane.b32.xlu1 %v9124_v4, %s8013_s17  ;;  %vm11059_vm3 = vcmask 122944  }
 0x2e0   : > { %4769 = vst.msk [vmem:[#allocation3 + $0x6f] sm:$0x1] %vm11057_vm1, %v4643_v56  ;;  %4520 = vrot.lane.b32.xlu0 %v9139_v11, %s8013_s17  ;;  %vm11060_vm1 = vcmask 189568  }
 0x2e1   : > { %v4641_v10 = vpop.permute.xlu1 %4640 }
 0x2e2   : > { %v4324_v0 = vpop.permute.xlu0 %4323  ;;  %4768 = vst.msk [vmem:[#allocation3 + $0x67] sm:$0xff] %vm11058_vm4, %v4641_v10  ;;  %vm11061_vm4 = vcmask 195712  }
 0x2e3   : > { %4353 = vrot.lane.b32.xlu1 %v9139_v11, %s8010_s21 }
 0x2e4   : > { %4674 = vrot.lane.b32.xlu0 %v9139_v11, %s8012_s16 }
 0x2e5   : > { %v4129_v15 = vpop.permute.xlu1 %4128 }
 0x2e6   : > { %v4328_v59 = vpop.permute.xlu0 %4327  ;;  %4251 = vst.msk [vmem:[#allocation3 + $0x7f] sm:$0xfe] %vm4224_vm5, %v4129_v15 }
 0x2e7   : > { %4446 = vst.msk [vmem:[#allocation3 + $0x7e] sm:$0xfc] %vm4419_vm7, %v4324_v0  ;;  %4357 = vrot.lane.b32.xlu1 %v9578_v32, %s8010_s21 }
 0x2e8   : > { %4162 = vrot.lane.b32.xlu0 %v9578_v32, %s8009_s20 }
 0x2e9   : > { %v4133_v17 = vpop.permute.xlu1 %4132 }
 0x2ea   : > { %v4501_v19 = vpop.permute.xlu0 %4500  ;;  %4253 = vst.msk [vmem:[#allocation3 + $0x8f] sm:$0x1] %vm11059_vm3, %v4133_v17  ;;  %vm11062_vm3 = vcmask 319744  }
 0x2eb   : > { %4583 = vst.msk [vmem:[#allocation3 + $0x70] sm:$0xff] %vm4568_vm14, %v4501_v19  ;;  %4160 = vrot.lane.b32.xlu1 %v9145_v40, %s8009_s20 }
 0x2ec   : > { %4678 = vrot.lane.b32.xlu0 %v9578_v32, %s8012_s16 }
 0x2ed   : > { %v4645_v41 = vpop.permute.xlu1 %4644 }
 0x2ee   : > { %v4131_v55 = vpop.permute.xlu0 %4130  ;;  %4770 = vst.msk [vmem:[#allocation3 + $0x6f] sm:$0xfe] %vm4746_vm15, %v4645_v41  ;;  %v9654_v41 = vsel %vm412_vm12, 0.0, %v9276_v27 }
 0x2ef   : > { %4252 = vst.msk [vmem:[#allocation3 + $0x87] sm:$0xff] %vm4226_vm6, %v4131_v55  ;;  %4522 = vrot.lane.b32.xlu1 %v9145_v40, %s8013_s17 }
 0x2f0   : > { %4448 = vst.msk [vmem:[#allocation3 + $0x8e] sm:$0x3] %vm11060_vm1, %v4328_v59  ;;  %4355 = vrot.lane.b32.xlu0 %v9145_v40, %s8010_s21  ;;  %vm11063_vm1 = vcmask 326912  }
 0x2f1   : > { %v4649_v29 = vpop.permute.xlu1 %4648 }
 0x2f2   : > { %v4647_v2 = vpop.permute.xlu0 %4646 }
 0x2f3   : > { %4676 = vrot.lane.b32.xlu1 %v9145_v40, %s8012_s16 }
 0x2f4   : > { %4359 = vrot.lane.b32.xlu0 %v9173_v20, %s8010_s21 }
 0x2f5   : > { %v4326_v24 = vpop.permute.xlu1 %4325 }
 0x2f6   : > { %v4135_v8 = vpop.permute.xlu0 %4134  ;;  %4447 = vst.msk [vmem:[#allocation3 + $0x86] sm:$0xff] %vm11061_vm4, %v4326_v24  ;;  %vm11064_vm4 = vcmask 122944  }
 0x2f7   : > { %4254 = vst.msk [vmem:[#allocation3 + $0x8f] sm:$0xfe] %vm4224_vm5, %v4135_v8  ;;  %4164 = vrot.lane.b32.xlu1 %v9173_v20, %s8009_s20 }
 0x2f8   : > { %4363 = vrot.lane.b32.xlu0 %v9607_v33, %s8010_s21 }
 0x2f9   : > { %v4503_v38 = vpop.permute.xlu1 %4502 }
 0x2fa   : > { %v4505_v47 = vpop.permute.xlu0 %4504  ;;  %4584 = vst.msk [vmem:[#allocation3 + $0x78] sm:$0xff] %vm4568_vm14, %v4503_v38 }
 0x2fb   : > { %4585 = vst.msk [vmem:[#allocation3 + $0x80] sm:$0xff] %vm4568_vm14, %v4505_v47  ;;  %4168 = vrot.lane.b32.xlu1 %v9607_v33, %s8009_s20 }
 0x2fc   : > { %4772 = vst.msk [vmem:[#allocation3 + $0x7f] sm:$0x1] %vm11062_vm3, %v4649_v29  ;;  %4524 = vrot.lane.b32.xlu0 %v9173_v20, %s8013_s17  ;;  %vm11065_vm3 = vcmask 189568  }
 0x2fd   : > { %4771 = vst.msk [vmem:[#allocation3 + $0x77] sm:$0xff] %vm11063_vm1, %v4647_v2  ;;  %v4330_v35 = vpop.permute.xlu1 %4329  ;;  %vm11066_vm1 = vcmask 195712  }
 0x2fe   : > { %v4651_v45 = vpop.permute.xlu0 %4650  ;;  %4449 = vst.msk [vmem:[#allocation3 + $0x8e] sm:$0xfc] %vm4419_vm7, %v4330_v35 }
 0x2ff   : > { %4773 = vst.msk [vmem:[#allocation3 + $0x7f] sm:$0xfe] %vm4746_vm15, %v4651_v45  ;;  %4680 = vrot.lane.b32.xlu1 %v9173_v20, %s8012_s16 }
 0x300   : > { %4166 = vrot.lane.b32.xlu0 %v9219_v36, %s8009_s20 }
 0x301   : > { %v4334_v56 = vpop.permute.xlu1 %4333 }
 0x302   : > { %v4139_v63 = vpop.permute.xlu0 %4138 }
 0x303   : > { %4256 = vst.msk [vmem:[#allocation3 + $0x9f] sm:$0x1] %vm11064_vm4, %v4139_v63  ;;  %4684 = vrot.lane.b32.xlu1 %v9607_v33, %s8012_s16  ;;  %vm11067_vm4 = vcmask 319744  }
 0x304   : > { %4682 = vrot.lane.b32.xlu0 %v9219_v36, %s8012_s16 }
 0x305   : > { %v4137_v21 = vpop.permute.xlu1 %4136 }
 0x306   : > { %v4655_v10 = vpop.permute.xlu0 %4654  ;;  %4255 = vst.msk [vmem:[#allocation3 + $0x97] sm:$0xff] %vm4226_vm6, %v4137_v21 }
 0x307   : > { %4451 = vst.msk [vmem:[#allocation3 + $0x9e] sm:$0x3] %vm11065_vm3, %v4334_v56  ;;  %4361 = vrot.lane.b32.xlu1 %v9219_v36, %s8010_s21  ;;  %vm11068_vm3 = vcmask 326912  }
 0x308   : > { %4170 = vrot.lane.b32.xlu0 %v9231_v42, %s8009_s20 }
 0x309   : > { %v4507_v0 = vpop.permute.xlu1 %4506 }
 0x30a   : > { %v4332_v15 = vpop.permute.xlu0 %4331  ;;  %4586 = vst.msk [vmem:[#allocation3 + $0x88] sm:$0xff] %vm4568_vm14, %v4507_v0 }
 0x30b   : > { %4450 = vst.msk [vmem:[#allocation3 + $0x96] sm:$0xff] %vm11066_vm1, %v4332_v15  ;;  %4526 = vrot.lane.b32.xlu1 %v9219_v36, %s8013_s17  ;;  %vm11069_vm1 = vcmask 122944  }
 0x30c   : > { %4775 = vst.msk [vmem:[#allocation3 + $0x8f] sm:$0x1] %vm11067_vm4, %v4655_v10  ;;  %4528 = vrot.lane.b32.xlu0 %v9231_v42, %s8013_s17  ;;  %vm11070_vm4 = vcmask 189568  }
 0x30d   : > { %v4653_v59 = vpop.permute.xlu1 %4652 }
 0x30e   : > { %v4336_v17 = vpop.permute.xlu0 %4335  ;;  %4774 = vst.msk [vmem:[#allocation3 + $0x87] sm:$0xff] %vm11068_vm3, %v4653_v59  ;;  %vm11071_vm3 = vcmask 195712  }
 0x30f   : > { %4365 = vrot.lane.b32.xlu1 %v9231_v42, %s8010_s21 }
 0x310   : > { %4686 = vrot.lane.b32.xlu0 %v9231_v42, %s8012_s16 }
 0x311   : > { %v4141_v19 = vpop.permute.xlu1 %4140 }
 0x312   : > { %v4340_v55 = vpop.permute.xlu0 %4339  ;;  %4257 = vst.msk [vmem:[#allocation3 + $0x9f] sm:$0xfe] %vm4224_vm5, %v4141_v19 }
 0x313   : > { %4452 = vst.msk [vmem:[#allocation3 + $0x9e] sm:$0xfc] %vm4419_vm7, %v4336_v17  ;;  %4369 = vrot.lane.b32.xlu1 %v9654_v41, %s8010_s21 }
 0x314   : > { %4174 = vrot.lane.b32.xlu0 %v9654_v41, %s8009_s20 }
 0x315   : > { %v4145_v29 = vpop.permute.xlu1 %4144 }
 0x316   : > { %v4509_v2 = vpop.permute.xlu0 %4508  ;;  %4259 = vst.msk [vmem:[#allocation3 + $0xaf] sm:$0x1] %vm11069_vm1, %v4145_v29  ;;  %vm11072_vm1 = vcmp.eq.s32.totalorder %v8118_v7, 0 }
 0x317   : > { %4587 = vst.msk [vmem:[#allocation3 + $0x90] sm:$0xff] %vm4568_vm14, %v4509_v2  ;;  %4172 = vrot.lane.b32.xlu1 %v9316_v50, %s8009_s20  ;;  %v9683_v45 = vsel %vm11072_vm1, 0.0, %v9344_v23  ;;  %vm11075_vm1 = vcmask 122944  }
 0x318   : > { %4690 = vrot.lane.b32.xlu0 %v9654_v41, %s8012_s16 }
 0x319   : > { %v4657_v27 = vpop.permute.xlu1 %4656 }
 0x31a   : > { %v4143_v24 = vpop.permute.xlu0 %4142  ;;  %4776 = vst.msk [vmem:[#allocation3 + $0x8f] sm:$0xfe] %vm4746_vm15, %v4657_v27 }
 0x31b   : > { %4258 = vst.msk [vmem:[#allocation3 + $0xa7] sm:$0xff] %vm4226_vm6, %v4143_v24  ;;  %4530 = vrot.lane.b32.xlu1 %v9316_v50, %s8013_s17 }
 0x31c   : > { %4454 = vst.msk [vmem:[#allocation3 + $0xae] sm:$0x3] %vm11070_vm4, %v4340_v55  ;;  %4367 = vrot.lane.b32.xlu0 %v9316_v50, %s8010_s21  ;;  %vm11073_vm4 = vcmask 319744  }
 0x31d   : > { %v4661_v8 = vpop.permute.xlu1 %4660 }
 0x31e   : > { %v4659_v38 = vpop.permute.xlu0 %4658 }
 0x31f   : > { %4688 = vrot.lane.b32.xlu1 %v9316_v50, %s8012_s16 }
 0x320   : > { %5331 = vrot.lane.b32.xlu0 %v8916_v46, %s8017_s29 }
 0x321   : > { %v4338_v47 = vpop.permute.xlu1 %4337 }
 0x322   : > { %v4147_v35 = vpop.permute.xlu0 %4146  ;;  %4453 = vst.msk [vmem:[#allocation3 + $0xa6] sm:$0xff] %vm11071_vm3, %v4338_v47  ;;  %vm11074_vm3 = vcmask 326912  }
 0x323   : > { %4260 = vst.msk [vmem:[#allocation3 + $0xaf] sm:$0xfe] %vm4224_vm5, %v4147_v35  ;;  %5333 = vrot.lane.b32.xlu1 %v8923_v48, %s8017_s29 }
 0x324   : > { %4532 = vrot.lane.b32.xlu0 %v9683_v45, %s8013_s17 }
 0x325   : > { %v4511_v56 = vpop.permute.xlu1 %4510 }
 0x326   : > { %v4513_v63 = vpop.permute.xlu0 %4512  ;;  %4588 = vst.msk [vmem:[#allocation3 + $0x98] sm:$0xff] %vm4568_vm14, %v4511_v56 }
 0x327   : > { %4589 = vst.msk [vmem:[#allocation3 + $0xa0] sm:$0xff] %vm4568_vm14, %v4513_v63  ;;  %4692 = vrot.lane.b32.xlu1 %v9683_v45, %s8012_s16  ;;  %s7942_s16 = scalar_lea.vmem %s10935_s15, 4096 }
 0x328   : > { %4778 = vst.msk [vmem:[#allocation3 + $0x9f] sm:$0x1] %vm11073_vm4, %v4661_v8  ;;  %4815 = vrot.lane.b32.xlu0 %v8916_v46, %s8014_s18  ;;  %vm11076_vm4 = vcmask 189568   ;;  %p7943_p11 = scmp.ne.s32.totalorder %s10935_s15, %s7942_s16 }
 0x329   : > { %4777 = vst.msk [vmem:[#allocation3 + $0x97] sm:$0xff] %vm11074_vm3, %v4659_v38  ;;  %v4342_v23 = vpop.permute.xlu1 %4341  ;;  %vm11077_vm3 = vcmask 195712  }
 0x32a   : > { %v4663_v21 = vpop.permute.xlu0 %4662  ;;  %4455 = vst.msk [vmem:[#allocation3 + $0xae] sm:$0xfc] %vm4419_vm7, %v4342_v23  ;;  %p7944_p12 = pnand %p7943_p11, %p8099_p5 }
 0x32b   : > { %4779 = vst.msk [vmem:[#allocation3 + $0x9f] sm:$0xfe] %vm4746_vm15, %v4663_v21  ;;  %4817 = vrot.lane.b32.xlu1 %v8923_v48, %s8014_s18 }
 0x32c   : > { %v9700_v10 = vpop.f32.mrb[8].mxu1  ;;  %4819 = vrot.lane.b32.xlu0 %v9198_v28, %s8014_s18  ;;  %p7945_p13 = pneg %p7944_p12 }
 0x32d   : > { %v9706_v0 = vpop.f32.mrb[9].mxu1  ;;  %v4346_v15 = vpop.permute.xlu1 %4345 }
 0x32e   : > { %v4151_v59 = vpop.permute.xlu0 %4150 }
 0x32f   : > { %4262 = vst.msk [vmem:[#allocation3 + $0xbf] sm:$0x1] %vm11075_vm1, %v4151_v59  ;;  %5335 = vrot.lane.b32.xlu1 %v9198_v28, %s8017_s29  ;;  %vm11078_vm1 = vcmask 319744  }
 0x330   : > { %5006 = vrot.lane.b32.xlu0 %v8935_v51, %s8015_s19 }
 0x331   : > { %v4149_v46 = vpop.permute.xlu1 %4148 }
 0x332   : > { %v4667_v17 = vpop.permute.xlu0 %4666  ;;  %4261 = vst.msk [vmem:[#allocation3 + $0xb7] sm:$0xff] %vm4226_vm6, %v4149_v46 }
 0x333   : > { %4457 = vst.msk [vmem:[#allocation3 + $0xbe] sm:$0x3] %vm11076_vm4, %v4346_v15  ;;  %5008 = vrot.lane.b32.xlu1 %v8943_v53, %s8015_s19  ;;  %vm11079_vm4 = vcmask 326912  }
 0x334   : > { %5142 = vrot.lane.b32.xlu0 %v8935_v51, %s8016_s22 }
 0x335   : > { %v4515_v48 = vpop.permute.xlu1 %4514 }
 0x336   : > { %v4344_v19 = vpop.permute.xlu0 %4343  ;;  %4590 = vst.msk [vmem:[#allocation3 + $0xa8] sm:$0xff] %vm4568_vm14, %v4515_v48 }
 0x337   : > { %4456 = vst.msk [vmem:[#allocation3 + $0xb6] sm:$0xff] %vm11077_vm3, %v4344_v19  ;;  %5144 = vrot.lane.b32.xlu1 %v8943_v53, %s8016_s22  ;;  %vm11080_vm3 = vcmask 122944  }
 0x338   : > { %4781 = vst.msk [vmem:[#allocation3 + $0xaf] sm:$0x1] %vm11078_vm1, %v4667_v17  ;;  %5146 = vrot.lane.b32.xlu0 %v9264_v18, %s8016_s22  ;;  %vm11081_vm1 = vcmask 189568  }
 0x339   : > { %v4665_v28 = vpop.permute.xlu1 %4664 }
 0x33a   : > { %v4348_v55 = vpop.permute.xlu0 %4347  ;;  %4780 = vst.msk [vmem:[#allocation3 + $0xa7] sm:$0xff] %vm11079_vm4, %v4665_v28  ;;  %vm11082_vm4 = vcmask 195712  }
 0x33b   : > { %5337 = vrot.lane.b32.xlu1 %v8935_v51, %s8017_s29 }
 0x33c   : > { %5339 = vrot.lane.b32.xlu0 %v8943_v53, %s8017_s29 }
 0x33d   : > { %v4153_v29 = vpop.permute.xlu1 %4152 }
 0x33e   : > { %v4352_v2 = vpop.permute.xlu0 %4351  ;;  %4263 = vst.msk [vmem:[#allocation3 + $0xbf] sm:$0xfe] %vm4224_vm5, %v4153_v29 }
 0x33f   : > { %4458 = vst.msk [vmem:[#allocation3 + $0xbe] sm:$0xfc] %vm4419_vm7, %v4348_v55  ;;  %4821 = vrot.lane.b32.xlu1 %v8935_v51, %s8014_s18 }
 0x340   : > { %4823 = vrot.lane.b32.xlu0 %v8943_v53, %s8014_s18 }
 0x341   : > { %v4157_v27 = vpop.permute.xlu1 %4156 }
 0x342   : > { %v4517_v24 = vpop.permute.xlu0 %4516  ;;  %4265 = vst.msk [vmem:[#allocation3 + $0xcf] sm:$0x1] %vm11080_vm3, %v4157_v27  ;;  %vm11083_vm3 = vcmask 319744  }
 0x343   : > { %4591 = vst.msk [vmem:[#allocation3 + $0xb0] sm:$0xff] %vm4568_vm14, %v4517_v24  ;;  %4825 = vrot.lane.b32.xlu1 %v9264_v18, %s8014_s18 }
 0x344   : > { %5341 = vrot.lane.b32.xlu0 %v9264_v18, %s8017_s29 }
 0x345   : > { %v4669_v8 = vpop.permute.xlu1 %4668 }
 0x346   : > { %v4155_v38 = vpop.permute.xlu0 %4154  ;;  %4782 = vst.msk [vmem:[#allocation3 + $0xaf] sm:$0xfe] %vm4746_vm15, %v4669_v8 }
 0x347   : > { %4264 = vst.msk [vmem:[#allocation3 + $0xc7] sm:$0xff] %vm4226_vm6, %v4155_v38  ;;  %5010 = vrot.lane.b32.xlu1 %v8959_v57, %s8015_s19 }
 0x348   : > { %4460 = vst.msk [vmem:[#allocation3 + $0xce] sm:$0x3] %vm11081_vm1, %v4352_v2  ;;  %5012 = vrot.lane.b32.xlu0 %v8963_v58, %s8015_s19  ;;  %vm11084_vm1 = vcmask 326912  }
 0x349   : > { %v4673_v51 = vpop.permute.xlu1 %4672 }
 0x34a   : > { %v4671_v53 = vpop.permute.xlu0 %4670 }
 0x34b   : > { %5148 = vrot.lane.b32.xlu1 %v8959_v57, %s8016_s22 }
 0x34c   : > { %5150 = vrot.lane.b32.xlu0 %v8963_v58, %s8016_s22 }
 0x34d   : > { %v4350_v18 = vpop.permute.xlu1 %4349 }
 0x34e   : > { %v4159_v47 = vpop.permute.xlu0 %4158  ;;  %4459 = vst.msk [vmem:[#allocation3 + $0xc6] sm:$0xff] %vm11082_vm4, %v4350_v18  ;;  %vm11085_vm4 = vcmask 122944  }
 0x34f   : > { %4266 = vst.msk [vmem:[#allocation3 + $0xcf] sm:$0xfe] %vm4224_vm5, %v4159_v47  ;;  %5152 = vrot.lane.b32.xlu1 %v9293_v31, %s8016_s22 }
 0x350   : > { %5343 = vrot.lane.b32.xlu0 %v8959_v57, %s8017_s29 }
 0x351   : > { %v4519_v35 = vpop.permute.xlu1 %4518 }
 0x352   : > { %v4521_v56 = vpop.permute.xlu0 %4520  ;;  %4592 = vst.msk [vmem:[#allocation3 + $0xb8] sm:$0xff] %vm4568_vm14, %v4519_v35 }
 0x353   : > { %4593 = vst.msk [vmem:[#allocation3 + $0xc0] sm:$0xff] %vm4568_vm14, %v4521_v56  ;;  %5345 = vrot.lane.b32.xlu1 %v8963_v58, %s8017_s29 }
 0x354   : > { %4784 = vst.msk [vmem:[#allocation3 + $0xbf] sm:$0x1] %vm11083_vm3, %v4673_v51  ;;  %4827 = vrot.lane.b32.xlu0 %v8959_v57, %s8014_s18  ;;  %vm11086_vm3 = vcmask 189568  }
 0x355   : > { %4783 = vst.msk [vmem:[#allocation3 + $0xb7] sm:$0xff] %vm11084_vm1, %v4671_v53  ;;  %v4354_v63 = vpop.permute.xlu1 %4353  ;;  %vm11087_vm1 = vcmask 195712  }
 0x356   : > { %v4675_v23 = vpop.permute.xlu0 %4674  ;;  %4461 = vst.msk [vmem:[#allocation3 + $0xce] sm:$0xfc] %vm4419_vm7, %v4354_v63 }
 0x357   : > { %4785 = vst.msk [vmem:[#allocation3 + $0xbf] sm:$0xfe] %vm4746_vm15, %v4675_v23  ;;  %4829 = vrot.lane.b32.xlu1 %v8963_v58, %s8014_s18 }
 0x358   : > { %4831 = vrot.lane.b32.xlu0 %v9293_v31, %s8014_s18 }
 0x359   : > { %v4358_v21 = vpop.permute.xlu1 %4357 }
 0x35a   : > { %v4163_v15 = vpop.permute.xlu0 %4162 }
 0x35b   : > { %4268 = vst.msk [vmem:[#allocation3 + $0xdf] sm:$0x1] %vm11085_vm4, %v4163_v15  ;;  %5347 = vrot.lane.b32.xlu1 %v9293_v31, %s8017_s29  ;;  %vm11088_vm4 = vcmask 319744  }
 0x35c   : > { %v9775_v59 = vpop.f32.mrb[10].mxu1  ;;  %5014 = vrot.lane.b32.xlu0 %v8975_v60, %s8015_s19 }
 0x35d   : > { %v9781_v57 = vpop.f32.mrb[11].mxu1  ;;  %v4161_v46 = vpop.permute.xlu1 %4160 }
 0x35e   : > { %v4679_v17 = vpop.permute.xlu0 %4678  ;;  %4267 = vst.msk [vmem:[#allocation3 + $0xd7] sm:$0xff] %vm4226_vm6, %v4161_v46 }
 0x35f   : > { %4463 = vst.msk [vmem:[#allocation3 + $0xde] sm:$0x3] %vm11086_vm3, %v4358_v21  ;;  %5016 = vrot.lane.b32.xlu1 %v8983_v61, %s8015_s19  ;;  %vm11089_vm3 = vcmask 326912  }
 0x360   : > { %5154 = vrot.lane.b32.xlu0 %v8975_v60, %s8016_s22 }
 0x361   : > { %v4523_v58 = vpop.permute.xlu1 %4522 }
 0x362   : > { %v4356_v48 = vpop.permute.xlu0 %4355  ;;  %4594 = vst.msk [vmem:[#allocation3 + $0xc8] sm:$0xff] %vm4568_vm14, %v4523_v58 }
 0x363   : > { %4462 = vst.msk [vmem:[#allocation3 + $0xd6] sm:$0xff] %vm11087_vm1, %v4356_v48  ;;  %5156 = vrot.lane.b32.xlu1 %v8983_v61, %s8016_s22  ;;  %vm11090_vm1 = vcmask 122944  }
 0x364   : > { %4787 = vst.msk [vmem:[#allocation3 + $0xcf] sm:$0x1] %vm11088_vm4, %v4679_v17  ;;  %5158 = vrot.lane.b32.xlu0 %v9349_v25, %s8016_s22  ;;  %vm11091_vm4 = vcmask 189568  }
 0x365   : > { %v4677_v31 = vpop.permute.xlu1 %4676 }
 0x366   : > { %v4360_v19 = vpop.permute.xlu0 %4359  ;;  %4786 = vst.msk [vmem:[#allocation3 + $0xc7] sm:$0xff] %vm11089_vm3, %v4677_v31  ;;  %vm11092_vm3 = vcmask 195712  }
 0x367   : > { %5349 = vrot.lane.b32.xlu1 %v8975_v60, %s8017_s29 }
 0x368   : > { %5351 = vrot.lane.b32.xlu0 %v8983_v61, %s8017_s29 }
 0x369   : > { %v4165_v28 = vpop.permute.xlu1 %4164 }
 0x36a   : > { %v4364_v55 = vpop.permute.xlu0 %4363  ;;  %4269 = vst.msk [vmem:[#allocation3 + $0xdf] sm:$0xfe] %vm4224_vm5, %v4165_v28 }
 0x36b   : > { %4464 = vst.msk [vmem:[#allocation3 + $0xde] sm:$0xfc] %vm4419_vm7, %v4360_v19  ;;  %4833 = vrot.lane.b32.xlu1 %v8975_v60, %s8014_s18 }
 0x36c   : > { %4835 = vrot.lane.b32.xlu0 %v8983_v61, %s8014_s18 }
 0x36d   : > { %v4169_v29 = vpop.permute.xlu1 %4168 }
 0x36e   : > { %v4525_v2 = vpop.permute.xlu0 %4524  ;;  %4271 = vst.msk [vmem:[#allocation3 + $0xef] sm:$0x1] %vm11090_vm1, %v4169_v29  ;;  %vm11093_vm1 = vcmask 319744  }
 0x36f   : > { %4595 = vst.msk [vmem:[#allocation3 + $0xd0] sm:$0xff] %vm4568_vm14, %v4525_v2  ;;  %4837 = vrot.lane.b32.xlu1 %v9349_v25, %s8014_s18 }
 0x370   : > { %5353 = vrot.lane.b32.xlu0 %v9349_v25, %s8017_s29 }
 0x371   : > { %v4681_v27 = vpop.permute.xlu1 %4680 }
 0x372   : > { %v4167_v24 = vpop.permute.xlu0 %4166  ;;  %4788 = vst.msk [vmem:[#allocation3 + $0xcf] sm:$0xfe] %vm4746_vm15, %v4681_v27 }
 0x373   : > { %4270 = vst.msk [vmem:[#allocation3 + $0xe7] sm:$0xff] %vm4226_vm6, %v4167_v24  ;;  %5018 = vrot.lane.b32.xlu1 %v9002_v6, %s8015_s19 }
 0x374   : > { %4466 = vst.msk [vmem:[#allocation3 + $0xee] sm:$0x3] %vm11091_vm4, %v4364_v55  ;;  %5020 = vrot.lane.b32.xlu0 %v9016_v14, %s8015_s19  ;;  %vm11094_vm4 = vcmask 326912  }
 0x375   : > { %v4685_v60 = vpop.permute.xlu1 %4684 }
 0x376   : > { %v4683_v61 = vpop.permute.xlu0 %4682 }
 0x377   : > { %5160 = vrot.lane.b32.xlu1 %v9002_v6, %s8016_s22 }
 0x378   : > { %5162 = vrot.lane.b32.xlu0 %v9016_v14, %s8016_s22 }
 0x379   : > { %v4362_v25 = vpop.permute.xlu1 %4361 }
 0x37a   : > { %v4171_v8 = vpop.permute.xlu0 %4170  ;;  %4465 = vst.msk [vmem:[#allocation3 + $0xe6] sm:$0xff] %vm11092_vm3, %v4362_v25 }
 0x37b   : > { %4272 = vst.msk [vmem:[#allocation3 + $0xef] sm:$0xfe] %vm4224_vm5, %v4171_v8  ;;  %5164 = vrot.lane.b32.xlu1 %v9376_v39, %s8016_s22  ;;  %vm11095_vm5 = vcmask 122944  }
 0x37c   : > { %5355 = vrot.lane.b32.xlu0 %v9002_v6, %s8017_s29 }
 0x37d   : > { %v4527_v38 = vpop.permute.xlu1 %4526 }
 0x37e   : > { %v4529_v51 = vpop.permute.xlu0 %4528  ;;  %4596 = vst.msk [vmem:[#allocation3 + $0xd8] sm:$0xff] %vm4568_vm14, %v4527_v38 }
 0x37f   : > { %4597 = vst.msk [vmem:[#allocation3 + $0xe0] sm:$0xff] %vm4568_vm14, %v4529_v51  ;;  %5357 = vrot.lane.b32.xlu1 %v9016_v14, %s8017_s29 }
 0x380   : > { %4790 = vst.msk [vmem:[#allocation3 + $0xdf] sm:$0x1] %vm11093_vm1, %v4685_v60  ;;  %4839 = vrot.lane.b32.xlu0 %v9002_v6, %s8014_s18 }
 0x381   : > { %4789 = vst.msk [vmem:[#allocation3 + $0xd7] sm:$0xff] %vm11094_vm4, %v4683_v61  ;;  %v4366_v53 = vpop.permute.xlu1 %4365 }
 0x382   : > { %v4687_v18 = vpop.permute.xlu0 %4686  ;;  %4467 = vst.msk [vmem:[#allocation3 + $0xee] sm:$0xfc] %vm4419_vm7, %v4366_v53  ;;  %vm11096_vm7 = vcmask 189568  }
 0x383   : > { %4791 = vst.msk [vmem:[#allocation3 + $0xdf] sm:$0xfe] %vm4746_vm15, %v4687_v18  ;;  %4841 = vrot.lane.b32.xlu1 %v9016_v14, %s8014_s18 }
 0x384   : > { %4843 = vrot.lane.b32.xlu0 %v9376_v39, %s8014_s18 }
 0x385   : > { %v4370_v47 = vpop.permute.xlu1 %4369 }
 0x386   : > { %v4175_v35 = vpop.permute.xlu0 %4174 }
 0x387   : > { %4274 = vst.msk [vmem:[#allocation3 + $0xff] sm:$0x1] %vm11095_vm5, %v4175_v35  ;;  %5359 = vrot.lane.b32.xlu1 %v9376_v39, %s8017_s29  ;;  %vm11098_vm5 = vcmask 589314  }
 0x388   : > { %5022 = vrot.lane.b32.xlu0 %v9038_v26, %s8015_s19 }
 0x389   : > { %v4173_v6 = vpop.permute.xlu1 %4172 }
 0x38a   : > { %v4691_v56 = vpop.permute.xlu0 %4690  ;;  %4273 = vst.msk [vmem:[#allocation3 + $0xf7] sm:$0xff] %vm4226_vm6, %v4173_v6  ;;  %vm11097_vm6 = vmmov %vm11093_vm1 }
 0x38b   : > { %4469 = vst.msk [vmem:[#allocation3 + $0xfe] sm:$0x3] %vm11096_vm7, %v4370_v47  ;;  %5024 = vrot.lane.b32.xlu1 %v9052_v34, %s8015_s19  ;;  %vm11099_vm7 = vmmov %vm11094_vm4 }
 0x38c   : > { %5166 = vrot.lane.b32.xlu0 %v9038_v26, %s8016_s22 }
 0x38d   : > { %v4531_v14 = vpop.permute.xlu1 %4530 }
 0x38e   : > { %v4368_v63 = vpop.permute.xlu0 %4367  ;;  %4598 = vst.msk [vmem:[#allocation3 + $0xe8] sm:$0xff] %vm4568_vm14, %v4531_v14 }
 0x38f   : > { %4468 = vst.msk [vmem:[#allocation3 + $0xf6] sm:$0xff] %vm11092_vm3, %v4368_v63  ;;  %5168 = vrot.lane.b32.xlu1 %v9052_v34, %s8016_s22  ;;  %vm11100_vm3 = vcmask 392514  }
 0x390   : > { %4793 = vst.msk [vmem:[#allocation3 + $0xef] sm:$0x1] %vm11093_vm1, %v4691_v56  ;;  %5170 = vrot.lane.b32.xlu0 %v9426_v49, %s8016_s22  ;;  %vm11102_vm1 = vcmask 523713  }
 0x391   : > { %4600 = vst.msk [vmem:[#allocation3 + $0xf8] sm:$0xff] %vm4568_vm14, %v9164_v16  ;;  %v4689_v39 = vpop.permute.xlu1 %4688 }
 0x392   : > { %4796 = vst.msk [vmem:[#allocation3 + $0xff] sm:$0x1] %vm11097_vm6, %v9153_v44  ;;  %v5332_v23 = vpop.permute.xlu0 %5331  ;;  %vm11103_vm6 = vmmov %vm11098_vm5 }
 0x393   : > { %4792 = vst.msk [vmem:[#allocation3 + $0xe7] sm:$0xff] %vm11094_vm4, %v4689_v39  ;;  %5361 = vrot.lane.b32.xlu1 %v9038_v26, %s8017_s29  ;;  %vm11104_vm4 = vmmov %vm11100_vm3 }
 0x394   : > { %5472 = vst.msk [vmem:[#allocation3 + $0x1e] sm:$0xfc] %vm11098_vm5, %v5332_v23  ;;  %5363 = vrot.lane.b32.xlu0 %v9052_v34, %s8017_s29 }
 0x395   : > { %v5334_v21 = vpop.permute.xlu1 %5333 }
 0x396   : > { %v4533_v16 = vpop.permute.xlu0 %4532  ;;  %5473 = vst.msk [vmem:[#allocation3 + $0x26] sm:$0xff] %vm5465_vm9, %v5334_v21 }
 0x397   : > { %4599 = vst.msk [vmem:[#allocation3 + $0xf0] sm:$0xff] %vm4568_vm14, %v4533_v16  ;;  %4845 = vrot.lane.b32.xlu1 %v9038_v26, %s8014_s18 }
 0x398   : > { %4795 = vst.msk [vmem:[#allocation3 + $0xf7] sm:$0xff] %vm11099_vm7, %v9184_v22  ;;  %4847 = vrot.lane.b32.xlu0 %v9052_v34, %s8014_s18  ;;  %vm11106_vm7 = vmmov %vm11102_vm1 }
 0x399   : > { %v4693_v44 = vpop.permute.xlu1 %4692 }
 0x39a   : > { %v4816_v15 = vpop.permute.xlu0 %4815  ;;  %4794 = vst.msk [vmem:[#allocation3 + $0xef] sm:$0xfe] %vm4746_vm15, %v4693_v44  ;;  %vm11101_vm15 = vcmask 583168  }
 0x39b   : > { %4953 = vst.msk [vmem:[#allocation3 + $0x2e] sm:$0xfc] %vm11100_vm3, %v4816_v15  ;;  %4849 = vrot.lane.b32.xlu1 %v9426_v49, %s8014_s18  ;;  %vm11105_vm5 = vmmov %vm11101_vm15 }
 0x39c   : > { %5365 = vrot.lane.b32.xlu0 %v9426_v49, %s8017_s29  ;;  %vm11107_vm3 = vmmov %vm11103_vm6 }
 0x39d   : > { %v4818_v46 = vpop.permute.xlu1 %4817  ;;  %v5518_v26 = vld [vmem:[#allocation3 + $0x20] sm:$0xff] }
 0x39e   : > { %v4820_v17 = vpop.permute.xlu0 %4819  ;;  %4954 = vst.msk [vmem:[#allocation3 + $0x36] sm:$0xff] %vm4943_vm0, %v4818_v46  ;;  %7664 = vmatprep.mubr.msk.f32.mxu1 %vm5562_vm10, %v5518_v26 }
 0x39f   : > { %4955 = vst.msk [vmem:[#allocation3 + $0x3e] sm:$0x3] %vm4945_vm2, %v4820_v17  ;;  %5026 = vrot.lane.b32.xlu1 %v9076_v12, %s8015_s19 }
 0x3a0   : > { %5028 = vrot.lane.b32.xlu0 %v9080_v54, %s8015_s19 }
 0x3a1   : > { %v5336_v34 = vpop.permute.xlu1 %5335 }
 0x3a2   : > { %v5007_v22 = vpop.permute.xlu0 %5006  ;;  %5474 = vst.msk [vmem:[#allocation3 + $0x2e] sm:$0x3] %vm11101_vm15, %v5336_v34  ;;  %vm11108_vm15 = vmmov %vm11104_vm4 }
 0x3a3   : > { %5097 = vst.msk [vmem:[#allocation3 + $0x30] sm:$0xff] %vm5090_vm13, %v5007_v22  ;;  %5172 = vrot.lane.b32.xlu1 %v9076_v12, %s8016_s22 }
 0x3a4   : > { %5174 = vrot.lane.b32.xlu0 %v9080_v54, %s8016_s22 }
 0x3a5   : > { %v5009_v49 = vpop.permute.xlu1 %5008 }
 0x3a6   : > { %v5143_v58 = vpop.permute.xlu0 %5142  ;;  %5098 = vst.msk [vmem:[#allocation3 + $0x38] sm:$0xff] %vm5090_vm13, %v5009_v49 }
 0x3a7   : > { %5280 = vst.msk [vmem:[#allocation3 + $0x2f] sm:$0xfe] %vm11102_vm1, %v5143_v58  ;;  %5176 = vrot.lane.b32.xlu1 %v9455_v13, %s8016_s22  ;;  %vm11109_vm1 = vmmov %vm11105_vm5 }
 0x3a8   : > { %5367 = vrot.lane.b32.xlu0 %v9076_v12, %s8017_s29 }
 0x3a9   : > { %v5145_v48 = vpop.permute.xlu1 %5144  ;;  %v5519_v31 = vld [vmem:[#allocation3 + $0x28] sm:$0xff] }
 0x3aa   : > { %v5147_v19 = vpop.permute.xlu0 %5146  ;;  %5281 = vst.msk [vmem:[#allocation3 + $0x37] sm:$0xff] %vm5270_vm11, %v5145_v48  ;;  %7665 = vmatmul.mubr.msk.f32.gmra.mrb[12].mxu1 %vm5562_vm10, %v5519_v31 }
 0x3ab   : > { %5282 = vst.msk [vmem:[#allocation3 + $0x3f] sm:$0x1] %vm5272_vm8, %v5147_v19  ;;  %5369 = vrot.lane.b32.xlu1 %v9080_v54, %s8017_s29 }
 0x3ac   : > { %4851 = vrot.lane.b32.xlu0 %v9076_v12, %s8014_s18 }
 0x3ad   : > { %v5338_v28 = vpop.permute.xlu1 %5337 }
 0x3ae   : > { %v5340_v55 = vpop.permute.xlu0 %5339  ;;  %5475 = vst.msk [vmem:[#allocation3 + $0x2e] sm:$0xfc] %vm11103_vm6, %v5338_v28  ;;  %vm11110_vm6 = vmmov %vm11106_vm7 }
 0x3af   : > { %5476 = vst.msk [vmem:[#allocation3 + $0x36] sm:$0xff] %vm5465_vm9, %v5340_v55  ;;  %4853 = vrot.lane.b32.xlu1 %v9080_v54, %s8014_s18 }
 0x3b0   : > { %4855 = vrot.lane.b32.xlu0 %v9455_v13, %s8014_s18 }
 0x3b1   : > { %v4822_v29 = vpop.permute.xlu1 %4821 }
 0x3b2   : > { %v4824_v2 = vpop.permute.xlu0 %4823  ;;  %4956 = vst.msk [vmem:[#allocation3 + $0x3e] sm:$0xfc] %vm11104_vm4, %v4822_v29  ;;  %vm11111_vm4 = vmmov %vm11107_vm3 }
 0x3b3   : > { %4957 = vst.msk [vmem:[#allocation3 + $0x46] sm:$0xff] %vm4943_vm0, %v4824_v2  ;;  %5371 = vrot.lane.b32.xlu1 %v9455_v13, %s8017_s29  ;;  %v6414_v2 = vld [vmem:[%s10990_s5] sm:$0xf] }
 0x3b4   : > { %5030 = vrot.lane.b32.xlu0 %v9094_v62, %s8015_s19 }
 0x3b5   : > { %v4826_v12 = vpop.permute.xlu1 %4825 }
 0x3b6   : > { %v5342_v27 = vpop.permute.xlu0 %5341  ;;  %4958 = vst.msk [vmem:[#allocation3 + $0x4e] sm:$0x3] %vm4945_vm2, %v4826_v12  ;;  %v5520_v54 = vld [vmem:[#allocation3 + $0x30] sm:$0xff] }
 0x3b7   : > { %5477 = vst.msk [vmem:[#allocation3 + $0x3e] sm:$0x3] %vm11105_vm5, %v5342_v27  ;;  %7667 = vmatprep.mubr.msk.f32.mxu1 %vm5562_vm10, %v5520_v54  ;;  %5032 = vrot.lane.b32.xlu1 %v9102_v30, %s8015_s19  ;;  %vm11112_vm5 = vmmov %vm11108_vm15 }
 0x3b8   : > { %5178 = vrot.lane.b32.xlu0 %v9094_v62, %s8016_s22 }
 0x3b9   : > { %v5011_v24 = vpop.permute.xlu1 %5010 }
 0x3ba   : > { %v5013_v13 = vpop.permute.xlu0 %5012  ;;  %5099 = vst.msk [vmem:[#allocation3 + $0x40] sm:$0xff] %vm5090_vm13, %v5011_v24 }
 0x3bb   : > { %5100 = vst.msk [vmem:[#allocation3 + $0x48] sm:$0xff] %vm5090_vm13, %v5013_v13  ;;  %5180 = vrot.lane.b32.xlu1 %v9102_v30, %s8016_s22 }
 0x3bc   : > { %5182 = vrot.lane.b32.xlu0 %v9502_v9, %s8016_s22 }
 0x3bd   : > { %v5149_v60 = vpop.permute.xlu1 %5148 }
 0x3be   : > { %v5151_v61 = vpop.permute.xlu0 %5150  ;;  %5283 = vst.msk [vmem:[#allocation3 + $0x3f] sm:$0xfe] %vm11106_vm7, %v5149_v60  ;;  %v5521_v25 = vld [vmem:[#allocation3 + $0x38] sm:$0xff]  ;;  %vm11113_vm7 = vmmov %vm11109_vm1 }
 0x3bf   : > { %5284 = vst.msk [vmem:[#allocation3 + $0x47] sm:$0xff] %vm5270_vm11, %v5151_v61  ;;  %7668 = vmatmul.mubr.msk.f32.gmra.mrb[14].mxu1 %vm5562_vm10, %v5521_v25  ;;  %5373 = vrot.lane.b32.xlu1 %v9094_v62, %s8017_s29 }
 0x3c0   : > { %5375 = vrot.lane.b32.xlu0 %v9102_v30, %s8017_s29 }
 0x3c1   : > { %v5153_v8 = vpop.permute.xlu1 %5152 }
 0x3c2   : > { %v5344_v38 = vpop.permute.xlu0 %5343  ;;  %5285 = vst.msk [vmem:[#allocation3 + $0x4f] sm:$0x1] %vm5272_vm8, %v5153_v8 }
 0x3c3   : > { %5478 = vst.msk [vmem:[#allocation3 + $0x3e] sm:$0xfc] %vm11107_vm3, %v5344_v38  ;;  %4857 = vrot.lane.b32.xlu1 %v9094_v62, %s8014_s18  ;;  %vm11114_vm3 = vmmov %vm11110_vm6 }
 0x3c4   : > { %4859 = vrot.lane.b32.xlu0 %v9102_v30, %s8014_s18 }
 0x3c5   : > { %v5346_v51 = vpop.permute.xlu1 %5345 }
 0x3c6   : > { %v4828_v53 = vpop.permute.xlu0 %4827  ;;  %5479 = vst.msk [vmem:[#allocation3 + $0x46] sm:$0xff] %vm5465_vm9, %v5346_v51 }
 0x3c7   : > { %4959 = vst.msk [vmem:[#allocation3 + $0x4e] sm:$0xfc] %vm11108_vm15, %v4828_v53  ;;  %4861 = vrot.lane.b32.xlu1 %v9502_v9, %s8014_s18  ;;  %vm11115_vm15 = vmmov %vm11111_vm4 }
 0x3c8   : > { %5377 = vrot.lane.b32.xlu0 %v9502_v9, %s8017_s29 }
 0x3c9   : > { %v4830_v18 = vpop.permute.xlu1 %4829 }
 0x3ca   : > { %v4832_v47 = vpop.permute.xlu0 %4831  ;;  %4960 = vst.msk [vmem:[#allocation3 + $0x56] sm:$0xff] %vm4943_vm0, %v4830_v18 }
 0x3cb   : > { %4961 = vst.msk [vmem:[#allocation3 + $0x5e] sm:$0x3] %vm4945_vm2, %v4832_v47  ;;  %5034 = vrot.lane.b32.xlu1 %v9116_v3, %s8015_s19 }
 0x3cc   : > { %5036 = vrot.lane.b32.xlu0 %v9124_v4, %s8015_s19 }
 0x3cd   : > { %v5348_v62 = vpop.permute.xlu1 %5347  ;;  %v5522_v30 = vld [vmem:[#allocation3 + $0x40] sm:$0xff] }
 0x3ce   : > { %v5015_v35 = vpop.permute.xlu0 %5014  ;;  %5480 = vst.msk [vmem:[#allocation3 + $0x4e] sm:$0x3] %vm11109_vm1, %v5348_v62  ;;  %7670 = vmatprep.mubr.msk.f32.mxu1 %vm5562_vm10, %v5522_v30  ;;  %vm11116_vm1 = vmmov %vm11112_vm5 }
 0x3cf   : > { %5101 = vst.msk [vmem:[#allocation3 + $0x50] sm:$0xff] %vm5090_vm13, %v5015_v35  ;;  %5184 = vrot.lane.b32.xlu1 %v9116_v3, %s8016_s22 }
 0x3d0   : > { %5186 = vrot.lane.b32.xlu0 %v9124_v4, %s8016_s22 }
 0x3d1   : > { %v5017_v9 = vpop.permute.xlu1 %5016 }
 0x3d2   : > { %v5155_v6 = vpop.permute.xlu0 %5154  ;;  %5102 = vst.msk [vmem:[#allocation3 + $0x58] sm:$0xff] %vm5090_vm13, %v5017_v9 }
 0x3d3   : > { %5286 = vst.msk [vmem:[#allocation3 + $0x4f] sm:$0xfe] %vm11110_vm6, %v5155_v6  ;;  %5188 = vrot.lane.b32.xlu1 %v9531_v43, %s8016_s22  ;;  %vm11117_vm6 = vmmov %vm11113_vm7 }
 0x3d4   : > { %5379 = vrot.lane.b32.xlu0 %v9116_v3, %s8017_s29 }
 0x3d5   : > { %v5157_v56 = vpop.permute.xlu1 %5156  ;;  %v5523_v14 = vld [vmem:[#allocation3 + $0x48] sm:$0xff] }
 0x3d6   : > { %v5159_v63 = vpop.permute.xlu0 %5158  ;;  %5287 = vst.msk [vmem:[#allocation3 + $0x57] sm:$0xff] %vm5270_vm11, %v5157_v56  ;;  %7671 = vmatmul.mubr.msk.f32.gmra.mrb[16].mxu1 %vm5562_vm10, %v5523_v14 }
 0x3d7   : > { %5288 = vst.msk [vmem:[#allocation3 + $0x5f] sm:$0x1] %vm5272_vm8, %v5159_v63  ;;  %5381 = vrot.lane.b32.xlu1 %v9124_v4, %s8017_s29 }
 0x3d8   : > { %4863 = vrot.lane.b32.xlu0 %v9116_v3, %s8014_s18 }
 0x3d9   : > { %v5350_v39 = vpop.permute.xlu1 %5349 }
 0x3da   : > { %v5352_v23 = vpop.permute.xlu0 %5351  ;;  %5481 = vst.msk [vmem:[#allocation3 + $0x4e] sm:$0xfc] %vm11111_vm4, %v5350_v39  ;;  %vm11118_vm4 = vmmov %vm11114_vm3  ;;  %v7877_v39 = vld [vmem:[#allocation2 + $0x28] sm:$0x3] }
 0x3db   : > { %5482 = vst.msk [vmem:[#allocation3 + $0x56] sm:$0xff] %vm5465_vm9, %v5352_v23  ;;  %4865 = vrot.lane.b32.xlu1 %v9124_v4, %s8014_s18  ;;  %v5921_v23 = vsel %vm412_vm12, -inf, %v7877_v39 }
 0x3dc   : > { %4867 = vrot.lane.b32.xlu0 %v9531_v43, %s8014_s18 }
 0x3dd   : > { %v4834_v21 = vpop.permute.xlu1 %4833 }
 0x3de   : > { %v4836_v16 = vpop.permute.xlu0 %4835  ;;  %4962 = vst.msk [vmem:[#allocation3 + $0x5e] sm:$0xfc] %vm11112_vm5, %v4834_v21  ;;  %vm11119_vm5 = vcmask 1043456  }
 0x3df   : > { %4963 = vst.msk [vmem:[#allocation3 + $0x66] sm:$0xff] %vm4943_vm0, %v4836_v16  ;;  %5383 = vrot.lane.b32.xlu1 %v9531_v43, %s8017_s29  ;;  %7706 = vmatprep.subr.msk.mxu1 %vm11119_vm5, %v6414_v2  ;;  %v7878_v16 = vld [vmem:[#allocation2 + $0x40] sm:$0x3] }
 0x3e0   : > { %5038 = vrot.lane.b32.xlu0 %v9139_v11, %s8015_s19 }
 0x3e1   : > { %v4838_v3 = vpop.permute.xlu1 %4837 }
 0x3e2   : > { %v5354_v44 = vpop.permute.xlu0 %5353  ;;  %4964 = vst.msk [vmem:[#allocation3 + $0x6e] sm:$0x3] %vm4945_vm2, %v4838_v3  ;;  %v5524_v4 = vld [vmem:[#allocation3 + $0x50] sm:$0xff]  ;;  %v5924_v3 = vsel %vm412_vm12, -inf, %v7878_v16 }
 0x3e3   : > { %5483 = vst.msk [vmem:[#allocation3 + $0x5e] sm:$0x3] %vm11113_vm7, %v5354_v44  ;;  %7673 = vmatprep.mubr.msk.f32.mxu1 %vm5562_vm10, %v5524_v4  ;;  %5040 = vrot.lane.b32.xlu1 %v9145_v40, %s8015_s19  ;;  %vm11120_vm7 = vmmov %vm11119_vm5 }
 0x3e4   : > { %5190 = vrot.lane.b32.xlu0 %v9139_v11, %s8016_s22  ;;  %7707 = vmatpush3.msk.msra.mxu1 %vm11120_vm7, %v6414_v2 }
 0x3e5   : > { %v5019_v15 = vpop.permute.xlu1 %5018 }
 0x3e6   : > { %v5021_v43 = vpop.permute.xlu0 %5020  ;;  %5103 = vst.msk [vmem:[#allocation3 + $0x60] sm:$0xff] %vm5090_vm13, %v5019_v15  ;;  %v10138_v15 = vld [vmem:[#allocation2 + $0x20] sm:$0xff] }
 0x3e7   : > { %5104 = vst.msk [vmem:[#allocation3 + $0x68] sm:$0xff] %vm5090_vm13, %v5021_v43  ;;  %5192 = vrot.lane.b32.xlu1 %v9145_v40, %s8016_s22  ;;  %v6031_v43 = vrot.slane %v10138_v15, 1 }
 0x3e8   : > { %5194 = vrot.lane.b32.xlu0 %v9578_v32, %s8016_s22 }
 0x3e9   : > { %v5161_v46 = vpop.permute.xlu1 %5160 }
 0x3ea   : > { %v5163_v26 = vpop.permute.xlu0 %5162  ;;  %5289 = vst.msk [vmem:[#allocation3 + $0x5f] sm:$0xfe] %vm11114_vm3, %v5161_v46  ;;  %v5525_v17 = vld [vmem:[#allocation3 + $0x58] sm:$0xff]  ;;  %vm11121_vm3 = vmmov %vm11115_vm15  ;;  %v6038_v46 = vrot.slane %v5924_v3, 1 }
 0x3eb   : > { %5290 = vst.msk [vmem:[#allocation3 + $0x67] sm:$0xff] %vm5270_vm11, %v5163_v26  ;;  %7674 = vmatmul.mubr.msk.f32.gmra.mrb[18].mxu1 %vm5562_vm10, %v5525_v17  ;;  %5385 = vrot.lane.b32.xlu1 %v9139_v11, %s8017_s29  ;;  %v6201_v26 = vrot.slane %v5924_v3, 2  ;;  %v10146_v17 = vld [vmem:[#allocation2 + $0x38] sm:$0xff] }
 0x3ec   : > { %5387 = vrot.lane.b32.xlu0 %v9145_v40, %s8017_s29 }
 0x3ed   : > { %v5165_v34 = vpop.permute.xlu1 %5164 }
 0x3ee   : > { %v5356_v22 = vpop.permute.xlu0 %5355  ;;  %5291 = vst.msk [vmem:[#allocation3 + $0x6f] sm:$0x1] %vm5272_vm8, %v5165_v34  ;;  %v6036_v34 = vrot.slane %v10146_v17, 1 }
 0x3ef   : > { %5484 = vst.msk [vmem:[#allocation3 + $0x5e] sm:$0xfc] %vm11115_vm15, %v5356_v22  ;;  %4869 = vrot.lane.b32.xlu1 %v9139_v11, %s8014_s18  ;;  %vm11122_vm15 = vmmov %vm11116_vm1  ;;  %v7881_v22 = vld [vmem:[#allocation2 + $0x58] sm:$0x3] }
 0x3f0   : > { %4871 = vrot.lane.b32.xlu0 %v9145_v40, %s8014_s18  ;;  %vm11126_vm5 = vmmov %vm11122_vm15 }
 0x3f1   : > { %v5358_v49 = vpop.permute.xlu1 %5357 }
 0x3f2   : > { %v4840_v58 = vpop.permute.xlu0 %4839  ;;  %5485 = vst.msk [vmem:[#allocation3 + $0x66] sm:$0xff] %vm5465_vm9, %v5358_v49  ;;  %v5927_v49 = vsel %vm412_vm12, -inf, %v7881_v22  ;;  %v7886_v22 = vld [vmem:[#allocation2 + $0xa0] sm:$0x3] }
 0x3f3   : > { %4965 = vst.msk [vmem:[#allocation3 + $0x6e] sm:$0xfc] %vm11116_vm1, %v4840_v58  ;;  %4873 = vrot.lane.b32.xlu1 %v9578_v32, %s8014_s18  ;;  %vm11123_vm1 = vmmov %vm11117_vm6  ;;  %v6043_v2 = vrot.slane %v5927_v49, 1 }
 0x3f4   : > { %5389 = vrot.lane.b32.xlu0 %v9578_v32, %s8017_s29  ;;  %vm11127_vm7 = vmmov %vm11123_vm1 }
 0x3f5   : > { %v4842_v48 = vpop.permute.xlu1 %4841 }
 0x3f6   : > { %v4844_v31 = vpop.permute.xlu0 %4843  ;;  %4966 = vst.msk [vmem:[#allocation3 + $0x76] sm:$0xff] %vm4943_vm0, %v4842_v48  ;;  %v8018_v48 = vmov -inf  }
 0x3f7   : > { %4967 = vst.msk [vmem:[#allocation3 + $0x7e] sm:$0x3] %vm4945_vm2, %v4844_v31  ;;  %5042 = vrot.lane.b32.xlu1 %v9173_v20, %s8015_s19  ;;  %v6025_v31 = vrot.slane %v8018_v48, 1 }
 0x3f8   : > { %5044 = vrot.lane.b32.xlu0 %v9219_v36, %s8015_s19 }
 0x3f9   : > { %v5360_v11 = vpop.permute.xlu1 %5359  ;;  %v5526_v40 = vld [vmem:[#allocation3 + $0x60] sm:$0xff] }
 0x3fa   : > { %v5023_v19 = vpop.permute.xlu0 %5022  ;;  %5486 = vst.msk [vmem:[#allocation3 + $0x6e] sm:$0x3] %vm11117_vm6, %v5360_v11  ;;  %7676 = vmatprep.mubr.msk.f32.mxu1 %vm5562_vm10, %v5526_v40  ;;  %vm11124_vm6 = vmmov %vm11118_vm4  ;;  %v10157_v11 = vld [vmem:[%s10989_s4] ss:$0 sm:$0xff] }
 0x3fb   : > { %5105 = vst.msk [vmem:[#allocation3 + $0x70] sm:$0xff] %vm5090_vm13, %v5023_v19  ;;  %5196 = vrot.lane.b32.xlu1 %v9173_v20, %s8016_s22 }
 0x3fc   : > { %5198 = vrot.lane.b32.xlu0 %v9219_v36, %s8016_s22 }
 0x3fd   : > { %v5025_v32 = vpop.permute.xlu1 %5024 }
 0x3fe   : > { %v5167_v28 = vpop.permute.xlu0 %5166  ;;  %5106 = vst.msk [vmem:[#allocation3 + $0x78] sm:$0xff] %vm5090_vm13, %v5025_v32  ;;  %v6188_v32 = vrot.slane %v8018_v48, 2 }
 0x3ff   : > { %5292 = vst.msk [vmem:[#allocation3 + $0x6f] sm:$0xfe] %vm11118_vm4, %v5167_v28  ;;  %5200 = vrot.lane.b32.xlu1 %v9607_v33, %s8016_s22  ;;  %vm11125_vm4 = vmmov %vm11121_vm3  ;;  %v6194_v28 = vrot.slane %v10138_v15, 2 }
 0x400   : > { %5391 = vrot.lane.b32.xlu0 %v9173_v20, %s8017_s29 }
 0x401   : > { %v5169_v55 = vpop.permute.xlu1 %5168  ;;  %v5527_v29 = vld [vmem:[#allocation3 + $0x68] sm:$0xff] }
 0x402   : > { %v5171_v12 = vpop.permute.xlu0 %5170  ;;  %5293 = vst.msk [vmem:[#allocation3 + $0x77] sm:$0xff] %vm5270_vm11, %v5169_v55  ;;  %7677 = vmatmul.mubr.msk.f32.gmra.mrb[20].mxu1 %vm5562_vm10, %v5527_v29  ;;  %v6199_v29 = vrot.slane %v10146_v17, 2 }
 0x403   : > { %5294 = vst.msk [vmem:[#allocation3 + $0x7f] sm:$0x1] %vm5272_vm8, %v5171_v12  ;;  %5393 = vrot.lane.b32.xlu1 %v9219_v36, %s8017_s29 }
 0x404   : > { %4875 = vrot.lane.b32.xlu0 %v9173_v20, %s8014_s18 }
 0x405   : > { %v5362_v27 = vpop.permute.xlu1 %5361 }
 0x406   : > { %v5364_v54 = vpop.permute.xlu0 %5363  ;;  %5487 = vst.msk [vmem:[#allocation3 + $0x6e] sm:$0xfc] %vm11121_vm3, %v5362_v27  ;;  %vm11128_vm3 = vmmov %vm11124_vm6  ;;  %v10174_v27 = vmax.f32 %v6025_v31, %v6188_v32 }
 0x407   : > { %5488 = vst.msk [vmem:[#allocation3 + $0x76] sm:$0xff] %vm5465_vm9, %v5364_v54  ;;  %4877 = vrot.lane.b32.xlu1 %v9219_v36, %s8014_s18 }
 0x408   : > { %4879 = vrot.lane.b32.xlu0 %v9607_v33, %s8014_s18 }
 0x409   : > { %v4846_v24 = vpop.permute.xlu1 %4845 }
 0x40a   : > { %v4848_v13 = vpop.permute.xlu0 %4847  ;;  %4968 = vst.msk [vmem:[#allocation3 + $0x7e] sm:$0xfc] %vm11122_vm15, %v4846_v24  ;;  %vm11129_vm15 = vmmov %vm11125_vm4  ;;  %v7882_v24 = vld [vmem:[#allocation2 + $0x70] sm:$0x3] }
 0x40b   : > { %4969 = vst.msk [vmem:[#allocation3 + $0x86] sm:$0xff] %vm4943_vm0, %v4848_v13  ;;  %5395 = vrot.lane.b32.xlu1 %v9607_v33, %s8017_s29  ;;  %v5930_v13 = vsel %vm412_vm12, -inf, %v7882_v24 }
 0x40c   : > { %5046 = vrot.lane.b32.xlu0 %v9231_v42, %s8015_s19 }
 0x40d   : > { %v4850_v20 = vpop.permute.xlu1 %4849 }
 0x40e   : > { %v5366_v60 = vpop.permute.xlu0 %5365  ;;  %4970 = vst.msk [vmem:[#allocation3 + $0x8e] sm:$0x3] %vm4945_vm2, %v4850_v20  ;;  %v5528_v36 = vld [vmem:[#allocation3 + $0x70] sm:$0xff]  ;;  %v5726_v20 = vadd.f32 %v10157_v11, %v9706_v0 }
 0x40f   : > { %5489 = vst.msk [vmem:[#allocation3 + $0x7e] sm:$0x3] %vm11123_vm1, %v5366_v60  ;;  %7679 = vmatprep.mubr.msk.f32.mxu1 %vm5562_vm10, %v5528_v36  ;;  %5048 = vrot.lane.b32.xlu1 %v9316_v50, %s8015_s19  ;;  %vm11130_vm1 = vmmov %vm11126_vm5 }
 0x410   : > { %5202 = vrot.lane.b32.xlu0 %v9231_v42, %s8016_s22 }
 0x411   : > { %v5027_v61 = vpop.permute.xlu1 %5026 }
 0x412   : > { %v5029_v33 = vpop.permute.xlu0 %5028  ;;  %5107 = vst.msk [vmem:[#allocation3 + $0x80] sm:$0xff] %vm5090_vm13, %v5027_v61 }
 0x413   : > { %5108 = vst.msk [vmem:[#allocation3 + $0x88] sm:$0xff] %vm5090_vm13, %v5029_v33  ;;  %5204 = vrot.lane.b32.xlu1 %v9316_v50, %s8016_s22  ;;  %v6206_v33 = vrot.slane %v5927_v49, 2  ;;  %v5936_v49 = vsel %vm412_vm12, -inf, %v7886_v22 }
 0x414   : > { %5206 = vrot.lane.b32.xlu0 %v9654_v41, %s8016_s22  ;;  %v6058_v24 = vrot.slane %v5936_v49, 1 }
 0x415   : > { %v5173_v25 = vpop.permute.xlu1 %5172 }
 0x416   : > { %v5175_v8 = vpop.permute.xlu0 %5174  ;;  %5295 = vst.msk [vmem:[#allocation3 + $0x7f] sm:$0xfe] %vm11124_vm6, %v5173_v25  ;;  %v5529_v38 = vld [vmem:[#allocation3 + $0x78] sm:$0xff]  ;;  %vm6024_vm6 = vcmask 1046528   ;;  %v5731_v25 = vadd.f32 %v9700_v10, %v10157_v11 }
 0x417   : > { %5296 = vst.msk [vmem:[#allocation3 + $0x87] sm:$0xff] %vm5270_vm11, %v5175_v8  ;;  %7680 = vmatmul.mubr.msk.f32.gmra.mrb[22].mxu1 %vm5562_vm10, %v5529_v38  ;;  %5397 = vrot.lane.b32.xlu1 %v9231_v42, %s8017_s29  ;;  %v6039_v55 = vsel %vm6024_vm6, %v6036_v34, %v6038_v46 }
 0x418   : > { %5399 = vrot.lane.b32.xlu0 %v9316_v50, %s8017_s29  ;;  %v6156_v61 = vmax.f32 %v10146_v17, %v6039_v55 }
 0x419   : > { %v5177_v51 = vpop.permute.xlu1 %5176 }
 0x41a   : > { %v5368_v53 = vpop.permute.xlu0 %5367  ;;  %5297 = vst.msk [vmem:[#allocation3 + $0x8f] sm:$0x1] %vm5272_vm8, %v5177_v51  ;;  %v10188_v51 = vld [vmem:[#allocation2 + $0x50] sm:$0xff] }
 0x41b   : > { %5490 = vst.msk [vmem:[#allocation3 + $0x7e] sm:$0xfc] %vm11125_vm4, %v5368_v53  ;;  %4881 = vrot.lane.b32.xlu1 %v9231_v42, %s8014_s18  ;;  %vm6187_vm4 = vcmask 1045504   ;;  %v6041_v53 = vrot.slane %v10188_v51, 1 }
 0x41c   : > { %4883 = vrot.lane.b32.xlu0 %v9316_v50, %s8014_s18  ;;  %v6202_v36 = vsel %vm6187_vm4, %v6199_v29, %v6201_v26 }
 0x41d   : > { %v5370_v18 = vpop.permute.xlu1 %5369  ;;  %v6319_v0 = vmax.f32 %v6156_v61, %v6202_v36 }
 0x41e   : > { %v4852_v47 = vpop.permute.xlu0 %4851  ;;  %5491 = vst.msk [vmem:[#allocation3 + $0x86] sm:$0xff] %vm5465_vm9, %v5370_v18  ;;  %v6048_v18 = vrot.slane %v5930_v13, 1 }
 0x41f   : > { %4971 = vst.msk [vmem:[#allocation3 + $0x8e] sm:$0xfc] %vm11126_vm5, %v4852_v47  ;;  %4885 = vrot.lane.b32.xlu1 %v9654_v41, %s8014_s18  ;;  %vm11131_vm5 = vmmov %vm11127_vm7  ;;  %v6204_v47 = vrot.slane %v10188_v51, 2 }
 0x420   : > { %5401 = vrot.lane.b32.xlu0 %v9654_v41, %s8017_s29 }
 0x421   : > { %v4854_v62 = vpop.permute.xlu1 %4853  ;;  %v6207_v39 = vsel %vm6187_vm4, %v6204_v47, %v6206_v33 }
 0x422   : > { %v4856_v30 = vpop.permute.xlu0 %4855  ;;  %4972 = vst.msk [vmem:[#allocation3 + $0x96] sm:$0xff] %vm4943_vm0, %v4854_v62  ;;  %v6044_v62 = vsel %vm6024_vm6, %v6041_v53, %v6043_v2 }
 0x423   : > { %4973 = vst.msk [vmem:[#allocation3 + $0x9e] sm:$0x3] %vm4945_vm2, %v4856_v30  ;;  %5050 = vrot.lane.b32.xlu1 %v9683_v45, %s8015_s19  ;;  %v7884_v30 = vld [vmem:[#allocation2 + $0x88] sm:$0x3] }
 0x424   : > { %5052 = vrot.lane.b32.xlu0 %v8821_v52, %s8015_s19 }
 0x425   : > { %v5372_v42 = vpop.permute.xlu1 %5371  ;;  %v5530_v50 = vld [vmem:[#allocation3 + $0x80] sm:$0xff] }
 0x426   : > { %v5031_v35 = vpop.permute.xlu0 %5030  ;;  %5492 = vst.msk [vmem:[#allocation3 + $0x8e] sm:$0x3] %vm11127_vm7, %v5372_v42  ;;  %7682 = vmatprep.mubr.msk.f32.mxu1 %vm5562_vm10, %v5530_v50  ;;  %v5933_v42 = vsel %vm412_vm12, -inf, %v7884_v30  ;;  %v5884_v50 = vmax.f32 %v5726_v20, 0.0  ;;  %vm11132_vm7 = vmmov %vm11128_vm3  ;;  %v7888_v20 = vld [vmem:[#allocation2 + $0xb8] sm:$0x3] }
 0x427   : > { %5109 = vst.msk [vmem:[#allocation3 + $0x90] sm:$0xff] %vm5090_vm13, %v5031_v35  ;;  %5208 = vrot.lane.b32.xlu1 %v9683_v45, %s8016_s22  ;;  %v5736_v35 = vadd.f32 %v10157_v11, %v9781_v57  ;;  %v6216_v26 = vrot.slane %v5933_v42, 2 }
 0x428   : > { %5210 = vrot.lane.b32.xlu0 %v8821_v52, %s8016_s22 }
 0x429   : > { %v5033_v41 = vpop.permute.xlu1 %5032 }
 0x42a   : > { %v5179_v9 = vpop.permute.xlu0 %5178  ;;  %5110 = vst.msk [vmem:[#allocation3 + $0x98] sm:$0xff] %vm5090_vm13, %v5033_v41 }
 0x42b   : > { %5298 = vst.msk [vmem:[#allocation3 + $0x8f] sm:$0xfe] %vm11128_vm3, %v5179_v9  ;;  %5212 = vrot.lane.b32.xlu1 %v8802_v37, %s8016_s22  ;;  %v6158_v9 = vmax.f32 %v10188_v51, %v6044_v62  ;;  %vm11133_vm3 = vmmov %vm11129_vm15 }
 0x42c   : > { %5403 = vrot.lane.b32.xlu0 %v9683_v45, %s8017_s29 }
 0x42d   : > { %v5181_v6 = vpop.permute.xlu1 %5180  ;;  %v5531_v56 = vld [vmem:[#allocation3 + $0x88] sm:$0xff]  ;;  %v6321_v57 = vmax.f32 %v6158_v9, %v6207_v39 }
 0x42e   : > { %v5183_v14 = vpop.permute.xlu0 %5182  ;;  %5299 = vst.msk [vmem:[#allocation3 + $0x97] sm:$0xff] %vm5270_vm11, %v5181_v6  ;;  %7683 = vmatmul.mubr.msk.f32.gmra.mrb[24].mxu1 %vm5562_vm10, %v5531_v56  ;;  %v5741_v6 = vadd.f32 %v9775_v59, %v10157_v11  ;;  %v10217_v59 = vld [vmem:[#allocation2 + $0x68] sm:$0xff] }
 0x42f   : > { %5300 = vst.msk [vmem:[#allocation3 + $0x9f] sm:$0x1] %vm5272_vm8, %v5183_v14  ;;  %5405 = vrot.lane.b32.xlu1 %v8821_v52, %s8017_s29  ;;  %v6046_v16 = vrot.slane %v10217_v59, 1  ;;  %v6209_v3 = vrot.slane %v10217_v59, 2 }
 0x430   : > { %4887 = vrot.lane.b32.xlu0 %v9683_v45, %s8014_s18  ;;  %v6033_v45 = vrot.slane %v5921_v23, 1 }
 0x431   : > { %v5374_v63 = vpop.permute.xlu1 %5373 }
 0x432   : > { %v5376_v21 = vpop.permute.xlu0 %5375  ;;  %5493 = vst.msk [vmem:[#allocation3 + $0x8e] sm:$0xfc] %vm11129_vm15, %v5374_v63  ;;  %vm11134_vm15 = vmmov %vm11130_vm1 }
 0x433   : > { %5494 = vst.msk [vmem:[#allocation3 + $0x96] sm:$0xff] %vm5465_vm9, %v5376_v21  ;;  %4889 = vrot.lane.b32.xlu1 %v8821_v52, %s8014_s18  ;;  %v6196_v52 = vrot.slane %v5921_v23, 2  ;;  %v6211_v23 = vrot.slane %v5930_v13, 2  ;;  %v6221_v13 = vrot.slane %v5936_v49, 2 }
 0x434   : > { %4891 = vrot.lane.b32.xlu0 %v8802_v37, %s8014_s18  ;;  %s8019_s18 = smov [#allocation4]  }
 0x435   : > { %v4858_v44 = vpop.permute.xlu1 %4857  ;;  %v6197_v12 = vsel %vm6187_vm4, %v6194_v28, %v6196_v52  ;;  %v6049_v52 = vsel %vm6024_vm6, %v6046_v16, %v6048_v18 }
 0x436   : > { %v4860_v4 = vpop.permute.xlu0 %4859  ;;  %4974 = vst.msk [vmem:[#allocation3 + $0x9e] sm:$0xfc] %vm11130_vm1, %v4858_v44  ;;  %v5886_v44 = vmax.f32 %v5736_v35, 0.0  ;;  %v6160_v31 = vmax.f32 %v10217_v59, %v6049_v52  ;;  %vm11135_vm1 = vmmov %vm11131_vm5 }
 0x437   : > { %4975 = vst.msk [vmem:[#allocation3 + $0xa6] sm:$0xff] %vm4943_vm0, %v4860_v4  ;;  %5407 = vrot.lane.b32.xlu1 %v8802_v37, %s8017_s29  ;;  %v6034_v37 = vsel %vm6024_vm6, %v6031_v43, %v6033_v45  ;;  %v6053_v45 = vrot.slane %v5933_v42, 1  ;;  %v10258_v42 = vld [vmem:[#allocation2 + $0xb0] sm:$0xff] }
 0x438   : > { %7838 = vrot.lane.b32.xlu0 %v8006_v1, %s8015_s19  ;;  %v6154_v54 = vmax.f32 %v10138_v15, %v6034_v37  ;;  %v6212_v37 = vsel %vm6187_vm4, %v6209_v3, %v6211_v23 }
 0x439   : > { %v4862_v58 = vpop.permute.xlu1 %4861 }
 0x43a   : > { %v5378_v40 = vpop.permute.xlu0 %5377  ;;  %4976 = vst.msk [vmem:[#allocation3 + $0xae] sm:$0x3] %vm4945_vm2, %v4862_v58  ;;  %v5532_v19 = vld [vmem:[#allocation3 + $0x90] sm:$0xff]  ;;  %v6317_v38 = vmax.f32 %v6154_v54, %v6197_v12  ;;  %v5887_v58 = vmax.f32 %v5741_v6, 0.0  ;;  %v6323_v12 = vmax.f32 %v6160_v31, %v6212_v37 }
 0x43b   : > { %5495 = vst.msk [vmem:[#allocation3 + $0x9e] sm:$0x3] %vm11131_vm5, %v5378_v40  ;;  %7685 = vmatprep.mubr.msk.f32.mxu1 %vm5562_vm10, %v5532_v19  ;;  %7843 = vrot.lane.b32.xlu1 %v8006_v1, %s8016_s22  ;;  %v6355_v40 = vmax.f32 %v6319_v0, %v6321_v57  ;;  %v10236_v19 = vld [vmem:[#allocation2 + $0x80] sm:$0xff]  ;;  %vm11136_vm5 = vmmov %vm11132_vm7 }
 0x43c   : > { %5218 = vrot.lane.b32.xlu0 %v8006_v1, %s8016_s22  ;;  %v6351_v10 = vmax.f32 %v10174_v27, %v6317_v38  ;;  %v6353_v21 = vmax.f32 %v6317_v38, %v6319_v0  ;;  %v6051_v32 = vrot.slane %v10236_v19, 1  ;;  %v11027_v55 = vrot.slane %v10236_v19, 2  ;;  %v10254_v38 = vld [vmem:[#allocation2 + $0x98] sm:$0xff] }
 0x43d   : > { %v5035_v60 = vpop.permute.xlu1 %5034  ;;  %v10248_v61 = vmax.f32 %v6355_v40, %v6323_v12  ;;  %v11026_v18 = vrot.slane %v10254_v38, 2 }
 0x43e   : > { %v5037_v8 = vpop.permute.xlu0 %5036  ;;  %5111 = vst.msk [vmem:[#allocation3 + $0xa0] sm:$0xff] %vm5090_vm13, %v5035_v60  ;;  %v10209_v63 = vmax.f32 %v6351_v10, %v6319_v0  ;;  %v10222_v46 = vmax.f32 %v6353_v21, %v6321_v57  ;;  %v6054_v54 = vsel %vm6024_vm6, %v6051_v32, %v6053_v45  ;;  %v5939_v60 = vsel %vm412_vm12, -inf, %v7888_v20 }
 0x43f   : > { %5112 = vst.msk [vmem:[#allocation3 + $0xa8] sm:$0xff] %vm5090_vm13, %v5037_v8  ;;  %7848 = vrot.lane.b32.xlu1 %v8006_v1, %s8017_s29  ;;  %v6162_v33 = vmax.f32 %v10236_v19, %v6054_v54  ;;  %v6357_v8 = vmax.f32 %v6321_v57, %v6323_v12  ;;  %v11028_v0 = vrot.slane %v10254_v38, 1  ;;  %v6063_v10 = vrot.slane %v5939_v60, 1 }
 0x440   : > { %5413 = vrot.lane.b32.xlu0 %v8006_v1, %s8017_s29  ;;  %v5885_v1 = vmax.f32 %v5731_v25, 0.0  ;;  %v6217_v25 = vsel %vm6187_vm4, %v11027_v55, %v6216_v26  ;;  %v11018_v45 = vrot.slane %v10258_v42, 2  ;;  %s7946_s29 = sshll.u32 %s8019_s18, 4  ;;  %s7947_s29 = int_to_ptr.vmem [resolvable:$false] %s7946_s29 }
 0x441   : > { %v5185_v41 = vpop.permute.xlu1 %5184  ;;  %v6325_v30 = vmax.f32 %v6162_v33, %v6217_v25  ;;  %v6059_v6 = vsel %vm6024_vm6, %v11028_v0, %v6058_v24  ;;  %v10297_v33 = vld [vmem:[#allocation2 + $0xe0] sm:$0xff]  ;;  %s7948_s19 = scalar_lea.vmem %s7947_s29, 8192  ;;  %p7949_p0 = scmp.lt.s32.totalorder %s10935_s15, %s7947_s29 }
 0x442   : > { %v5187_v56 = vpop.permute.xlu0 %5186  ;;  %5301 = vst.msk [vmem:[#allocation3 + $0x9f] sm:$0xfe] %vm11132_vm7, %v5185_v41  ;;  %v5533_v14 = vld [vmem:[#allocation3 + $0x98] sm:$0xff]  ;;  %v7891_v41 = vld [vmem:[#allocation2 + $0xd0] sm:$0x3]  ;;  %v6164_v39 = vmax.f32 %v10254_v38, %v6059_v6  ;;  %v11013_v25 = vrot.slane %v10297_v33, 1  ;;  %vm11137_vm7 = vmmov %vm11133_vm3  ;;  %p7950_p1 = scmp.lt.s32.totalorder %s7948_s19, %s7942_s16 }
 0x443   : > { %5302 = vst.msk [vmem:[#allocation3 + $0xa7] sm:$0xff] %vm5270_vm11, %v5187_v56  ;;  %7686 = vmatmul.mubr.msk.f32.gmra.mrb[26].mxu1 %vm5562_vm10, %v5533_v14  ;;  %6908 = vrot.lane.b32.xlu1 %v5884_v50, %s8009_s20  ;;  %v11025_v50 = vrot.slane %v10258_v42, 1  ;;  %v5942_v9 = vsel %vm412_vm12, -inf, %v7891_v41  ;;  %v6222_v56 = vsel %vm6187_vm4, %v11026_v18, %v6221_v13  ;;  %v6226_v14 = vrot.slane %v5939_v60, 2  ;;  %v7911_v18 = vld [vmem:[#allocation2 + $0x48] sm:$0xff] }
 0x444   : > { %6910 = vrot.lane.b32.xlu0 %v5885_v1, %s8009_s20  ;;  %v10265_v1 = vmax.f32 %v6357_v8, %v6325_v30  ;;  %v6359_v23 = vmax.f32 %v6323_v12, %v6325_v30  ;;  %v6327_v26 = vmax.f32 %v6164_v39, %v6222_v56  ;;  %v6231_v49 = vrot.slane %v5942_v9, 2  ;;  %v7895_v8 = vld [vmem:[#allocation2 + $0x100] sm:$0x3]  ;;  %p7951_p2 = por %p7950_p1, %p7949_p0 }
 0x445   : > { %v5189_v4 = vpop.permute.xlu1 %5188  ;;  %v6227_v37 = vsel %vm6187_vm4, %v11018_v45, %v6226_v14  ;;  %v11009_v14 = vrot.slane %v10297_v33, 2  ;;  %v10412_v45 = vld [vmem:[#allocation2 + $0x170] sm:$0xff] }
 0x446   : > { %v5380_v48 = vpop.permute.xlu0 %5379  ;;  %5303 = vst.msk [vmem:[#allocation3 + $0xaf] sm:$0x1] %vm5272_vm8, %v5189_v4  ;;  %v6068_v4 = vrot.slane %v5942_v9, 1  ;;  %v10284_v31 = vmax.f32 %v6359_v23, %v6327_v26  ;;  %v6361_v40 = vmax.f32 %v6325_v30, %v6327_v26  ;;  %p7952_p3 = pnand %p7951_p2, %p7945_p13 }
 0x447   : > { %5496 = vst.msk [vmem:[#allocation3 + $0x9e] sm:$0xfc] %vm11133_vm3, %v5380_v48  ;;  %6912 = vrot.lane.b32.xlu1 %v5886_v44, %s8009_s20  ;;  %v6064_v44 = vsel %vm6024_vm6, %v11025_v50, %v6063_v10  ;;  %v5948_v10 = vsel %vm412_vm12, -inf, %v7895_v8  ;;  %vm11138_vm3 = vmmov %vm11134_vm15 }
 0x448   : > { %6914 = vrot.lane.b32.xlu0 %v5887_v58, %s8009_s20  ;;  %v6166_v22 = vmax.f32 %v10258_v42, %v6064_v44  ;;  %v7892_v58 = vld [vmem:[#allocation2 + $0xe8] sm:$0x3]  ;;  %v6078_v39 = vrot.slane %v5948_v10, 1  ;;  %v10315_v44 = vld [vmem:[#allocation2 + $0xf8] sm:$0xff] }
 0x449   : > { %v5382_v2 = vpop.permute.xlu1 %5381  ;;  %v5945_v48 = vsel %vm412_vm12, -inf, %v7892_v58 }
 0x44a   : > { %v4864_v36 = vpop.permute.xlu0 %4863  ;;  %5497 = vst.msk [vmem:[#allocation3 + $0xa6] sm:$0xff] %vm5465_vm9, %v5382_v2  ;;  %v10289_v2 = vld [vmem:[#allocation2 + $0xc8] sm:$0xff]  ;;  %v6329_v24 = vmax.f32 %v6166_v22, %v6227_v37  ;;  %v6073_v20 = vrot.slane %v5945_v48, 1  ;;  %v6236_v30 = vrot.slane %v5945_v48, 2 }
 0x44b   : > { %4977 = vst.msk [vmem:[#allocation3 + $0xae] sm:$0xfc] %vm11134_vm15, %v4864_v36  ;;  %v11024_v12 = vrot.slane %v10289_v2, 1  ;;  %v11014_v13 = vrot.slane %v10289_v2, 2  ;;  %vm11139_vm15 = vmmov %vm11135_vm1 }
 0x44c   : > { %v6363_v9 = vmax.f32 %v6327_v26, %v6329_v24  ;;  %v7897_v26 = vld [vmem:[#allocation2 + $0x118] sm:$0x3]  ;;  %v6237_v48 = vsel %vm6187_vm4, %v11009_v14, %v6236_v30 }
 0x44d   : > { %v4866_v62 = vpop.permute.xlu1 %4865  ;;  %v6069_v36 = vsel %vm6024_vm6, %v11024_v12, %v6068_v4  ;;  %v6232_v41 = vsel %vm6187_vm4, %v11014_v13, %v6231_v49  ;;  %v11010_v4 = vrot.slane %v10315_v44, 1  ;;  %v5951_v22 = vsel %vm412_vm12, -inf, %v7897_v26 }
 0x44e   : > { %v4868_v35 = vpop.permute.xlu0 %4867  ;;  %4978 = vst.msk [vmem:[#allocation3 + $0xb6] sm:$0xff] %vm4943_vm0, %v4866_v62  ;;  %v10303_v62 = vmax.f32 %v6361_v40, %v6329_v24  ;;  %v6083_v8 = vrot.slane %v5951_v22, 1 }
 0x44f   : > { %4979 = vst.msk [vmem:[#allocation3 + $0xbe] sm:$0x3] %vm4945_vm2, %v4868_v35  ;;  %v6168_v35 = vmax.f32 %v10289_v2, %v6069_v36  ;;  %v6079_v36 = vsel %vm6024_vm6, %v11010_v4, %v6078_v39  ;;  %v10341_v39 = vld [vmem:[#allocation2 + $0x110] sm:$0xff] }
 0x451   : > { %v5384_v57 = vpop.permute.xlu1 %5383  ;;  %v5534_v21 = vld [vmem:[#allocation3 + $0xa0] sm:$0xff] }
 0x452   : > { %v5039_v52 = vpop.permute.xlu0 %5038  ;;  %5498 = vst.msk [vmem:[#allocation3 + $0xae] sm:$0x3] %vm11135_vm1, %v5384_v57  ;;  %7688 = vmatprep.mubr.msk.f32.mxu1 %vm5562_vm10, %v5534_v21  ;;  %v6331_v57 = vmax.f32 %v6168_v35, %v6232_v41  ;;  %v6074_v21 = vsel %vm6024_vm6, %v11013_v25, %v6073_v20  ;;  %vm11140_vm1 = vmmov %vm11136_vm5 }
 0x453   : > { %5113 = vst.msk [vmem:[#allocation3 + $0xb0] sm:$0xff] %vm5090_vm13, %v5039_v52  ;;  %v6241_v52 = vrot.slane %v5948_v10, 2  ;;  %v6170_v58 = vmax.f32 %v10297_v33, %v6074_v21  ;;  %v6172_v10 = vmax.f32 %v10315_v44, %v6079_v36  ;;  %v11007_v21 = vrot.slane %v10341_v39, 1 }
 0x454   : > { %v10321_v49 = vmax.f32 %v6363_v9, %v6331_v57  ;;  %v6365_v40 = vmax.f32 %v6329_v24, %v6331_v57  ;;  %v7898_v24 = vld [vmem:[#allocation2 + $0x130] sm:$0x3]  ;;  %v6246_v9 = vrot.slane %v5951_v22, 2 }
 0x455   : > { %v5041_v54 = vpop.permute.xlu1 %5040  ;;  %v5954_v35 = vsel %vm412_vm12, -inf, %v7898_v24  ;;  %v6084_v22 = vsel %vm6024_vm6, %v11007_v21, %v6083_v8  ;;  %v10358_v24 = vld [vmem:[#allocation2 + $0x128] sm:$0xff] }
 0x456   : > { %v5191_v60 = vpop.permute.xlu0 %5190  ;;  %5114 = vst.msk [vmem:[#allocation3 + $0xb8] sm:$0xff] %vm5090_vm13, %v5041_v54  ;;  %v11008_v54 = vrot.slane %v10315_v44, 2  ;;  %v11011_v8 = vrot.slane %v10358_v24, 2 }
 0x457   : > { %5304 = vst.msk [vmem:[#allocation3 + $0xaf] sm:$0xfe] %vm11136_vm5, %v5191_v60  ;;  %v6333_v60 = vmax.f32 %v6170_v58, %v6237_v48  ;;  %v11006_v58 = vrot.slane %v10341_v39, 2  ;;  %vm11141_vm5 = vmmov %vm11137_vm7 }
 0x458   : > { %v6242_v30 = vsel %vm6187_vm4, %v11008_v54, %v6241_v52  ;;  %v6088_v52 = vrot.slane %v5954_v35, 1 }
 0x459   : > { %v5193_v6 = vpop.permute.xlu1 %5192  ;;  %v5535_v56 = vld [vmem:[#allocation3 + $0xa8] sm:$0xff]  ;;  %v10339_v41 = vmax.f32 %v6365_v40, %v6333_v60  ;;  %v7900_v40 = vld [vmem:[#allocation2 + $0x148] sm:$0x3] }
 0x45a   : > { %v5195_v23 = vpop.permute.xlu0 %5194  ;;  %5305 = vst.msk [vmem:[#allocation3 + $0xb7] sm:$0xff] %vm5270_vm11, %v5193_v6  ;;  %7689 = vmatmul.mubr.msk.f32.gmra.mrb[28].mxu1 %vm5562_vm10, %v5535_v56  ;;  %v6335_v56 = vmax.f32 %v6172_v10, %v6242_v30  ;;  %v6174_v10 = vmax.f32 %v10341_v39, %v6084_v22  ;;  %v6247_v30 = vsel %vm6187_vm4, %v11006_v58, %v6246_v9 }
 0x45b   : > { %5306 = vst.msk [vmem:[#allocation3 + $0xbf] sm:$0x1] %vm5272_vm8, %v5195_v23  ;;  %v6367_v23 = vmax.f32 %v6331_v57, %v6333_v60  ;;  %v6251_v57 = vrot.slane %v5954_v35, 2  ;;  %v7902_v35 = vld [vmem:[#allocation2 + $0x160] sm:$0x3] }
 0x45c   : > { %v6337_v22 = vmax.f32 %v6174_v10, %v6247_v30  ;;  %v10377_v10 = vld [vmem:[#allocation2 + $0x140] sm:$0xff] }
 0x45d   : > { %v5386_v37 = vpop.permute.xlu1 %5385  ;;  %v10347_v48 = vmax.f32 %v6367_v23, %v6335_v56 }
 0x45e   : > { %v5388_v20 = vpop.permute.xlu0 %5387  ;;  %5499 = vst.msk [vmem:[#allocation3 + $0xae] sm:$0xfc] %vm11137_vm7, %v5386_v37  ;;  %v6369_v37 = vmax.f32 %v6333_v60, %v6335_v56  ;;  %v6371_v14 = vmax.f32 %v6335_v56, %v6337_v22  ;;  %vm11143_vm7 = vmmov %vm11139_vm15 }
 0x45f   : > { %5500 = vst.msk [vmem:[#allocation3 + $0xb6] sm:$0xff] %vm5465_vm9, %v5388_v20  ;;  %v5957_v20 = vsel %vm412_vm12, -inf, %v7900_v40 }
 0x460   : > { %v6093_v40 = vrot.slane %v5957_v20, 1  ;;  %v6256_v58 = vrot.slane %v5957_v20, 2  ;;  %v11015_v20 = vrot.slane %v10377_v10, 2 }
 0x461   : > { %v4870_v6 = vpop.permute.xlu1 %4869 }
 0x462   : > { %v4872_v26 = vpop.permute.xlu0 %4871  ;;  %4980 = vst.msk [vmem:[#allocation3 + $0xbe] sm:$0xfc] %vm11138_vm3, %v4870_v6  ;;  %v11012_v6 = vrot.slane %v10358_v24, 1 }
 0x463   : > { %4981 = vst.msk [vmem:[#allocation3 + $0xc6] sm:$0xff] %vm4943_vm0, %v4872_v26  ;;  %v5960_v26 = vsel %vm412_vm12, -inf, %v7902_v35  ;;  %v6252_v35 = vsel %vm6187_vm4, %v11011_v8, %v6251_v57  ;;  %v7905_v57 = vld [vmem:[#allocation2 + $0x178] sm:$0x3] }
 0x464   : > { %v6089_v9 = vsel %vm6024_vm6, %v11012_v6, %v6088_v52  ;;  %v11016_v52 = vrot.slane %v10377_v10, 1  ;;  %v6261_v30 = vrot.slane %v5960_v26, 2 }
 0x465   : > { %v4874_v36 = vpop.permute.xlu1 %4873  ;;  %v6176_v54 = vmax.f32 %v10358_v24, %v6089_v9 }
 0x466   : > { %v5390_v23 = vpop.permute.xlu0 %5389  ;;  %4982 = vst.msk [vmem:[#allocation3 + $0xce] sm:$0x3] %vm4945_vm2, %v4874_v36  ;;  %v5536_v60 = vld [vmem:[#allocation3 + $0xb0] sm:$0xff]  ;;  %v10370_v36 = vmax.f32 %v6369_v37, %v6337_v22 }
 0x467   : > { %5501 = vst.msk [vmem:[#allocation3 + $0xbe] sm:$0x3] %vm11139_vm15, %v5390_v23  ;;  %7691 = vmatprep.mubr.msk.f32.mxu1 %vm5562_vm10, %v5536_v60  ;;  %v6098_v23 = vrot.slane %v5960_v26, 1  ;;  %v6339_v37 = vmax.f32 %v6176_v54, %v6252_v35  ;;  %v10382_v60 = vld [vmem:[#allocation2 + $0x158] sm:$0xff]  ;;  %v6094_v26 = vsel %vm6024_vm6, %v11016_v52, %v6093_v40  ;;  %vm11145_vm15 = vmmov %vm11141_vm5 }
 0x468   : > { %v11017_v9 = vrot.slane %v10382_v60, 1  ;;  %v11023_v56 = vrot.slane %v10382_v60, 2  ;;  %v6178_v25 = vmax.f32 %v10377_v10, %v6094_v26 }
 0x469   : > { %v5043_v21 = vpop.permute.xlu1 %5042  ;;  %v10388_v6 = vmax.f32 %v6371_v14, %v6339_v37  ;;  %v6373_v13 = vmax.f32 %v6337_v22, %v6339_v37 }
 0x46a   : > { %v5045_v4 = vpop.permute.xlu0 %5044  ;;  %5115 = vst.msk [vmem:[#allocation3 + $0xc0] sm:$0xff] %vm5090_vm13, %v5043_v21  ;;  %v5963_v21 = vsel %vm412_vm12, -inf, %v7905_v57  ;;  %v6099_v14 = vsel %vm6024_vm6, %v11017_v9, %v6098_v23  ;;  %v6262_v40 = vsel %vm6187_vm4, %v11023_v56, %v6261_v30  ;;  %v11021_v30 = vrot.slane %v10412_v45, 1 }
 0x46b   : > { %5116 = vst.msk [vmem:[#allocation3 + $0xc8] sm:$0xff] %vm5090_vm13, %v5045_v4  ;;  %v6257_v4 = vsel %vm6187_vm4, %v11015_v20, %v6256_v58  ;;  %v6103_v58 = vrot.slane %v5963_v21, 1  ;;  %v7906_v20 = vld [vmem:[#allocation2 + $0x190] sm:$0x3]  ;;  %v6266_v26 = vrot.slane %v5963_v21, 2 }
 0x46c   : > { %v6341_v57 = vmax.f32 %v6178_v25, %v6257_v4  ;;  %v5966_v22 = vsel %vm412_vm12, -inf, %v7906_v20  ;;  %v11019_v25 = vrot.slane %v10412_v45, 2  ;;  %vm11142_vm12 = vmmov %vm11138_vm3 }
 0x46d   : > { %v5197_v8 = vpop.permute.xlu1 %5196  ;;  %v6108_v4 = vrot.slane %v5966_v22, 1  ;;  %v6104_v20 = vsel %vm6024_vm6, %v11021_v30, %v6103_v58  ;;  %v6271_v58 = vrot.slane %v5966_v22, 2  ;;  %vm11144_vm3 = vmmov %vm11140_vm1 }
 0x46e   : > { %v5199_v54 = vpop.permute.xlu0 %5198  ;;  %5307 = vst.msk [vmem:[#allocation3 + $0xbf] sm:$0xfe] %vm11140_vm1, %v5197_v8  ;;  %v5537_v35 = vld [vmem:[#allocation3 + $0xb8] sm:$0xff]  ;;  %v6180_v8 = vmax.f32 %v10382_v60, %v6099_v14  ;;  %v6375_v9 = vmax.f32 %v6339_v37, %v6341_v57  ;;  %v6182_v37 = vmax.f32 %v10412_v45, %v6104_v20  ;;  %vm11146_vm1 = vmmov %vm11142_vm12 }
 0x46f   : > { %5308 = vst.msk [vmem:[#allocation3 + $0xc7] sm:$0xff] %vm5270_vm11, %v5199_v54  ;;  %7692 = vmatmul.mubr.msk.f32.gmra.mrb[30].mxu1 %vm5562_vm10, %v5537_v35  ;;  %v10410_v35 = vmax.f32 %v6373_v13, %v6341_v57 }
 0x470   : > { %v6343_v23 = vmax.f32 %v6180_v8, %v6262_v40  ;;  %v10427_v40 = vld [vmem:[#allocation2 + $0x188] sm:$0xff] }
 0x471   : > { %v5201_v54 = vpop.permute.xlu1 %5200  ;;  %v11022_v8 = vrot.slane %v10427_v40, 2 }
 0x472   : > { %v5392_v52 = vpop.permute.xlu0 %5391  ;;  %5309 = vst.msk [vmem:[#allocation3 + $0xcf] sm:$0x1] %vm5272_vm8, %v5201_v54  ;;  %v10417_v5 = vmax.f32 %v6375_v9, %v6343_v23  ;;  %v6377_v21 = vmax.f32 %v6341_v57, %v6343_v23  ;;  %v11020_v9 = vrot.slane %v10427_v40, 1 }
 0x473   : > { %5502 = vst.msk [vmem:[#allocation3 + $0xbe] sm:$0xfc] %vm11141_vm5, %v5392_v52  ;;  %v6267_v52 = vsel %vm6187_vm4, %v11019_v25, %v6266_v26  ;;  %vm11147_vm5 = vmmov %vm11143_vm7 }
 0x474   : > { %v10432_v57 = vmax.f32 %v6182_v37, %v6267_v52  ;;  %v6109_v54 = vsel %vm6024_vm6, %v11020_v9, %v6108_v4 }
 0x475   : > { %v5394_v13 = vpop.permute.xlu1 %5393  ;;  %v6184_v25 = vmax.f32 %v10427_v40, %v6109_v54 }
 0x476   : > { %v4876_v14 = vpop.permute.xlu0 %4875  ;;  %5503 = vst.msk [vmem:[#allocation3 + $0xc6] sm:$0xff] %vm5465_vm9, %v5394_v13  ;;  %v10439_v26 = vmax.f32 %v6377_v21, %v10432_v57  ;;  %v6379_v22 = vmax.f32 %v6343_v23, %v10432_v57 }
 0x477   : > { %4983 = vst.msk [vmem:[#allocation3 + $0xce] sm:$0xfc] %vm11142_vm12, %v4876_v14  ;;  %v6272_v14 = vsel %vm6187_vm4, %v11022_v8, %v6271_v58  ;;  %vm11148_vm12 = vmmov %vm11144_vm3 }
 0x478   : > { %v10447_v37 = vmax.f32 %v6184_v25, %v6272_v14 }
 0x479   : > { %v4878_v20 = vpop.permute.xlu1 %4877 }
 0x47a   : > { %v4880_v13 = vpop.permute.xlu0 %4879  ;;  %4984 = vst.msk [vmem:[#allocation3 + $0xd6] sm:$0xff] %vm4943_vm0, %v4878_v20  ;;  %v10453_v54 = vmax.f32 %v6379_v22, %v10447_v37 }
 0x47b   : > { %4985 = vst.msk [vmem:[#allocation3 + $0xde] sm:$0x3] %vm4945_vm2, %v4880_v13 }
 0x47d   : > { %v7666_v4 = vpop.f32.mrb[12].mxu1  ;;  %v5396_v52 = vpop.permute.xlu1 %5395  ;;  %v5538_v9 = vld [vmem:[#allocation3 + $0xc0] sm:$0xff] }
 0x47e   : > { %v5047_v30 = vpop.permute.xlu0 %5046  ;;  %v5751_v20 = vadd.f32 %v7666_v4, %v10157_v11  ;;  %5504 = vst.msk [vmem:[#allocation3 + $0xce] sm:$0x3] %vm11143_vm7, %v5396_v52  ;;  %v5745_v21 = vpop.f32.mrb[13].mxu1  ;;  %7694 = vmatprep.mubr.msk.f32.mxu1 %vm5562_vm10, %v5538_v9  ;;  %vm11149_vm7 = vmmov %vm11145_vm15 }
 0x47f   : > { %5117 = vst.msk [vmem:[#allocation3 + $0xd0] sm:$0xff] %vm5090_vm13, %v5047_v30  ;;  %v5746_v25 = vadd.f32 %v10157_v11, %v5745_v21 }
 0x480   : > { %v5889_v58 = vmax.f32 %v5751_v20, 0.0 }
 0x481   : > { %v5888_v13 = vmax.f32 %v5746_v25, 0.0  ;;  %v5049_v14 = vpop.permute.xlu1 %5048 }
 0x482   : > { %v5203_v8 = vpop.permute.xlu0 %5202  ;;  %5118 = vst.msk [vmem:[#allocation3 + $0xd8] sm:$0xff] %vm5090_vm13, %v5049_v14  ;;  %6918 = vrot.lane.b32.xlu0 %v5889_v58, %s8009_s20 }
 0x483   : > { %5310 = vst.msk [vmem:[#allocation3 + $0xcf] sm:$0xfe] %vm11144_vm3, %v5203_v8  ;;  %6916 = vrot.lane.b32.xlu1 %v5888_v13, %s8009_s20  ;;  %vm11150_vm3 = vmmov %vm11146_vm1 }
 0x485   : > { %v5205_v9 = vpop.permute.xlu1 %5204  ;;  %v5539_v22 = vld [vmem:[#allocation3 + $0xc8] sm:$0xff] }
 0x486   : > { %v5207_v4 = vpop.permute.xlu0 %5206  ;;  %5311 = vst.msk [vmem:[#allocation3 + $0xd7] sm:$0xff] %vm5270_vm11, %v5205_v9  ;;  %7695 = vmatmul.mubr.msk.f32.gmra.mrb[32].mxu1 %vm5562_vm10, %v5539_v22 }
 0x487   : > { %5312 = vst.msk [vmem:[#allocation3 + $0xdf] sm:$0x1] %vm5272_vm8, %v5207_v4 }
 0x489   : > { %v5398_v30 = vpop.permute.xlu1 %5397 }
 0x48a   : > { %v5400_v52 = vpop.permute.xlu0 %5399  ;;  %5505 = vst.msk [vmem:[#allocation3 + $0xce] sm:$0xfc] %vm11145_vm15, %v5398_v30  ;;  %vm11151_vm15 = vcmp.eq.s32.totalorder %v8118_v7, 0 }
 0x48b   : > { %5506 = vst.msk [vmem:[#allocation3 + $0xd6] sm:$0xff] %vm5465_vm9, %v5400_v52 }
 0x48d   : > { %v4882_v20 = vpop.permute.xlu1 %4881 }
 0x48e   : > { %v4884_v21 = vpop.permute.xlu0 %4883  ;;  %4986 = vst.msk [vmem:[#allocation3 + $0xde] sm:$0xfc] %vm11146_vm1, %v4882_v20  ;;  %vm11152_vm1 = vmmov %vm11151_vm15 }
 0x48f   : > { %4987 = vst.msk [vmem:[#allocation3 + $0xe6] sm:$0xff] %vm4943_vm0, %v4884_v21 }
 0x491   : > { %v4886_v8 = vpop.permute.xlu1 %4885 }
 0x492   : > { %v5402_v25 = vpop.permute.xlu0 %5401  ;;  %v7669_v58 = vpop.f32.mrb[14].mxu1  ;;  %4988 = vst.msk [vmem:[#allocation3 + $0xee] sm:$0x3] %vm4945_vm2, %v4886_v8  ;;  %v5540_v13 = vld [vmem:[#allocation3 + $0xd0] sm:$0xff] }
 0x493   : > { %5507 = vst.msk [vmem:[#allocation3 + $0xde] sm:$0x3] %vm11147_vm5, %v5402_v25  ;;  %v5761_v14 = vadd.f32 %v7669_v58, %v10157_v11  ;;  %v5755_v9 = vpop.f32.mrb[15].mxu1  ;;  %7697 = vmatprep.mubr.msk.f32.mxu1 %vm5562_vm10, %v5540_v13 }
 0x494   : > { %v5756_v22 = vadd.f32 %v10157_v11, %v5755_v9 }
 0x495   : > { %v5891_v4 = vmax.f32 %v5761_v14, 0.0  ;;  %v5051_v30 = vpop.permute.xlu1 %5050 }
 0x496   : > { %v5890_v52 = vmax.f32 %v5756_v22, 0.0  ;;  %v5053_v20 = vpop.permute.xlu0 %5052  ;;  %5119 = vst.msk [vmem:[#allocation3 + $0xe0] sm:$0xff] %vm5090_vm13, %v5051_v30  ;;  %v7909_v22 = vld [vmem:[#allocation2 + $0x18] sm:$0xff] }
 0x497   : > { %5120 = vst.msk [vmem:[#allocation3 + $0xe8] sm:$0xff] %vm5090_vm13, %v5053_v20  ;;  %6922 = vrot.lane.b32.xlu0 %v5891_v4, %s8009_s20  ;;  %v5919_v4 = vsel %vm11151_vm15, -inf, %v7909_v22  ;;  %v7910_v20 = vld [vmem:[#allocation2 + $0x30] sm:$0xff]  ;;  %vm11161_vm15 = vcmask 31744  }
 0x498   : > { %6920 = vrot.lane.b32.xlu1 %v5890_v52, %s8009_s20 }
 0x499   : > { %v5209_v21 = vpop.permute.xlu1 %5208 }
 0x49a   : > { %v5211_v8 = vpop.permute.xlu0 %5210  ;;  %5313 = vst.msk [vmem:[#allocation3 + $0xdf] sm:$0xfe] %vm11148_vm12, %v5209_v21  ;;  %v5541_v25 = vld [vmem:[#allocation3 + $0xd8] sm:$0xff]  ;;  %v5922_v21 = vsel %vm11152_vm1, -inf, %v7910_v20  ;;  %v6193_v20 = vrot.slane %v5919_v4, 2 }
 0x49b   : > { %5314 = vst.msk [vmem:[#allocation3 + $0xe7] sm:$0xff] %vm5270_vm11, %v5211_v8  ;;  %7698 = vmatmul.mubr.msk.f32.gmra.mrb[34].mxu1 %vm5562_vm10, %v5541_v25  ;;  %v6030_v8 = vrot.slane %v5919_v4, 1 }
 0x49d   : > { %v5213_v58 = vpop.permute.xlu1 %5212 }
 0x49e   : > { %v5404_v13 = vpop.permute.xlu0 %5403  ;;  %5315 = vst.msk [vmem:[#allocation3 + $0xef] sm:$0x1] %vm5272_vm8, %v5213_v58 }
 0x49f   : > { %5508 = vst.msk [vmem:[#allocation3 + $0xde] sm:$0xfc] %vm11149_vm7, %v5404_v13 }
 0x4a1   : > { %v5406_v14 = vpop.permute.xlu1 %5405 }
 0x4a2   : > { %v4888_v9 = vpop.permute.xlu0 %4887  ;;  %5509 = vst.msk [vmem:[#allocation3 + $0xe6] sm:$0xff] %vm5465_vm9, %v5406_v14  ;;  %v6035_v14 = vrot.slane %v5922_v21, 1 }
 0x4a3   : > { %4989 = vst.msk [vmem:[#allocation3 + $0xee] sm:$0xfc] %vm11150_vm3, %v4888_v9 }
 0x4a5   : > { %v4890_v30 = vpop.permute.xlu1 %4889 }
 0x4a6   : > { %v4892_v52 = vpop.permute.xlu0 %4891  ;;  %4990 = vst.msk [vmem:[#allocation3 + $0xf6] sm:$0xff] %vm4943_vm0, %v4890_v30  ;;  %v6032_v30 = vsel %vm6024_vm6, %v6030_v8, %v6031_v43  ;;  %vm11153_vm0 = vmmov %vm11152_vm1  ;;  %v6037_v43 = vsel %vm6024_vm6, %v6035_v14, %v6036_v34 }
 0x4a7   : > { %4991 = vst.msk [vmem:[#allocation3 + $0xfe] sm:$0x3] %vm4945_vm2, %v4892_v52  ;;  %v5925_v55 = vsel %vm11153_vm0, -inf, %v7911_v18  ;;  %v6153_v8 = vmax.f32 %v5919_v4, %v6032_v30  ;;  %v6195_v18 = vsel %vm6187_vm4, %v6193_v20, %v6194_v28  ;;  %vm11154_vm2 = vmmov %vm11153_vm0  ;;  %v6155_v14 = vmax.f32 %v5922_v21, %v6037_v43 }
 0x4a8   : > { %vm11160_vm3 = vmmov %vm11153_vm0 }
 0x4a9   : > { %v7672_v25 = vpop.f32.mrb[16].mxu1  ;;  %v5408_v58 = vpop.permute.xlu1 %5407  ;;  %v5542_v13 = vld [vmem:[#allocation3 + $0xe0] sm:$0xff]  ;;  %v6316_v15 = vmax.f32 %v6153_v8, %v6195_v18  ;;  %vm11165_vm1 = vmmov %vm11161_vm15 }
 0x4aa   : > { %v7839_v9 = vpop.permute.xlu0 %7838  ;;  %v5771_v23 = vadd.f32 %v7672_v25, %v10157_v11  ;;  %5510 = vst.msk [vmem:[#allocation3 + $0xee] sm:$0x3] %vm11147_vm5, %v5408_v58  ;;  %v5765_v22 = vpop.f32.mrb[17].mxu1  ;;  %7700 = vmatprep.mubr.msk.f32.mxu1 %vm5562_vm10, %v5542_v13 }
 0x4ab   : > { %v7841_v56 = vunpack.i.h.bf16 %v7839_v9  ;;  %v7840_v12 = vunpack.i.l.bf16 %v7839_v9  ;;  %v5766_v52 = vadd.f32 %v10157_v11, %v5765_v22  ;;  %v6350_v43 = vmax.f32 %v10174_v27, %v6316_v15 }
 0x4ac   : > { %v5893_v50 = vmax.f32 %v5771_v23, 0.0  ;;  %v6198_v23 = vrot.slane %v5922_v21, 2  ;;  %v6203_v21 = vrot.slane %v5925_v55, 2 }
 0x4ad   : > { %5121 = vst.msk [vmem:[#allocation3 + $0xf0] sm:$0xff] %vm5090_vm13, %v7840_v12  ;;  %5122 = vst.msk [vmem:[#allocation3 + $0xf8] sm:$0xff] %vm5090_vm13, %v7841_v56  ;;  %v5892_v25 = vmax.f32 %v5766_v52, 0.0  ;;  %v7844_v58 = vpop.permute.xlu1 %7843  ;;  %v6040_v12 = vrot.slane %v5925_v55, 1  ;;  %v7912_v56 = vld [vmem:[#allocation2 + $0x60] sm:$0xff] }
 0x4ae   : > { %v5219_v13 = vpop.permute.xlu0 %5218  ;;  %v7846_v9 = vunpack.i.h.bf16 %v7844_v58  ;;  %v7845_v0 = vunpack.i.l.bf16 %v7844_v58  ;;  %6926 = vrot.lane.b32.xlu0 %v5893_v50, %s8009_s20  ;;  %v5928_v34 = vsel %vm11154_vm2, -inf, %v7912_v56  ;;  %vm11155_vm13 = vmmov %vm11148_vm12  ;;  %v6200_v20 = vsel %vm6187_vm4, %v6198_v23, %v6199_v29 }
 0x4af   : > { %5318 = vst.msk [vmem:[#allocation3 + $0xff] sm:$0x1] %vm5272_vm8, %v5219_v13  ;;  %6924 = vrot.lane.b32.xlu1 %v5892_v25, %s8009_s20  ;;  %v6045_v52 = vrot.slane %v5928_v34, 1  ;;  %vm11156_vm8 = vmmov %vm11147_vm5  ;;  %vm7004_vm12 = vcmask 195648   ;;  %v7913_v25 = vld [vmem:[#allocation2 + $0x78] sm:$0xff]  ;;  %v6318_v29 = vmax.f32 %v6155_v14, %v6200_v20  ;;  %v6205_v18 = vsel %vm6187_vm4, %v6203_v21, %v6204_v47 }
 0x4b0   : > { %5316 = vst.msk [vmem:[#allocation3 + $0xef] sm:$0xfe] %vm11155_vm13, %v7845_v0  ;;  %v6042_v0 = vsel %vm6024_vm6, %v6040_v12, %v6041_v53  ;;  %v7914_v12 = vld [vmem:[#allocation2 + $0x90] sm:$0xff]  ;;  %vm11166_vm5 = vmmov %vm11165_vm1 }
 0x4b1   : > { %5317 = vst.msk [vmem:[#allocation3 + $0xf7] sm:$0xff] %vm5270_vm11, %v7846_v9  ;;  %v7849_v4 = vpop.permute.xlu1 %7848  ;;  %v5543_v50 = vld [vmem:[#allocation3 + $0xe8] sm:$0xff]  ;;  %vm11157_vm11 = vmmov %vm11149_vm7  ;;  %v6157_v13 = vmax.f32 %v5925_v55, %v6042_v0  ;;  %v6047_v53 = vsel %vm6024_vm6, %v6045_v52, %v6046_v16  ;;  %v6208_v9 = vrot.slane %v5928_v34, 2 }
 0x4b2   : > { %v5414_v22 = vpop.permute.xlu0 %5413  ;;  %v7851_v28 = vunpack.i.h.bf16 %v7849_v4  ;;  %v7850_v30 = vunpack.i.l.bf16 %v7849_v4  ;;  %7701 = vmatmul.mubr.msk.f32.gmra.mrb[36].mxu1 %vm5562_vm10, %v5543_v50  ;;  %vm11158_vm7 = vmmov %vm11153_vm0  ;;  %v6382_v50 = vmax.f32 %v6350_v43, %v6318_v29  ;;  %v6159_v55 = vmax.f32 %v5928_v34, %v6047_v53  ;;  %v7915_v34 = vld [vmem:[#allocation2 + $0xa8] sm:$0xff] }
 0x4b3   : > { %5513 = vst.msk [vmem:[#allocation3 + $0xfe] sm:$0x3] %vm11156_vm8, %v5414_v22  ;;  %v5931_v17 = vsel %vm11158_vm7, -inf, %v7913_v25  ;;  %v6320_v16 = vmax.f32 %v6157_v13, %v6205_v18  ;;  %v6352_v22 = vmax.f32 %v6316_v15, %v6318_v29  ;;  %v5937_v15 = vsel %vm11160_vm3, -inf, %v7915_v34  ;;  %vm11169_vm2 = vmmov %vm11165_vm1 }
 0x4b4   : > { %5511 = vst.msk [vmem:[#allocation3 + $0xee] sm:$0xfc] %vm11157_vm11, %v7850_v30  ;;  %v6050_v23 = vrot.slane %v5931_v17, 1  ;;  %v6213_v52 = vrot.slane %v5931_v17, 2  ;;  %v11163_v53 = vrot.slane %v10236_v19, 2  ;;  %v6060_v18 = vrot.slane %v5937_v15, 1  ;;  %vm11170_vm13 = vmmov %vm11165_vm1 }
 0x4b5   : > { %5512 = vst.msk [vmem:[#allocation3 + $0xf6] sm:$0xff] %vm5465_vm9, %v7851_v28  ;;  %v6909_v58 = vpop.permute.xlu1 %6908  ;;  %vm11159_vm9 = vmmov %vm11153_vm0  ;;  %v6210_v28 = vsel %vm6187_vm4, %v6208_v9, %v6209_v3  ;;  %v6354_v3 = vmax.f32 %v6318_v29, %v6320_v16  ;;  %v6384_v21 = vmax.f32 %v6352_v22, %v6320_v16  ;;  %v11167_v22 = vrot.slane %v10254_v38, 2 }
 0x4b6   : > { %v6911_v8 = vpop.permute.xlu0 %6910  ;;  %7005 = vst.msk [vmem:[%s8515_s13] sm:$0xff] %vm7004_vm12, %v6909_v58  ;;  %v5934_v56 = vsel %vm11159_vm9, -inf, %v7914_v12  ;;  %v6052_v20 = vsel %vm6024_vm6, %v6050_v23, %v6051_v32  ;;  %v6322_v59 = vmax.f32 %v6159_v55, %v6210_v28  ;;  %v11162_v58 = vrot.slane %v10254_v38, 1  ;;  %v7916_v23 = vld [vmem:[#allocation2 + $0xc0] sm:$0xff]  ;;  %vm11173_vm8 = vmmov %vm11153_vm0 }
 0x4b7   : > { %7006 = vst.msk [vmem:[%s8515_s13 + $0x8] sm:$0xff] %vm7004_vm12, %v6911_v8  ;;  %v6055_v51 = vrot.slane %v5934_v56, 1  ;;  %v6161_v25 = vmax.f32 %v5931_v17, %v6052_v20  ;;  %v6218_v43 = vrot.slane %v5934_v56, 2  ;;  %v6215_v9 = vsel %vm6187_vm4, %v6213_v52, %v11163_v53  ;;  %vm11174_vm11 = vmmov %vm11165_vm1 }
 0x4b8   : > { %v6223_v20 = vrot.slane %v5937_v15, 2  ;;  %vm11175_vm7 = vmmov %vm11165_vm1  ;;  %v11176_v53 = vrot.slane %v10289_v2, 2 }
 0x4b9   : > { %v6913_v4 = vpop.permute.xlu1 %6912  ;;  %v6057_v32 = vsel %vm6024_vm6, %v6055_v51, %v11162_v58  ;;  %v6324_v19 = vmax.f32 %v6161_v25, %v6215_v9  ;;  %v6220_v28 = vsel %vm6187_vm4, %v6218_v43, %v11167_v22  ;;  %v11172_v25 = vrot.slane %v10258_v42, 2  ;;  %v7918_v43 = vld [vmem:[#allocation2 + $0xf0] sm:$0xff]  ;;  %vm11178_vm9 = vmmov %vm11153_vm0 }
 0x4ba   : > { %v6915_v14 = vpop.permute.xlu0 %6914  ;;  %7007 = vst.msk [vmem:[%s8515_s13 + $0x10] sm:$0xff] %vm7004_vm12, %v6913_v4  ;;  %v6386_v4 = vmax.f32 %v6354_v3, %v6322_v59  ;;  %v6163_v55 = vmax.f32 %v5934_v56, %v6057_v32  ;;  %v11171_v3 = vrot.slane %v10289_v2, 1  ;;  %vm11179_vm3 = vmmov %vm11165_vm1  ;;  %v11182_v22 = vrot.slane %v10297_v33, 2 }
 0x4bb   : > { %7008 = vst.msk [vmem:[%s8515_s13 + $0x18] sm:$0xff] %vm7004_vm12, %v6915_v14  ;;  %v6225_v58 = vsel %vm6187_vm4, %v6223_v20, %v11172_v25 }
 0x4bc   : > { %v5544_v47 = vld [vmem:[#allocation3 + $0xf0] sm:$0xff]  ;;  %v5545_v30 = vld [vmem:[#allocation3 + $0xf8] sm:$0xff]  ;;  %v6326_v38 = vmax.f32 %v6163_v55, %v6220_v28  ;;  %v11181_v55 = vrot.slane %v10315_v44, 1 }
 0x4bd   : > { %7703 = vmatprep.mubr.msk.f32.mxu1 %vm5562_vm10, %v5544_v47  ;;  %v11168_v47 = vrot.slane %v10258_v42, 1 }
 0x4be   : > { %7704 = vmatmul.mubr.msk.f32.gmra.mrb[38].mxu1 %vm5562_vm10, %v5545_v30  ;;  %v7675_v0 = vpop.f32.mrb[18].mxu1  ;;  %vm11164_vm10 = vmmov %vm11153_vm0 }
 0x4bf   : > { %7708 = vmatprep.mubr.msk.f32.mxu1 %vm11161_vm15, %v6382_v50  ;;  %v5781_v8 = vadd.f32 %v7675_v0, %v10157_v11  ;;  %v5775_v13 = vpop.f32.mrb[19].mxu1  ;;  %v5940_v29 = vsel %vm11164_vm10, -inf, %v7916_v23  ;;  %v6356_v50 = vmax.f32 %v6320_v16, %v6322_v59  ;;  %v6062_v30 = vsel %vm6024_vm6, %v6060_v18, %v11168_v47  ;;  %vm11180_vm15 = vmmov %vm11165_vm1  ;;  %v7920_v47 = vld [vmem:[#allocation2 + $0x120] sm:$0xff] }
 0x4c0   : > { %v5776_v12 = vadd.f32 %v10157_v11, %v5775_v13  ;;  %v6065_v51 = vrot.slane %v5940_v29, 1  ;;  %v6358_v16 = vmax.f32 %v6322_v59, %v6324_v19  ;;  %v6165_v34 = vmax.f32 %v5937_v15, %v6062_v30  ;;  %vm11183_vm10 = vmmov %vm11153_vm0 }
 0x4c1   : > { %v5895_v17 = vmax.f32 %v5781_v8, 0.0  ;;  %v6388_v52 = vmax.f32 %v6356_v50, %v6324_v19  ;;  %v6360_v13 = vmax.f32 %v6324_v19, %v6326_v38  ;;  %v11177_v18 = vrot.slane %v10297_v33, 1 }
 0x4c2   : > { %7709 = vmatmul.mubr.msk.f32.vlgmr.msra.gmra.mrb[40].mxu1 %vm11165_vm1, %v10209_v63  ;;  %v5894_v14 = vmax.f32 %v5776_v12, 0.0  ;;  %v7917_v63 = vld [vmem:[#allocation2 + $0xd8] sm:$0xff]  ;;  %v6067_v0 = vsel %vm6024_vm6, %v6065_v51, %v11171_v3  ;;  %v6390_v59 = vmax.f32 %v6358_v16, %v6326_v38  ;;  %v6328_v15 = vmax.f32 %v6165_v34, %v6225_v58 }
 0x4c3   : > { %7711 = vmatprep.mubr.msk.f32.mxu1 %vm11166_vm5, %v6384_v21  ;;  %6930 = vrot.lane.b32.xlu0 %v5895_v17, %s8009_s20  ;;  %v5943_v56 = vsel %vm11153_vm0, -inf, %v7917_v63  ;;  %v6228_v21 = vrot.slane %v5940_v29, 2  ;;  %v6167_v8 = vmax.f32 %v5940_v29, %v6067_v0  ;;  %v7919_v17 = vld [vmem:[#allocation2 + $0x108] sm:$0xff]  ;;  %vm11184_vm5 = vmmov %vm11165_vm1  ;;  %v7921_v0 = vld [vmem:[#allocation2 + $0x138] sm:$0xff] }
 0x4c4   : > { %6928 = vrot.lane.b32.xlu1 %v5894_v14, %s8009_s20  ;;  %v6070_v32 = vrot.slane %v5943_v56, 1  ;;  %v6233_v12 = vrot.slane %v5943_v56, 2  ;;  %v6392_v2 = vmax.f32 %v6360_v13, %v6328_v15  ;;  %v11190_v13 = vrot.slane %v10358_v24, 1 }
 0x4c5   : > { %v6230_v42 = vsel %vm6187_vm4, %v6228_v21, %v11176_v53 }
 0x4c6   : > { %7712 = vmatmul.mubr.msk.f32.gmra.mrb[42].mxu1 %vm11169_vm2, %v10222_v46  ;;  %v5946_v46 = vsel %vm11173_vm8, -inf, %v7918_v43  ;;  %v6072_v23 = vsel %vm6024_vm6, %v6070_v32, %v11177_v18  ;;  %v6330_v29 = vmax.f32 %v6167_v8, %v6230_v42  ;;  %v6235_v28 = vsel %vm6187_vm4, %v6233_v12, %v11182_v22  ;;  %vm11187_vm2 = vmmov %vm11165_vm1  ;;  %v7922_v18 = vld [vmem:[#allocation2 + $0x150] sm:$0xff] }
 0x4c7   : > { %7714 = vmatprep.mubr.msk.f32.mxu1 %vm11170_vm13, %v6386_v4  ;;  %v6075_v9 = vrot.slane %v5946_v46, 1  ;;  %v6362_v4 = vmax.f32 %v6326_v38, %v6328_v15  ;;  %v6169_v50 = vmax.f32 %v5943_v56, %v6072_v23  ;;  %v6238_v19 = vrot.slane %v5946_v46, 2  ;;  %vm11188_vm13 = vmmov %vm11165_vm1 }
 0x4c8   : > { %v6364_v56 = vmax.f32 %v6328_v15, %v6330_v29  ;;  %v11185_v38 = vrot.slane %v10315_v44, 2  ;;  %vm11191_vm8 = vmmov %vm11153_vm0 }
 0x4c9   : > { %v6077_v14 = vsel %vm6024_vm6, %v6075_v9, %v11181_v55  ;;  %v6394_v30 = vmax.f32 %v6362_v4, %v6330_v29  ;;  %v6332_v63 = vmax.f32 %v6169_v50, %v6235_v28  ;;  %v5958_v23 = vsel %vm11191_vm8, -inf, %v7922_v18 }
 0x4ca   : > { %7715 = vmatmul.mubr.msk.f32.gmra.mrb[44].mxu1 %vm11174_vm11, %v10248_v61  ;;  %v5949_v61 = vsel %vm11178_vm9, -inf, %v7919_v17  ;;  %v6171_v20 = vmax.f32 %v5946_v46, %v6077_v14  ;;  %v6240_v33 = vsel %vm6187_vm4, %v6238_v19, %v11185_v38  ;;  %vm11192_vm11 = vmmov %vm11165_vm1  ;;  %v7923_v14 = vld [vmem:[#allocation2 + $0x168] sm:$0xff]  ;;  %v7924_v38 = vld [vmem:[#allocation2 + $0x180] sm:$0xff] }
 0x4cb   : > { %7717 = vmatprep.mubr.msk.f32.mxu1 %vm11175_vm7, %v6388_v52  ;;  %v6080_v51 = vrot.slane %v5949_v61, 1  ;;  %v6243_v16 = vrot.slane %v5949_v61, 2  ;;  %v11186_v52 = vrot.slane %v10341_v39, 1  ;;  %v6366_v58 = vmax.f32 %v6330_v29, %v6332_v63  ;;  %vm11193_vm7 = vmmov %vm11165_vm1 }
 0x4cc   : > { %v6334_v25 = vmax.f32 %v6171_v20, %v6240_v33  ;;  %v6396_v43 = vmax.f32 %v6364_v56, %v6332_v63  ;;  %v11194_v29 = vrot.slane %v10358_v24, 2  ;;  %vm11196_vm9 = vmmov %vm11153_vm0 }
 0x4cd   : > { %v6082_v34 = vsel %vm6024_vm6, %v6080_v51, %v11186_v52  ;;  %v5961_v19 = vsel %vm11196_vm9, -inf, %v7923_v14 }
 0x4ce   : > { %7718 = vmatmul.mubr.msk.f32.gmra.mrb[46].mxu1 %vm11179_vm3, %v10265_v1  ;;  %v5952_v1 = vsel %vm11183_vm10, -inf, %v7920_v47  ;;  %v6173_v46 = vmax.f32 %v5949_v61, %v6082_v34  ;;  %v6368_v17 = vmax.f32 %v6332_v63, %v6334_v25  ;;  %vm11197_vm3 = vmmov %vm11165_vm1  ;;  %v11199_v47 = vrot.slane %v10377_v10, 2 }
 0x4cf   : > { %7720 = vmatprep.mubr.msk.f32.mxu1 %vm11180_vm15, %v6390_v59  ;;  %v6085_v3 = vrot.slane %v5952_v1, 1  ;;  %v11189_v59 = vrot.slane %v10341_v39, 2  ;;  %v6398_v39 = vmax.f32 %v6366_v58, %v6334_v25  ;;  %vm11198_vm15 = vmmov %vm11165_vm1  ;;  %v6258_v63 = vrot.slane %v5958_v23, 2 }
 0x4d0   : > { %v6100_v56 = vrot.slane %v5961_v19, 1  ;;  %vm11201_vm10 = vmmov %vm11153_vm0  ;;  %v11203_v34 = vrot.slane %v10382_v60, 2 }
 0x4d1   : > { %v6245_v8 = vsel %vm6187_vm4, %v6243_v16, %v11189_v59  ;;  %v6087_v53 = vsel %vm6024_vm6, %v6085_v3, %v11190_v13 }
 0x4d2   : > { %7721 = vmatmul.mubr.msk.f32.gmra.mrb[48].mxu1 %vm11165_vm1, %v10284_v31  ;;  %v5955_v31 = vsel %vm11153_vm0, -inf, %v7921_v0  ;;  %v6175_v61 = vmax.f32 %v5952_v1, %v6087_v53  ;;  %v6260_v3 = vsel %vm6187_vm4, %v6258_v63, %v11203_v34  ;;  %v11204_v0 = vrot.slane %v10412_v45, 1  ;;  %vm11205_vm0 = vmmov %vm11165_vm1 }
 0x4d3   : > { %7723 = vmatprep.mubr.msk.f32.mxu1 %vm11184_vm5, %v6392_v2  ;;  %v6090_v42 = vrot.slane %v5955_v31, 1  ;;  %v11195_v2 = vrot.slane %v10377_v10, 1  ;;  %v6253_v55 = vrot.slane %v5955_v31, 2  ;;  %vm11202_vm5 = vmmov %vm11165_vm1 }
 0x4d4   : > { %vm11210_vm8 = vmmov %vm11205_vm0 }
 0x4d5   : > { %v7678_v21 = vpop.f32.mrb[20].mxu1  ;;  %v6092_v50 = vsel %vm6024_vm6, %v6090_v42, %v11195_v2  ;;  %vm11216_vm9 = vmmov %vm11205_vm0 }
 0x4d6   : > { %7724 = vmatmul.mubr.msk.f32.gmra.mrb[50].mxu1 %vm11187_vm2, %v10303_v62  ;;  %v5791_v44 = vadd.f32 %v7678_v21, %v10157_v11  ;;  %v5785_v32 = vpop.f32.mrb[21].mxu1  ;;  %v6248_v62 = vrot.slane %v5952_v1, 2  ;;  %v6177_v51 = vmax.f32 %v5955_v31, %v6092_v50  ;;  %v6255_v1 = vsel %vm6187_vm4, %v6253_v55, %v11199_v47  ;;  %vm11206_vm2 = vmmov %vm11205_vm0 }
 0x4d7   : > { %7726 = vmatprep.mubr.msk.f32.mxu1 %vm11188_vm13, %v6394_v30  ;;  %v5786_v15 = vadd.f32 %v10157_v11, %v5785_v32  ;;  %v6336_v11 = vmax.f32 %v6173_v46, %v6245_v8  ;;  %v11200_v30 = vrot.slane %v10382_v60, 1  ;;  %v6102_v31 = vsel %vm6024_vm6, %v6100_v56, %v11204_v0  ;;  %vm11209_vm13 = vmmov %vm11205_vm0 }
 0x4d8   : > { %v5897_v9 = vmax.f32 %v5791_v44, 0.0  ;;  %v6250_v4 = vsel %vm6187_vm4, %v6248_v62, %v11194_v29  ;;  %v6340_v16 = vmax.f32 %v6177_v51, %v6255_v1  ;;  %v6263_v21 = vrot.slane %v5961_v19, 2 }
 0x4d9   : > { %v5896_v12 = vmax.f32 %v5786_v15, 0.0  ;;  %v6400_v22 = vmax.f32 %v6368_v17, %v6336_v11  ;;  %v6338_v28 = vmax.f32 %v6175_v61, %v6250_v4  ;;  %v6370_v24 = vmax.f32 %v6334_v25, %v6336_v11 }
 0x4da   : > { %7727 = vmatmul.mubr.msk.f32.gmra.mrb[52].mxu1 %vm11192_vm11, %v10321_v49  ;;  %6934 = vrot.lane.b32.xlu0 %v5897_v9, %s8009_s20  ;;  %v6095_v49 = vrot.slane %v5958_v23, 1  ;;  %v6181_v44 = vmax.f32 %v5961_v19, %v6102_v31  ;;  %v11207_v32 = vrot.slane %v10412_v45, 2  ;;  %v10684_v45 = vld [vmem:[%s10989_s4] ss:$0 sm:$0xff]  ;;  %v11211_v9 = vrot.slane %v10427_v40, 2  ;;  %vm11213_vm11 = vmmov %vm11205_vm0 }
 0x4db   : > { %7729 = vmatprep.mubr.msk.f32.mxu1 %vm11193_vm7, %v6396_v43  ;;  %6932 = vrot.lane.b32.xlu1 %v5896_v12, %s8009_s20  ;;  %v6402_v33 = vmax.f32 %v6370_v24, %v6338_v28  ;;  %v6372_v10 = vmax.f32 %v6336_v11, %v6338_v28  ;;  %v6374_v58 = vmax.f32 %v6338_v28, %v6340_v16  ;;  %v11208_v43 = vrot.slane %v10427_v40, 1  ;;  %vm11215_vm7 = vmmov %vm11205_vm0 }
 0x4dc   : > { %v6097_v20 = vsel %vm6024_vm6, %v6095_v49, %v11200_v30  ;;  %v6265_v60 = vsel %vm6187_vm4, %v6263_v21, %v11207_v32 }
 0x4dd   : > { %v6179_v52 = vmax.f32 %v5958_v23, %v6097_v20  ;;  %v6344_v15 = vmax.f32 %v6181_v44, %v6265_v60 }
 0x4de   : > { %7730 = vmatmul.mubr.msk.f32.gmra.mrb[54].mxu1 %vm11197_vm3, %v10339_v41  ;;  %v5964_v41 = vsel %vm11201_vm10, -inf, %v7924_v38  ;;  %vm11217_vm3 = vmmov %vm11205_vm0 }
 0x4df   : > { %7732 = vmatprep.mubr.msk.f32.mxu1 %vm11198_vm15, %v6398_v39  ;;  %v6105_v7 = vrot.slane %v5964_v41, 1  ;;  %v6342_v25 = vmax.f32 %v6179_v52, %v6260_v3  ;;  %v6268_v59 = vrot.slane %v5964_v41, 2  ;;  %vm11218_vm15 = vmmov %vm11205_vm0 }
 0x4e0   : > { %vm11220_vm10 = vmmov %vm11205_vm0 }
 0x4e1   : > { %v6107_v46 = vsel %vm6024_vm6, %v6105_v7, %v11208_v43  ;;  %v6376_v13 = vmax.f32 %v6340_v16, %v6342_v25  ;;  %v6270_v18 = vsel %vm6187_vm4, %v6268_v59, %v11211_v9  ;;  %vm11212_vm6 = vmmov %vm11205_vm0  ;;  %v6378_v17 = vmax.f32 %v6342_v25, %v6344_v15 }
 0x4e2   : > { %7733 = vmatmul.mubr.msk.f32.gmra.mrb[56].mxu1 %vm11165_vm1, %v10347_v48  ;;  %v6404_v48 = vmax.f32 %v6372_v10, %v6340_v16  ;;  %v6183_v53 = vmax.f32 %v5964_v41, %v6107_v46  ;;  %vm11214_vm4 = vmmov %vm11205_vm0 }
 0x4e3   : > { %7735 = vmatprep.mubr.msk.f32.mxu1 %vm11202_vm5, %v6400_v22  ;;  %v6408_v39 = vmax.f32 %v6376_v13, %v6344_v15  ;;  %vm11221_vm1 = vmmov %vm11205_vm0 }
 0x4e4   : > { %v6346_v11 = vmax.f32 %v6183_v53, %v6270_v18 }
 0x4e6   : > { %7736 = vmatmul.mubr.msk.f32.gmra.mrb[58].mxu1 %vm11205_vm0, %v10370_v36  ;;  %v6406_v36 = vmax.f32 %v6374_v58, %v6342_v25  ;;  %v6410_v40 = vmax.f32 %v6378_v17, %v6346_v11  ;;  %v6380_v61 = vmax.f32 %v6344_v15, %v6346_v11 }
 0x4e7   : > { %7738 = vmatprep.mubr.msk.f32.mxu1 %vm11206_vm2, %v6402_v33 }
 0x4e8   : > { %v6412_v4 = vmax.f32 %v6380_v61, %v10174_v27 }
 0x4ea   : > { %7739 = vmatmul.mubr.msk.f32.gmra.mrb[60].mxu1 %vm11209_vm13, %v10388_v6  ;;  %v7681_v8 = vpop.f32.mrb[22].mxu1 }
 0x4eb   : > { %7741 = vmatprep.mubr.msk.f32.mxu1 %vm11210_vm8, %v6404_v48  ;;  %v5801_v62 = vadd.f32 %v10684_v45, %v7681_v8  ;;  %v5795_v42 = vpop.f32.mrb[23].mxu1 }
 0x4ec   : > { %v5796_v6 = vadd.f32 %v10684_v45, %v5795_v42 }
 0x4ed   : > { %v5899_v23 = vmax.f32 %v5801_v62, 0.0 }
 0x4ee   : > { %7742 = vmatmul.mubr.msk.f32.gmra.mrb[62].mxu1 %vm11212_vm6, %v10410_v35  ;;  %v5898_v12 = vmax.f32 %v5796_v6, 0.0 }
 0x4ef   : > { %7744 = vmatprep.mubr.msk.f32.mxu1 %vm11213_vm11, %v6406_v36  ;;  %6938 = vrot.lane.b32.xlu0 %v5899_v23, %s8009_s20 }
 0x4f0   : > { %6936 = vrot.lane.b32.xlu1 %v5898_v12, %s8009_s20 }
 0x4f2   : > { %7745 = vmatmul.mubr.msk.f32.gmra.mrb[64].mxu1 %vm11214_vm4, %v10417_v5  ;;  %v11219_v5 = vmax.f32 %v10432_v57, %v10447_v37 }
 0x4f3   : > { %7747 = vmatprep.mubr.msk.f32.mxu1 %vm11215_vm7, %v6408_v39 }
 0x4f4   : > { %v6919_v29 = vpop.permute.xlu0 %6918  ;;  %v6413_v2 = vmax.f32 %v11219_v5, %v10174_v27 }
 0x4f5   : > { %7010 = vst.msk [vmem:[%s8515_s13 + $0x28] sm:$0xff] %vm7004_vm12, %v6919_v29  ;;  %v6917_v35 = vpop.permute.xlu1 %6916 }
 0x4f6   : > { %7748 = vmatmul.mubr.msk.f32.gmra.mrb[66].mxu1 %vm11216_vm9, %v10439_v26  ;;  %7009 = vst.msk [vmem:[%s8515_s13 + $0x20] sm:$0xff] %vm7004_vm12, %v6917_v35 }
 0x4f7   : > { %7750 = vmatprep.mubr.msk.f32.mxu1 %vm11217_vm3, %v6410_v40 }
 0x4fa   : > { %7751 = vmatmul.mubr.msk.f32.gmra.mrb[68].mxu1 %vm11218_vm15, %v10453_v54 }
 0x4fb   : > { %7753 = vmatprep.mubr.msk.f32.mxu1 %vm11220_vm10, %v6412_v4  ;;  %v10776_v4 = vld [vmem:[%s10991_s6] ss:$0 sm:$0xff] }
 0x4fe   : > { %7754 = vmatmul.mubr.msk.f32.gmra.mrb[70].mxu1 %vm11221_vm1, %v6413_v2 }
 0x501   : > { %v7684_v26 = vpop.f32.mrb[24].mxu1 }
 0x502   : > { %v5811_v50 = vadd.f32 %v10684_v45, %v7684_v26  ;;  %v5805_v55 = vpop.f32.mrb[25].mxu1 }
 0x503   : > { %v5806_v49 = vadd.f32 %v10684_v45, %v5805_v55 }
 0x504   : > { %v5901_v14 = vmax.f32 %v5811_v50, 0.0 }
 0x505   : > { %v5900_v19 = vmax.f32 %v5806_v49, 0.0 }
 0x506   : > { %6942 = vrot.lane.b32.xlu0 %v5901_v14, %s8009_s20 }
 0x507   : > { %6940 = vrot.lane.b32.xlu1 %v5900_v19, %s8009_s20 }
 0x509   : > { %v6923_v57 = vpop.permute.xlu0 %6922 }
 0x50a   : > { %7012 = vst.msk [vmem:[%s8515_s13 + $0x38] sm:$0xff] %vm7004_vm12, %v6923_v57  ;;  %v6921_v27 = vpop.permute.xlu1 %6920 }
 0x50b   : > { %7011 = vst.msk [vmem:[%s8515_s13 + $0x30] sm:$0xff] %vm7004_vm12, %v6921_v27 }
 0x516   : > { %v7687_v37 = vpop.f32.mrb[26].mxu1 }
 0x517   : > { %v5821_v54 = vadd.f32 %v10684_v45, %v7687_v37  ;;  %v5815_v22 = vpop.f32.mrb[27].mxu1 }
 0x518   : > { %v5816_v28 = vadd.f32 %v10684_v45, %v5815_v22 }
 0x519   : > { %v5903_v24 = vmax.f32 %v5821_v54, 0.0 }
 0x51a   : > { %v5902_v51 = vmax.f32 %v5816_v28, 0.0 }
 0x51b   : > { %6946 = vrot.lane.b32.xlu0 %v5903_v24, %s8009_s20 }
 0x51c   : > { %6944 = vrot.lane.b32.xlu1 %v5902_v51, %s8009_s20 }
 0x520   : > { %v6927_v47 = vpop.permute.xlu0 %6926 }
 0x521   : > { %7014 = vst.msk [vmem:[%s8515_s13 + $0x48] sm:$0xff] %vm7004_vm12, %v6927_v47  ;;  %v6925_v1 = vpop.permute.xlu1 %6924 }
 0x522   : > { %7013 = vst.msk [vmem:[%s8515_s13 + $0x40] sm:$0xff] %vm7004_vm12, %v6925_v1 }
 0x52d   : > { %v7690_v30 = vpop.f32.mrb[28].mxu1 }
 0x52e   : > { %v5831_v20 = vadd.f32 %v10684_v45, %v7690_v30  ;;  %v5825_v63 = vpop.f32.mrb[29].mxu1 }
 0x52f   : > { %v5826_v56 = vadd.f32 %v10684_v45, %v5825_v63 }
 0x530   : > { %v5905_v38 = vmax.f32 %v5831_v20, 0.0 }
 0x531   : > { %v5904_v41 = vmax.f32 %v5826_v56, 0.0 }
 0x532   : > { %6950 = vrot.lane.b32.xlu0 %v5905_v38, %s8009_s20 }
 0x533   : > { %6948 = vrot.lane.b32.xlu1 %v5904_v41, %s8009_s20 }
 0x535   : > { %v6931_v33 = vpop.permute.xlu0 %6930 }
 0x536   : > { %7016 = vst.msk [vmem:[%s8515_s13 + $0x58] sm:$0xff] %vm7004_vm12, %v6931_v33  ;;  %v6929_v16 = vpop.permute.xlu1 %6928 }
 0x537   : > { %7015 = vst.msk [vmem:[%s8515_s13 + $0x50] sm:$0xff] %vm7004_vm12, %v6929_v16 }
 0x542   : > { %v7693_v10 = vpop.f32.mrb[30].mxu1 }
 0x543   : > { %v5841_v52 = vadd.f32 %v10684_v45, %v7693_v10  ;;  %v5835_v34 = vpop.f32.mrb[31].mxu1 }
 0x544   : > { %v5836_v3 = vadd.f32 %v10684_v45, %v5835_v34 }
 0x545   : > { %v5907_v0 = vmax.f32 %v5841_v52, 0.0 }
 0x546   : > { %v5906_v31 = vmax.f32 %v5836_v3, 0.0 }
 0x547   : > { %6954 = vrot.lane.b32.xlu0 %v5907_v0, %s8009_s20 }
 0x548   : > { %6952 = vrot.lane.b32.xlu1 %v5906_v31, %s8009_s20 }
 0x54c   : > { %v6935_v21 = vpop.permute.xlu0 %6934 }
 0x54d   : > { %7018 = vst.msk [vmem:[%s8515_s13 + $0x68] sm:$0xff] %vm7004_vm12, %v6935_v21  ;;  %v6933_v7 = vpop.permute.xlu1 %6932 }
 0x54e   : > { %7017 = vst.msk [vmem:[%s8515_s13 + $0x60] sm:$0xff] %vm7004_vm12, %v6933_v7 }
 0x559   : > { %v7696_v48 = vpop.f32.mrb[32].mxu1 }
 0x55a   : > { %v5851_v25 = vadd.f32 %v10684_v45, %v7696_v48  ;;  %v5845_v58 = vpop.f32.mrb[33].mxu1 }
 0x55b   : > { %v5846_v44 = vadd.f32 %v10684_v45, %v5845_v58 }
 0x55c   : > { %v5909_v32 = vmax.f32 %v5851_v25, 0.0 }
 0x55d   : > { %v5908_v60 = vmax.f32 %v5846_v44, 0.0 }
 0x55e   : > { %6958 = vrot.lane.b32.xlu0 %v5909_v32, %s8009_s20 }
 0x55f   : > { %6956 = vrot.lane.b32.xlu1 %v5908_v60, %s8009_s20 }
 0x561   : > { %v6939_v43 = vpop.permute.xlu0 %6938 }
 0x562   : > { %7020 = vst.msk [vmem:[%s8515_s13 + $0x78] sm:$0xff] %vm7004_vm12, %v6939_v43  ;;  %v6937_v46 = vpop.permute.xlu1 %6936 }
 0x563   : > { %7019 = vst.msk [vmem:[%s8515_s13 + $0x70] sm:$0xff] %vm7004_vm12, %v6937_v46 }
 0x56e   : > { %v7699_v59 = vpop.f32.mrb[34].mxu1 }
 0x56f   : > { %v5861_v8 = vadd.f32 %v10684_v45, %v7699_v59  ;;  %v5855_v36 = vpop.f32.mrb[35].mxu1 }
 0x570   : > { %v5856_v15 = vadd.f32 %v10684_v45, %v5855_v36 }
 0x571   : > { %v5911_v13 = vmax.f32 %v5861_v8, 0.0 }
 0x572   : > { %v5910_v53 = vmax.f32 %v5856_v15, 0.0 }
 0x573   : > { %6962 = vrot.lane.b32.xlu0 %v5911_v13, %s8009_s20 }
 0x574   : > { %6960 = vrot.lane.b32.xlu1 %v5910_v53, %s8009_s20 }
 0x578   : > { %v6943_v62 = vpop.permute.xlu0 %6942 }
 0x579   : > { %7022 = vst.msk [vmem:[%s8515_s13 + $0x88] sm:$0xff] %vm7004_vm12, %v6943_v62  ;;  %v6941_v42 = vpop.permute.xlu1 %6940 }
 0x57a   : > { %7021 = vst.msk [vmem:[%s8515_s13 + $0x80] sm:$0xff] %vm7004_vm12, %v6941_v42 }
 0x585   : > { %v7702_v9 = vpop.f32.mrb[36].mxu1 }
 0x586   : > { %v5871_v18 = vadd.f32 %v10684_v45, %v7702_v9  ;;  %v5865_v6 = vpop.f32.mrb[37].mxu1 }
 0x587   : > { %v5866_v23 = vadd.f32 %v10684_v45, %v5865_v6 }
 0x588   : > { %v5913_v12 = vmax.f32 %v5871_v18, 0.0 }
 0x589   : > { %v5912_v39 = vmax.f32 %v5866_v23, 0.0 }
 0x58a   : > { %6966 = vrot.lane.b32.xlu0 %v5913_v12, %s8009_s20 }
 0x58b   : > { %6964 = vrot.lane.b32.xlu1 %v5912_v39, %s8009_s20 }
 0x58d   : > { %v6947_v11 = vpop.permute.xlu0 %6946 }
 0x58e   : > { %7024 = vst.msk [vmem:[%s8515_s13 + $0x98] sm:$0xff] %vm7004_vm12, %v6947_v11  ;;  %v6945_v17 = vpop.permute.xlu1 %6944 }
 0x58f   : > { %7023 = vst.msk [vmem:[%s8515_s13 + $0x90] sm:$0xff] %vm7004_vm12, %v6945_v17 }
 0x591   : > { %v7705_v40 = vpop.f32.mrb[38].mxu1 }
 0x592   : > { %v5881_v61 = vadd.f32 %v10684_v45, %v7705_v40  ;;  %v5875_v29 = vpop.f32.mrb[39].mxu1 }
 0x593   : > { %v5876_v35 = vadd.f32 %v10684_v45, %v5875_v29 }
 0x594   : > { %v5915_v5 = vmax.f32 %v5881_v61, 0.0 }
 0x595   : > { %v5914_v2 = vmax.f32 %v5876_v35, 0.0  ;;  %v7710_v26 = vpop.f32.mrb[40].mxu1 }
 0x596   : > { %v6593_v50 = vadd.f32 %v7710_v26, %v10776_v4  ;;  %6970 = vrot.lane.b32.xlu0 %v5915_v5, %s8009_s20  ;;  %v6587_v55 = vpop.f32.mrb[41].mxu1 }
 0x597   : > { %v6588_v49 = vadd.f32 %v10776_v4, %v6587_v55  ;;  %6968 = vrot.lane.b32.xlu1 %v5914_v2, %s8009_s20 }
 0x598   : > { %v6747_v14 = vmax.f32 %v6593_v50, 0.0 }
 0x599   : > { %v6746_v19 = vmax.f32 %v6588_v49, 0.0  ;;  %v7713_v45 = vpop.f32.mrb[42].mxu1 }
 0x59a   : > { %v6603_v57 = vadd.f32 %v7713_v45, %v10776_v4  ;;  %7071 = vrot.lane.b32.xlu0 %v6747_v14, %s8013_s17  ;;  %v6597_v27 = vpop.f32.mrb[43].mxu1 }
 0x59b   : > { %v6598_v37 = vadd.f32 %v10776_v4, %v6597_v27  ;;  %7069 = vrot.lane.b32.xlu1 %v6746_v19, %s8013_s17 }
 0x59c   : > { %v6749_v54 = vmax.f32 %v6603_v57, 0.0 }
 0x59d   : > { %v6748_v22 = vmax.f32 %v6598_v37, 0.0  ;;  %v7716_v28 = vpop.f32.mrb[44].mxu1 }
 0x59e   : > { %v6613_v24 = vadd.f32 %v7716_v28, %v10776_v4  ;;  %7075 = vrot.lane.b32.xlu0 %v6749_v54, %s8013_s17  ;;  %v6607_v51 = vpop.f32.mrb[45].mxu1 }
 0x59f   : > { %v6608_v47 = vadd.f32 %v10776_v4, %v6607_v51  ;;  %7073 = vrot.lane.b32.xlu1 %v6748_v22, %s8013_s17 }
 0x5a0   : > { %v6751_v1 = vmax.f32 %v6613_v24, 0.0 }
 0x5a1   : > { %v6750_v30 = vmax.f32 %v6608_v47, 0.0  ;;  %v7719_v20 = vpop.f32.mrb[46].mxu1 }
 0x5a2   : > { %v6623_v63 = vadd.f32 %v7719_v20, %v10776_v4  ;;  %7079 = vrot.lane.b32.xlu0 %v6751_v1, %s8013_s17  ;;  %v6617_v56 = vpop.f32.mrb[47].mxu1 }
 0x5a3   : > { %v6618_v38 = vadd.f32 %v10776_v4, %v6617_v56  ;;  %7077 = vrot.lane.b32.xlu1 %v6750_v30, %s8013_s17 }
 0x5a4   : > { %v6753_v41 = vmax.f32 %v6623_v63, 0.0  ;;  %v6951_v16 = vpop.permute.xlu0 %6950 }
 0x5a5   : > { %v6752_v33 = vmax.f32 %v6618_v38, 0.0  ;;  %v7722_v10 = vpop.f32.mrb[48].mxu1  ;;  %7026 = vst.msk [vmem:[%s8515_s13 + $0xa8] sm:$0xff] %vm7004_vm12, %v6951_v16  ;;  %v6949_v34 = vpop.permute.xlu1 %6948 }
 0x5a6   : > { %v6633_v52 = vadd.f32 %v7722_v10, %v10776_v4  ;;  %7083 = vrot.lane.b32.xlu0 %v6753_v41, %s8013_s17  ;;  %v6627_v3 = vpop.f32.mrb[49].mxu1  ;;  %7025 = vst.msk [vmem:[%s8515_s13 + $0xa0] sm:$0xff] %vm7004_vm12, %v6949_v34 }
 0x5a7   : > { %v6628_v0 = vadd.f32 %v10776_v4, %v6627_v3  ;;  %7081 = vrot.lane.b32.xlu1 %v6752_v33, %s8013_s17 }
 0x5a8   : > { %v6755_v31 = vmax.f32 %v6633_v52, 0.0 }
 0x5a9   : > { %v6754_v21 = vmax.f32 %v6628_v0, 0.0  ;;  %v7725_v7 = vpop.f32.mrb[50].mxu1 }
 0x5aa   : > { %v6643_v48 = vadd.f32 %v7725_v7, %v10776_v4  ;;  %7087 = vrot.lane.b32.xlu0 %v6755_v31, %s8013_s17  ;;  %v6637_v25 = vpop.f32.mrb[51].mxu1 }
 0x5ab   : > { %v6638_v58 = vadd.f32 %v10776_v4, %v6637_v25  ;;  %7085 = vrot.lane.b32.xlu1 %v6754_v21, %s8013_s17 }
 0x5ac   : > { %v6757_v44 = vmax.f32 %v6643_v48, 0.0 }
 0x5ad   : > { %v6756_v32 = vmax.f32 %v6638_v58, 0.0  ;;  %v7728_v60 = vpop.f32.mrb[52].mxu1 }
 0x5ae   : > { %v6653_v43 = vadd.f32 %v7728_v60, %v10776_v4  ;;  %7091 = vrot.lane.b32.xlu0 %v6757_v44, %s8013_s17  ;;  %v6647_v46 = vpop.f32.mrb[53].mxu1 }
 0x5af   : > { %v6648_v59 = vadd.f32 %v10776_v4, %v6647_v46  ;;  %7089 = vrot.lane.b32.xlu1 %v6756_v32, %s8013_s17 }
 0x5b0   : > { %v6759_v8 = vmax.f32 %v6653_v43, 0.0 }
 0x5b1   : > { %v6758_v36 = vmax.f32 %v6648_v59, 0.0  ;;  %v7731_v15 = vpop.f32.mrb[54].mxu1 }
 0x5b2   : > { %v6663_v13 = vadd.f32 %v7731_v15, %v10776_v4  ;;  %7095 = vrot.lane.b32.xlu0 %v6759_v8, %s8013_s17  ;;  %v6657_v53 = vpop.f32.mrb[55].mxu1 }
 0x5b3   : > { %v6658_v62 = vadd.f32 %v10776_v4, %v6657_v53  ;;  %7093 = vrot.lane.b32.xlu1 %v6758_v36, %s8013_s17 }
 0x5b4   : > { %v6761_v42 = vmax.f32 %v6663_v13, 0.0 }
 0x5b5   : > { %v6760_v9 = vmax.f32 %v6658_v62, 0.0  ;;  %v7734_v18 = vpop.f32.mrb[56].mxu1 }
 0x5b6   : > { %v6673_v6 = vadd.f32 %v7734_v18, %v10776_v4  ;;  %7099 = vrot.lane.b32.xlu0 %v6761_v42, %s8013_s17  ;;  %v6667_v23 = vpop.f32.mrb[57].mxu1 }
 0x5b7   : > { %v6668_v12 = vadd.f32 %v10776_v4, %v6667_v23  ;;  %7097 = vrot.lane.b32.xlu1 %v6760_v9, %s8013_s17 }
 0x5b8   : > { %v6763_v39 = vmax.f32 %v6673_v6, 0.0 }
 0x5b9   : > { %v6762_v11 = vmax.f32 %v6668_v12, 0.0  ;;  %v7737_v17 = vpop.f32.mrb[58].mxu1  ;;  %v6955_v40 = vpop.permute.xlu0 %6954 }
 0x5ba   : > { %v6683_v61 = vadd.f32 %v7737_v17, %v10776_v4  ;;  %7103 = vrot.lane.b32.xlu0 %v6763_v39, %s8013_s17  ;;  %v6677_v29 = vpop.f32.mrb[59].mxu1  ;;  %7028 = vst.msk [vmem:[%s8515_s13 + $0xb8] sm:$0xff] %vm7004_vm12, %v6955_v40  ;;  %v6953_v35 = vpop.permute.xlu1 %6952 }
 0x5bb   : > { %v6678_v5 = vadd.f32 %v10776_v4, %v6677_v29  ;;  %7101 = vrot.lane.b32.xlu1 %v6762_v11, %s8013_s17  ;;  %7027 = vst.msk [vmem:[%s8515_s13 + $0xb0] sm:$0xff] %vm7004_vm12, %v6953_v35 }
 0x5bc   : > { %v6765_v2 = vmax.f32 %v6683_v61, 0.0 }
 0x5bd   : > { %v6764_v26 = vmax.f32 %v6678_v5, 0.0  ;;  %v7740_v50 = vpop.f32.mrb[60].mxu1 }
 0x5be   : > { %v6693_v55 = vadd.f32 %v7740_v50, %v10776_v4  ;;  %7107 = vrot.lane.b32.xlu0 %v6765_v2, %s8013_s17  ;;  %v6687_v49 = vpop.f32.mrb[61].mxu1 }
 0x5bf   : > { %v6688_v14 = vadd.f32 %v10776_v4, %v6687_v49  ;;  %7105 = vrot.lane.b32.xlu1 %v6764_v26, %s8013_s17 }
 0x5c0   : > { %v6767_v19 = vmax.f32 %v6693_v55, 0.0 }
 0x5c1   : > { %v6766_v45 = vmax.f32 %v6688_v14, 0.0  ;;  %v7743_v57 = vpop.f32.mrb[62].mxu1 }
 0x5c2   : > { %v6703_v27 = vadd.f32 %v7743_v57, %v10776_v4  ;;  %7111 = vrot.lane.b32.xlu0 %v6767_v19, %s8013_s17  ;;  %v6697_v37 = vpop.f32.mrb[63].mxu1 }
 0x5c3   : > { %v6698_v54 = vadd.f32 %v10776_v4, %v6697_v37  ;;  %7109 = vrot.lane.b32.xlu1 %v6766_v45, %s8013_s17 }
 0x5c4   : > { %v6769_v22 = vmax.f32 %v6703_v27, 0.0 }
 0x5c5   : > { %v6768_v28 = vmax.f32 %v6698_v54, 0.0  ;;  %v7746_v24 = vpop.f32.mrb[64].mxu1 }
 0x5c6   : > { %v6713_v51 = vadd.f32 %v7746_v24, %v10776_v4  ;;  %7115 = vrot.lane.b32.xlu0 %v6769_v22, %s8013_s17  ;;  %v6707_v47 = vpop.f32.mrb[65].mxu1 }
 0x5c7   : > { %v6708_v1 = vadd.f32 %v10776_v4, %v6707_v47  ;;  %7113 = vrot.lane.b32.xlu1 %v6768_v28, %s8013_s17 }
 0x5c8   : > { %v6771_v30 = vmax.f32 %v6713_v51, 0.0 }
 0x5c9   : > { %v6770_v20 = vmax.f32 %v6708_v1, 0.0  ;;  %v7749_v63 = vpop.f32.mrb[66].mxu1 }
 0x5ca   : > { %v6723_v56 = vadd.f32 %v7749_v63, %v10776_v4  ;;  %7119 = vrot.lane.b32.xlu0 %v6771_v30, %s8013_s17  ;;  %v6717_v38 = vpop.f32.mrb[67].mxu1 }
 0x5cb   : > { %v6718_v41 = vadd.f32 %v10776_v4, %v6717_v38  ;;  %7117 = vrot.lane.b32.xlu1 %v6770_v20, %s8013_s17 }
 0x5cc   : > { %v6773_v33 = vmax.f32 %v6723_v56, 0.0 }
 0x5cd   : > { %v6772_v16 = vmax.f32 %v6718_v41, 0.0  ;;  %v7752_v10 = vpop.f32.mrb[68].mxu1 }
 0x5ce   : > { %v6733_v52 = vadd.f32 %v7752_v10, %v10776_v4  ;;  %7123 = vrot.lane.b32.xlu0 %v6773_v33, %s8013_s17  ;;  %v6727_v34 = vpop.f32.mrb[69].mxu1 }
 0x5cf   : > { %v6728_v3 = vadd.f32 %v10776_v4, %v6727_v34  ;;  %7121 = vrot.lane.b32.xlu1 %v6772_v16, %s8013_s17 }
 0x5d0   : > { %v6775_v0 = vmax.f32 %v6733_v52, 0.0  ;;  %v6959_v21 = vpop.permute.xlu0 %6958 }
 0x5d1   : > { %v6774_v31 = vmax.f32 %v6728_v3, 0.0  ;;  %v7755_v7 = vpop.f32.mrb[70].mxu1  ;;  %7030 = vst.msk [vmem:[%s8515_s13 + $0xc8] sm:$0xff] %vm7004_vm12, %v6959_v21  ;;  %v6957_v25 = vpop.permute.xlu1 %6956 }
 0x5d2   : > { %v6743_v48 = vadd.f32 %v7755_v7, %v10776_v4  ;;  %7127 = vrot.lane.b32.xlu0 %v6775_v0, %s8013_s17  ;;  %v6737_v58 = vpop.f32.mrb[71].mxu1  ;;  %7029 = vst.msk [vmem:[%s8515_s13 + $0xc0] sm:$0xff] %vm7004_vm12, %v6957_v25 }
 0x5d3   : > { %v6738_v44 = vadd.f32 %v10776_v4, %v6737_v58  ;;  %7125 = vrot.lane.b32.xlu1 %v6774_v31, %s8013_s17 }
 0x5d4   : > { %v6777_v32 = vmax.f32 %v6743_v48, 0.0 }
 0x5d5   : > { %v6776_v60 = vmax.f32 %v6738_v44, 0.0 }
 0x5d6   : > { %7131 = vrot.lane.b32.xlu0 %v6777_v32, %s8013_s17 }
 0x5d7   : > { %7129 = vrot.lane.b32.xlu1 %v6776_v60, %s8013_s17  ;;  %s7398_s17 = sshll.u32 %s8082_s28, 12  ;;  %s11222_s28 = sand.u32 1, %s7996_s25  }
 0x5d8   : > { %s10933_s21 = scalar_lea.hbm %s10992_s7, %s7398_s17  ;;  %s10943_s9 = scalar_lea.sflag [#allocation5], %s11222_s28 }
 0x5e5   : > { %v6963_v43 = vpop.permute.xlu0 %6962 }
 0x5e6   : > { %7032 = vst.msk [vmem:[%s8515_s13 + $0xd8] sm:$0xff] %vm7004_vm12, %v6963_v43  ;;  %v6961_v46 = vpop.permute.xlu1 %6960 }
 0x5e7   : > { %7031 = vst.msk [vmem:[%s8515_s13 + $0xd0] sm:$0xff] %vm7004_vm12, %v6961_v46 }
 0x5fc   : > { %v6967_v4 = vpop.permute.xlu0 %6966 }
 0x5fd   : > { %7034 = vst.msk [vmem:[%s8515_s13 + $0xe8] sm:$0xff] %vm7004_vm12, %v6967_v4  ;;  %v6965_v59 = vpop.permute.xlu1 %6964 }
 0x5fe   : > { %7033 = vst.msk [vmem:[%s8515_s13 + $0xe0] sm:$0xff] %vm7004_vm12, %v6965_v59 }
 0x608   : > { %v6971_v8 = vpop.permute.xlu0 %6970 }
 0x609   : > { %7036 = vst.msk [vmem:[%s8515_s13 + $0xf8] sm:$0xff] %vm7004_vm12, %v6971_v8  ;;  %v6969_v36 = vpop.permute.xlu1 %6968 }
 0x60a   : > { %7035 = vst.msk [vmem:[%s8515_s13 + $0xf0] sm:$0xff] %vm7004_vm12, %v6969_v36 }
 0x60c   : > { %v7072_v15 = vpop.permute.xlu0 %7071 }
 0x60d   : > { %7166 = vst.msk [vmem:[%s8515_s13 + $0x8] sm:$0xff] %vm4568_vm14, %v7072_v15  ;;  %v7070_v13 = vpop.permute.xlu1 %7069 }
 0x60e   : > { %7165 = vst.msk [vmem:[%s8515_s13] sm:$0xff] %vm4568_vm14, %v7070_v13 }
 0x610   : > { %v7076_v53 = vpop.permute.xlu0 %7075 }
 0x611   : > { %7168 = vst.msk [vmem:[%s8515_s13 + $0x18] sm:$0xff] %vm4568_vm14, %v7076_v53  ;;  %v7074_v62 = vpop.permute.xlu1 %7073 }
 0x612   : > { %7167 = vst.msk [vmem:[%s8515_s13 + $0x10] sm:$0xff] %vm4568_vm14, %v7074_v62 }
 0x614   : > { %v7080_v42 = vpop.permute.xlu0 %7079 }
 0x615   : > { %7170 = vst.msk [vmem:[%s8515_s13 + $0x28] sm:$0xff] %vm4568_vm14, %v7080_v42  ;;  %v7078_v9 = vpop.permute.xlu1 %7077 }
 0x616   : > { %7169 = vst.msk [vmem:[%s8515_s13 + $0x20] sm:$0xff] %vm4568_vm14, %v7078_v9 }
 0x618   : > { %v7084_v18 = vpop.permute.xlu0 %7083 }
 0x619   : > { %7172 = vst.msk [vmem:[%s8515_s13 + $0x38] sm:$0xff] %vm4568_vm14, %v7084_v18  ;;  %v7082_v6 = vpop.permute.xlu1 %7081 }
 0x61a   : > { %7171 = vst.msk [vmem:[%s8515_s13 + $0x30] sm:$0xff] %vm4568_vm14, %v7082_v6 }
 0x61c   : > { %v7088_v23 = vpop.permute.xlu0 %7087 }
 0x61d   : > { %7174 = vst.msk [vmem:[%s8515_s13 + $0x48] sm:$0xff] %vm4568_vm14, %v7088_v23  ;;  %v7086_v12 = vpop.permute.xlu1 %7085 }
 0x61e   : > { %7173 = vst.msk [vmem:[%s8515_s13 + $0x40] sm:$0xff] %vm4568_vm14, %v7086_v12 }
 0x620   : > { %v7092_v39 = vpop.permute.xlu0 %7091 }
 0x621   : > { %7176 = vst.msk [vmem:[%s8515_s13 + $0x58] sm:$0xff] %vm4568_vm14, %v7092_v39  ;;  %v7090_v11 = vpop.permute.xlu1 %7089 }
 0x622   : > { %7175 = vst.msk [vmem:[%s8515_s13 + $0x50] sm:$0xff] %vm4568_vm14, %v7090_v11 }
 0x624   : > { %v7096_v17 = vpop.permute.xlu0 %7095 }
 0x625   : > { %7178 = vst.msk [vmem:[%s8515_s13 + $0x68] sm:$0xff] %vm4568_vm14, %v7096_v17  ;;  %v7094_v40 = vpop.permute.xlu1 %7093 }
 0x626   : > { %7177 = vst.msk [vmem:[%s8515_s13 + $0x60] sm:$0xff] %vm4568_vm14, %v7094_v40 }
 0x628   : > { %v7100_v61 = vpop.permute.xlu0 %7099 }
 0x629   : > { %7180 = vst.msk [vmem:[%s8515_s13 + $0x78] sm:$0xff] %vm4568_vm14, %v7100_v61  ;;  %v7098_v29 = vpop.permute.xlu1 %7097 }
 0x62a   : > { %7179 = vst.msk [vmem:[%s8515_s13 + $0x70] sm:$0xff] %vm4568_vm14, %v7098_v29 }
 0x62c   : > { %v7104_v35 = vpop.permute.xlu0 %7103 }
 0x62d   : > { %7182 = vst.msk [vmem:[%s8515_s13 + $0x88] sm:$0xff] %vm4568_vm14, %v7104_v35  ;;  %v7102_v5 = vpop.permute.xlu1 %7101 }
 0x62e   : > { %7181 = vst.msk [vmem:[%s8515_s13 + $0x80] sm:$0xff] %vm4568_vm14, %v7102_v5 }
 0x630   : > { %v7108_v2 = vpop.permute.xlu0 %7107 }
 0x631   : > { %7184 = vst.msk [vmem:[%s8515_s13 + $0x98] sm:$0xff] %vm4568_vm14, %v7108_v2  ;;  %v7106_v26 = vpop.permute.xlu1 %7105 }
 0x632   : > { %7183 = vst.msk [vmem:[%s8515_s13 + $0x90] sm:$0xff] %vm4568_vm14, %v7106_v26 }
 0x634   : > { %v7112_v50 = vpop.permute.xlu0 %7111 }
 0x635   : > { %7186 = vst.msk [vmem:[%s8515_s13 + $0xa8] sm:$0xff] %vm4568_vm14, %v7112_v50  ;;  %v7110_v55 = vpop.permute.xlu1 %7109 }
 0x636   : > { %7185 = vst.msk [vmem:[%s8515_s13 + $0xa0] sm:$0xff] %vm4568_vm14, %v7110_v55 }
 0x638   : > { %v7116_v49 = vpop.permute.xlu0 %7115 }
 0x639   : > { %7188 = vst.msk [vmem:[%s8515_s13 + $0xb8] sm:$0xff] %vm4568_vm14, %v7116_v49  ;;  %v7114_v14 = vpop.permute.xlu1 %7113 }
 0x63a   : > { %7187 = vst.msk [vmem:[%s8515_s13 + $0xb0] sm:$0xff] %vm4568_vm14, %v7114_v14 }
 0x63c   : > { %v7120_v19 = vpop.permute.xlu0 %7119 }
 0x63d   : > { %7190 = vst.msk [vmem:[%s8515_s13 + $0xc8] sm:$0xff] %vm4568_vm14, %v7120_v19  ;;  %v7118_v45 = vpop.permute.xlu1 %7117 }
 0x63e   : > { %7189 = vst.msk [vmem:[%s8515_s13 + $0xc0] sm:$0xff] %vm4568_vm14, %v7118_v45 }
 0x640   : > { %v7124_v57 = vpop.permute.xlu0 %7123 }
 0x641   : > { %7192 = vst.msk [vmem:[%s8515_s13 + $0xd8] sm:$0xff] %vm4568_vm14, %v7124_v57  ;;  %v7122_v27 = vpop.permute.xlu1 %7121 }
 0x642   : > { %7191 = vst.msk [vmem:[%s8515_s13 + $0xd0] sm:$0xff] %vm4568_vm14, %v7122_v27 }
 0x644   : > { %v7128_v37 = vpop.permute.xlu0 %7127 }
 0x645   : > { %7194 = vst.msk [vmem:[%s8515_s13 + $0xe8] sm:$0xff] %vm4568_vm14, %v7128_v37  ;;  %v7126_v54 = vpop.permute.xlu1 %7125 }
 0x646   : > { %7193 = vst.msk [vmem:[%s8515_s13 + $0xe0] sm:$0xff] %vm4568_vm14, %v7126_v54 }
 0x648   : > { %v7132_v22 = vpop.permute.xlu0 %7131 }
 0x649   : > { %7196 = vst.msk [vmem:[%s8515_s13 + $0xf8] sm:$0xff] %vm4568_vm14, %v7132_v22  ;;  %v7130_v28 = vpop.permute.xlu1 %7129 }
 0x64a   : > { %7195 = vst.msk [vmem:[%s8515_s13 + $0xf0] sm:$0xff] %vm4568_vm14, %v7130_v28 }
 0x64b   : > { %7955 = shalt.err (!%p7952_p3)
}
 0x64c   : > { %s7956_s13 = scalar_lea.hbm %s10933_s21, 4096  ;;  %s7960_s17 = scalar_lea.hbm %s10992_s7, 8192 }
 0x64d   : > { %p7957_p4 = scmp.ne.s32.totalorder %s10933_s21, %s7956_s13  ;;  %p7961_p9 = scmp.lt.u32.totalorder %s10933_s21, %s10992_s7 }
 0x64e   : > { %p7962_p10 = scmp.lt.u32.totalorder %s7960_s17, %s7956_s13  ;;  %p7964_p12 = scmp.lt.u32.totalorder %s7956_s13, %s10933_s21 }
 0x64f   : > { %p7958_p7 = pnand %p7957_p4, %p8099_p5 }
 0x650   : > { %p7963_p11 = por %p7962_p10, %p7961_p9 }
 0x651   : > { %p7959_p8 = pneg %p7958_p7 }
 0x652   : > { %p7965_p13 = por %p7964_p12, %p7963_p11 }
 0x654   : > { %p7966_p0 = pnand %p7965_p13, %p7959_p8 }
 0x656   : > { %7969 = shalt.err (!%p7966_p0)
}
 0x657   : > { %s8020_s28 = smov 128  }
 0x658   : > { %7774 = dma.vmem_to_hbm [thread:$0]  (%p8099_p5), %s10935_s15, 4096, %s10933_s21, %s10943_s9, %s8020_s28, %s8020_s28, %s8009_s20  }
 0x659 PF: > { %p7780_p1 = scmp.ge.s32.totalorder %s8004_s27, 2  ;;  %s7226_s16 = sand.u32 1, %s7992_s24  }
 0x65a   : > { %s7227_s18 = scalar_lea.sflag [#allocation5], %s7226_s16 }
 0x65b   : > { %p7777_p2 = pnand %p7780_p1, %p8103_p6 }
 0x65d   : > { %7987 = dma.done.wait (!%p7777_p2), %s7227_s18, 4096  }
 0x65e   : > { %7989 = vsyncadd (!%p7777_p2), %s7227_s18, 4294963200  ;;  %p17_p3 = scmp.ge.s32.totalorder %s8086_s30, 4   ;;  %s11223_s24 = smov %s7996_s25 }
 0x65f   : > { %s11224_s25 = smov %s8000_s26  ;;  %s11225_s26 = smov %s8097_s10 }
 0x660   : > { %s11226_s27 = smov %s8086_s30  ;;  %19 = sbr.rel (!%p17_p3) target bundleno = 3 (0x3), region = 84 }
 0x667   :  { %7232 = vsyncpa [#allocation5], 1 }
 0x668   :  { %7234 = vsyncpa [#allocation5 + $0x1], 1 }

</bundles_post_ra>
